<compile_context>
chip_gen: v6e
topology: v6e:2x2x1
jax: 0.10.0
libtpu: 0.0.40
codegen_flags: <defaults>
</compile_context>

<pallas_src>
import numpy as np

import jax
import jax.numpy as jnp
from jax.experimental import pallas as pl
from jax.experimental.pallas import tpu as pltpu

EPS = 1e-5


# ----------------------------------------------------------------------------- kernels
def _make_conv_stats_kernel(H, W, Cin, Cout):
    HW = H * W

    def kernel(xpad_ref, w_ref, b_ref, y_ref, psum_ref, psq_ref):
        # xpad_ref: (1, H+2, W+2, Cin) bf16   w_ref: (9, Cout, Cin) bf16
        # b_ref: (Cout, 1) f32
        # y_ref: (1, Cout, H*W) f32   psum/psq_ref: (1, Cout, 1) f32
        acc = jnp.zeros((Cout, HW), jnp.float32)
        for kh in range(3):
            for kw in range(3):
                # in-kernel im2col: shifted window of the padded input, channels on lanes
                patch = xpad_ref[0, kh:kh + H, kw:kw + W, :].reshape(HW, Cin)
                # (Cout, Cin) x (HW, Cin) contracting the minor (Cin) dims -> (Cout, HW)
                acc = acc + jax.lax.dot_general(
                    w_ref[kh * 3 + kw], patch,
                    dimension_numbers=(((1,), (1,)), ((), ())),
                    preferred_element_type=jnp.float32)
        acc = acc + b_ref[...]                       # conv bias, broadcast over lanes
        y_ref[0] = acc                               # lane-dense (Cout, H*W) store
        # per-image BatchNorm partial statistics (lane reductions -> XLU)
        psum_ref[0] = jnp.sum(acc, axis=1, keepdims=True)
        psq_ref[0] = jnp.sum(acc * acc, axis=1, keepdims=True)

    return kernel


def _make_bn_relu_upsample_kernel(H, W, OH, OW, Cout):
    def kernel(y_ref, sc_ref, sh_ref, ah_ref, awt_ref, o_ref):
        # y_ref: (1, Cout*H, W) f32 ; sc/sh_ref: (Cout*H, 1) f32
        # ah_ref: (OH, H) f32 ; awt_ref: (W, OW) f32 ; o_ref: (1, Cout*OH, OW) f32
        y = jnp.maximum(y_ref[0] * sc_ref[...] + sh_ref[...], 0.0)   # BN affine + ReLU
        # W-direction interpolation for all channels at once: (Cout*H, W) @ (W, OW)
        t = jnp.dot(y, awt_ref[...], preferred_element_type=jnp.float32)
        ah = ah_ref[...]
        # H-direction interpolation per channel (static unroll, Cout small)
        for c in range(Cout):
            tc = t[c * H:(c + 1) * H, :]                              # (H, OW)
            o_ref[0, c * OH:(c + 1) * OH, :] = jnp.dot(
                ah, tc, preferred_element_type=jnp.float32)           # (OH, OW)

    return kernel


# ----------------------------------------------------------------------------- glue
def _bilinear_matrix_half_pixel(out_size, in_size):
    """Interpolation matrix (out,in) matching F.interpolate(mode='bilinear',
    align_corners=False) with out_size = 2 * in_size (half-pixel centers)."""
    scale = in_size / out_size
    i = np.arange(out_size, dtype=np.float64)
    src = np.maximum((i + 0.5) * scale - 0.5, 0.0)
    lo = np.minimum(np.floor(src).astype(np.int64), in_size - 1)
    hi = np.minimum(lo + 1, in_size - 1)
    frac = src - lo
    A = np.zeros((out_size, in_size), dtype=np.float32)
    rows = np.arange(out_size)
    A[rows, lo] += (1.0 - frac).astype(np.float32)
    A[rows, hi] += frac.astype(np.float32)
    return jnp.asarray(A)


@jax.jit
def up_sample_forward(x_nchw, params):
    w, b = params["w"], params["b"]
    gamma, beta = params["gamma"], params["beta"]
    N, Cin, H, W = x_nchw.shape
    Cout = w.shape[0]
    OH, OW = 2 * H, 2 * W
    HW = H * W
    Hp, Wp = H + 2, W + 2

    # prep: NCHW -> padded NHWC (Cin on lanes = conv contraction dim); bf16 operands
    # for the MXU, f32 accumulation happens inside the kernel.
    x_nhwc = jnp.transpose(x_nchw, (0, 2, 3, 1)).astype(jnp.float32)
    xpad = jnp.pad(x_nhwc, ((0, 0), (1, 1), (1, 1), (0, 0))).astype(jnp.bfloat16)
    # torch weight (Cout, Cin, 3, 3) -> (9, Cout, Cin), index = kh*3 + kw
    w9 = jnp.transpose(w, (2, 3, 0, 1)).reshape(9, Cout, Cin).astype(jnp.bfloat16)
    b_col = b.astype(jnp.float32).reshape(Cout, 1)

    # ---- pass 1: conv (+bias) and per-image BN partial statistics -------------------
    # TODO(synk): for very large H*W, add a second grid axis over output-row blocks
    # with a manual halo DMA (memory_space=pl.ANY + pltpu.make_async_copy); the
    # per-image block here assumes one padded image fits comfortably in VMEM.
    flops_a = 2 * N * HW * 9 * Cin * Cout
    bytes_a = (N * Hp * Wp * Cin * 2 + 9 * Cout * Cin * 2 + Cout * 4
               + N * Cout * HW * 4 + 2 * N * Cout * 4)
    y_flat, psum, psq = pl.pallas_call(
        _make_conv_stats_kernel(H, W, Cin, Cout),
        grid=(N,),
        in_specs=[
            pl.BlockSpec((1, Hp, Wp, Cin), lambda n: (n, 0, 0, 0)),
            pl.BlockSpec((9, Cout, Cin), lambda n: (0, 0, 0)),      # VMEM-resident
            pl.BlockSpec((Cout, 1), lambda n: (0, 0)),              # VMEM-resident
        ],
        out_specs=[
            pl.BlockSpec((1, Cout, HW), lambda n: (n, 0, 0)),
            pl.BlockSpec((1, Cout, 1), lambda n: (n, 0, 0)),
            pl.BlockSpec((1, Cout, 1), lambda n: (n, 0, 0)),
        ],
        out_shape=[
            jax.ShapeDtypeStruct((N, Cout, HW), jnp.float32),
            jax.ShapeDtypeStruct((N, Cout, 1), jnp.float32),
            jax.ShapeDtypeStruct((N, Cout, 1), jnp.float32),
        ],
        compiler_params=pltpu.CompilerParams(
            dimension_semantics=("parallel",),
            vmem_limit_bytes=32 * 1024 * 1024),
        cost_estimate=pl.CostEstimate(flops=flops_a, transcendentals=0,
                                      bytes_accessed=bytes_a),
    )(xpad, w9, b_col)

    # ---- BatchNorm2d (training-mode batch stats) finalize: a few scalars of glue ----
    cnt = float(N * HW)
    s = jnp.sum(psum[:, :, 0], axis=0)                     # (Cout,)
    sq = jnp.sum(psq[:, :, 0], axis=0)
    mean = s / cnt
    var = jnp.maximum(sq / cnt - mean * mean, 0.0)         # biased variance
    inv_std = jax.lax.rsqrt(var + EPS)
    scale = gamma.astype(jnp.float32) * inv_std
    shift = beta.astype(jnp.float32) - mean * scale
    scale_rows = jnp.repeat(scale, H).reshape(Cout * H, 1)  # row c*H+h -> scale[c]
    shift_rows = jnp.repeat(shift, H).reshape(Cout * H, 1)

    # bilinear (align_corners=False) interpolation matrices -- trace-time constants
    ah = _bilinear_matrix_half_pixel(OH, H)                 # (OH, H)
    awt = _bilinear_matrix_half_pixel(OW, W).T              # (W, OW)

    # (N, Cout, H*W) -> (N, Cout*H, W): same row-major bytes, metadata-only reshape
    y2 = y_flat.reshape(N, Cout * H, W)

    # ---- pass 2: BN apply + ReLU + 2x bilinear upsample, emits NCHW directly --------
    flops_b = 2 * N * Cout * (H * W * OW + OH * H * OW)
    bytes_b = (N * Cout * HW * 4 + N * Cout * OH * OW * 4
               + (W * OW + OH * H + 2 * Cout * H) * 4)
    out = pl.pallas_call(
        _make_bn_relu_upsample_kernel(H, W, OH, OW, Cout),
        grid=(N,),
        in_specs=[
            pl.BlockSpec((1, Cout * H, W), lambda n: (n, 0, 0)),
            pl.BlockSpec((Cout * H, 1), lambda n: (0, 0)),
            pl.BlockSpec((Cout * H, 1), lambda n: (0, 0)),
            pl.BlockSpec((OH, H), lambda n: (0, 0)),
            pl.BlockSpec((W, OW), lambda n: (0, 0)),
        ],
        out_specs=pl.BlockSpec((1, Cout * OH, OW), lambda n: (n, 0, 0)),
        out_shape=jax.ShapeDtypeStruct((N, Cout * OH, OW), jnp.float32),
        compiler_params=pltpu.CompilerParams(
            dimension_semantics=("parallel",),
            vmem_limit_bytes=32 * 1024 * 1024),
        cost_estimate=pl.CostEstimate(flops=flops_b, transcendentals=0,
                                      bytes_accessed=bytes_b),
    )(y2, scale_rows, shift_rows, ah, awt)

    # already NCHW layout; final reshape is metadata-only (no transpose pass)
    return out.reshape(N, Cout, OH, OW)


# ----------------------------------------------------------------------------- reference
def _reference(x, params):
    """Plain-JAX forward of the module (f32), for a loose numerical check."""
    w, b, gamma, beta = params["w"], params["b"], params["gamma"], params["beta"]
    y = jax.lax.conv_general_dilated(
        x, w, window_strides=(1, 1), padding=((1, 1), (1, 1)),
        dimension_numbers=("NCHW", "OIHW", "NCHW"))
    y = y + b[None, :, None, None]
    mean = jnp.mean(y, axis=(0, 2, 3), keepdims=True)
    var = jnp.mean((y - mean) ** 2, axis=(0, 2, 3), keepdims=True)
    y = (y - mean) * jax.lax.rsqrt(var + EPS)
    y = y * gamma[None, :, None, None] + beta[None, :, None, None]
    y = jnp.maximum(y, 0.0)
    _, _, H, W = y.shape
    Ah = _bilinear_matrix_half_pixel(2 * H, H)
    Aw = _bilinear_matrix_half_pixel(2 * W, W)
    return jnp.einsum("oh,pw,nchw->ncop", Ah, Aw, y)


if __name__ == "__main__":
    key = jax.random.PRNGKey(0)
    kx, kw_, kb_ = jax.random.split(key, 3)

    N, Cin, H, W = 2, 4, 16, 16
    Cout = 8
    x = jax.random.normal(kx, (N, Cin, H, W), jnp.float32)
    params = dict(
        w=0.05 * jax.random.normal(kw_, (Cout, Cin, 3, 3), jnp.float32),
        b=0.05 * jax.random.normal(kb_, (Cout,), jnp.float32),
        gamma=jnp.ones((Cout,), jnp.float32),   # BatchNorm2d default init
        beta=jnp.zeros((Cout,), jnp.float32),
    )

    out = up_sample_forward(x, params)
    out = jax.block_until_ready(out)

    assert out.shape == (N, Cout, 2 * H, 2 * W), out.shape
    assert bool(jnp.all(jnp.isfinite(out)))

    # loose check vs plain-JAX reference (bf16 MXU operands => generous tolerance)
    ref = _reference(x, params)
    err = float(jnp.max(jnp.abs(out - ref)))
    assert err < 1e-1, f"max abs error vs reference: {err}"

    print("KERNEL_OK")
</pallas_src>

<mosaic_0001>
module attributes {stable_mosaic.version = 11 : i64} {
  func.func @kernel(%arg0: i32, %arg1: memref<1x18x18x4xbf16, #tpu.memory_space<vmem>>, %arg2: memref<9x8x4xbf16, #tpu.memory_space<vmem>>, %arg3: memref<8x1xf32, #tpu.memory_space<vmem>>, %arg4: memref<1x8x256xf32, #tpu.memory_space<vmem>>, %arg5: memref<1x8x1xf32, #tpu.memory_space<vmem>>, %arg6: memref<1x8x1xf32, #tpu.memory_space<vmem>>) attributes {dimension_semantics = [#tpu.dimension_semantics<parallel>], iteration_bounds = array<i64: 2>, scalar_prefetch = 0 : i64, scratch_operands = 0 : i64, tpu.core_type = #tpu.core_type<tc>, window_params = [{transform_indices = @transform_0, window_bounds = array<i64: 1, 18, 18, 4>}, {pipeline_mode = #tpu.pipeline_mode<synchronous>, transform_indices = @transform_1, window_bounds = array<i64: 9, 8, 4>}, {pipeline_mode = #tpu.pipeline_mode<synchronous>, transform_indices = @transform_2, window_bounds = array<i64: 8, 1>}, {transform_indices = @transform_3, window_bounds = array<i64: 1, 8, 256>}, {transform_indices = @transform_4, window_bounds = array<i64: 1, 8, 1>}, {transform_indices = @transform_5, window_bounds = array<i64: 1, 8, 1>}]} {
    %cst = arith.constant 0.000000e+00 : f32
    %0 = vector.broadcast %cst : f32 to vector<8x256xf32>
    %c0 = arith.constant 0 : index
    %c0_0 = arith.constant 0 : index
    %c0_1 = arith.constant 0 : index
    %c0_2 = arith.constant 0 : index
    %1 = vector.load %arg1[%c0, %c0_0, %c0_1, %c0_2] : memref<1x18x18x4xbf16, #tpu.memory_space<vmem>>, vector<1x16x16x4xbf16>
    %2 = vector.shape_cast %1 : vector<1x16x16x4xbf16> to vector<16x16x4xbf16>
    %3 = vector.shape_cast %2 : vector<16x16x4xbf16> to vector<256x4xbf16>
    %c0_3 = arith.constant 0 : index
    %c0_4 = arith.constant 0 : index
    %c0_5 = arith.constant 0 : index
    %4 = vector.load %arg2[%c0_3, %c0_4, %c0_5] : memref<9x8x4xbf16, #tpu.memory_space<vmem>>, vector<1x8x4xbf16>
    %5 = vector.shape_cast %4 : vector<1x8x4xbf16> to vector<8x4xbf16>
    %cst_6 = arith.constant dense<0.000000e+00> : vector<8x256xf32>
    %6 = tpu.matmul %5, %3, %cst_6 {dimension_numbers = #tpu.dot_dimension_numbers<[1], [1], [0], [0], [0, 0, 1, 0], [], []>} : vector<8x4xbf16>, vector<256x4xbf16>, vector<8x256xf32> -> vector<8x256xf32>
    %7 = arith.addf %0, %6 : vector<8x256xf32>
    %c0_7 = arith.constant 0 : index
    %c0_8 = arith.constant 0 : index
    %c1 = arith.constant 1 : index
    %c0_9 = arith.constant 0 : index
    %8 = vector.load %arg1[%c0_7, %c0_8, %c1, %c0_9] : memref<1x18x18x4xbf16, #tpu.memory_space<vmem>>, vector<1x16x16x4xbf16>
    %9 = vector.shape_cast %8 : vector<1x16x16x4xbf16> to vector<16x16x4xbf16>
    %10 = vector.shape_cast %9 : vector<16x16x4xbf16> to vector<256x4xbf16>
    %c1_10 = arith.constant 1 : index
    %c0_11 = arith.constant 0 : index
    %c0_12 = arith.constant 0 : index
    %11 = vector.load %arg2[%c1_10, %c0_11, %c0_12] : memref<9x8x4xbf16, #tpu.memory_space<vmem>>, vector<1x8x4xbf16>
    %12 = vector.shape_cast %11 : vector<1x8x4xbf16> to vector<8x4xbf16>
    %cst_13 = arith.constant dense<0.000000e+00> : vector<8x256xf32>
    %13 = tpu.matmul %12, %10, %cst_13 {dimension_numbers = #tpu.dot_dimension_numbers<[1], [1], [0], [0], [0, 0, 1, 0], [], []>} : vector<8x4xbf16>, vector<256x4xbf16>, vector<8x256xf32> -> vector<8x256xf32>
    %14 = arith.addf %7, %13 : vector<8x256xf32>
    %c0_14 = arith.constant 0 : index
    %c0_15 = arith.constant 0 : index
    %c2 = arith.constant 2 : index
    %c0_16 = arith.constant 0 : index
    %15 = vector.load %arg1[%c0_14, %c0_15, %c2, %c0_16] : memref<1x18x18x4xbf16, #tpu.memory_space<vmem>>, vector<1x16x16x4xbf16>
    %16 = vector.shape_cast %15 : vector<1x16x16x4xbf16> to vector<16x16x4xbf16>
    %17 = vector.shape_cast %16 : vector<16x16x4xbf16> to vector<256x4xbf16>
    %c2_17 = arith.constant 2 : index
    %c0_18 = arith.constant 0 : index
    %c0_19 = arith.constant 0 : index
    %18 = vector.load %arg2[%c2_17, %c0_18, %c0_19] : memref<9x8x4xbf16, #tpu.memory_space<vmem>>, vector<1x8x4xbf16>
    %19 = vector.shape_cast %18 : vector<1x8x4xbf16> to vector<8x4xbf16>
    %cst_20 = arith.constant dense<0.000000e+00> : vector<8x256xf32>
    %20 = tpu.matmul %19, %17, %cst_20 {dimension_numbers = #tpu.dot_dimension_numbers<[1], [1], [0], [0], [0, 0, 1, 0], [], []>} : vector<8x4xbf16>, vector<256x4xbf16>, vector<8x256xf32> -> vector<8x256xf32>
    %21 = arith.addf %14, %20 : vector<8x256xf32>
    %c0_21 = arith.constant 0 : index
    %c1_22 = arith.constant 1 : index
    %c0_23 = arith.constant 0 : index
    %c0_24 = arith.constant 0 : index
    %22 = vector.load %arg1[%c0_21, %c1_22, %c0_23, %c0_24] : memref<1x18x18x4xbf16, #tpu.memory_space<vmem>>, vector<1x16x16x4xbf16>
    %23 = vector.shape_cast %22 : vector<1x16x16x4xbf16> to vector<16x16x4xbf16>
    %24 = vector.shape_cast %23 : vector<16x16x4xbf16> to vector<256x4xbf16>
    %c3 = arith.constant 3 : index
    %c0_25 = arith.constant 0 : index
    %c0_26 = arith.constant 0 : index
    %25 = vector.load %arg2[%c3, %c0_25, %c0_26] : memref<9x8x4xbf16, #tpu.memory_space<vmem>>, vector<1x8x4xbf16>
    %26 = vector.shape_cast %25 : vector<1x8x4xbf16> to vector<8x4xbf16>
    %cst_27 = arith.constant dense<0.000000e+00> : vector<8x256xf32>
    %27 = tpu.matmul %26, %24, %cst_27 {dimension_numbers = #tpu.dot_dimension_numbers<[1], [1], [0], [0], [0, 0, 1, 0], [], []>} : vector<8x4xbf16>, vector<256x4xbf16>, vector<8x256xf32> -> vector<8x256xf32>
    %28 = arith.addf %21, %27 : vector<8x256xf32>
    %c0_28 = arith.constant 0 : index
    %c1_29 = arith.constant 1 : index
    %c1_30 = arith.constant 1 : index
    %c0_31 = arith.constant 0 : index
    %29 = vector.load %arg1[%c0_28, %c1_29, %c1_30, %c0_31] : memref<1x18x18x4xbf16, #tpu.memory_space<vmem>>, vector<1x16x16x4xbf16>
    %30 = vector.shape_cast %29 : vector<1x16x16x4xbf16> to vector<16x16x4xbf16>
    %31 = vector.shape_cast %30 : vector<16x16x4xbf16> to vector<256x4xbf16>
    %c4 = arith.constant 4 : index
    %c0_32 = arith.constant 0 : index
    %c0_33 = arith.constant 0 : index
    %32 = vector.load %arg2[%c4, %c0_32, %c0_33] : memref<9x8x4xbf16, #tpu.memory_space<vmem>>, vector<1x8x4xbf16>
    %33 = vector.shape_cast %32 : vector<1x8x4xbf16> to vector<8x4xbf16>
    %cst_34 = arith.constant dense<0.000000e+00> : vector<8x256xf32>
    %34 = tpu.matmul %33, %31, %cst_34 {dimension_numbers = #tpu.dot_dimension_numbers<[1], [1], [0], [0], [0, 0, 1, 0], [], []>} : vector<8x4xbf16>, vector<256x4xbf16>, vector<8x256xf32> -> vector<8x256xf32>
    %35 = arith.addf %28, %34 : vector<8x256xf32>
    %c0_35 = arith.constant 0 : index
    %c1_36 = arith.constant 1 : index
    %c2_37 = arith.constant 2 : index
    %c0_38 = arith.constant 0 : index
    %36 = vector.load %arg1[%c0_35, %c1_36, %c2_37, %c0_38] : memref<1x18x18x4xbf16, #tpu.memory_space<vmem>>, vector<1x16x16x4xbf16>
    %37 = vector.shape_cast %36 : vector<1x16x16x4xbf16> to vector<16x16x4xbf16>
    %38 = vector.shape_cast %37 : vector<16x16x4xbf16> to vector<256x4xbf16>
    %c5 = arith.constant 5 : index
    %c0_39 = arith.constant 0 : index
    %c0_40 = arith.constant 0 : index
    %39 = vector.load %arg2[%c5, %c0_39, %c0_40] : memref<9x8x4xbf16, #tpu.memory_space<vmem>>, vector<1x8x4xbf16>
    %40 = vector.shape_cast %39 : vector<1x8x4xbf16> to vector<8x4xbf16>
    %cst_41 = arith.constant dense<0.000000e+00> : vector<8x256xf32>
    %41 = tpu.matmul %40, %38, %cst_41 {dimension_numbers = #tpu.dot_dimension_numbers<[1], [1], [0], [0], [0, 0, 1, 0], [], []>} : vector<8x4xbf16>, vector<256x4xbf16>, vector<8x256xf32> -> vector<8x256xf32>
    %42 = arith.addf %35, %41 : vector<8x256xf32>
    %c0_42 = arith.constant 0 : index
    %c2_43 = arith.constant 2 : index
    %c0_44 = arith.constant 0 : index
    %c0_45 = arith.constant 0 : index
    %43 = vector.load %arg1[%c0_42, %c2_43, %c0_44, %c0_45] : memref<1x18x18x4xbf16, #tpu.memory_space<vmem>>, vector<1x16x16x4xbf16>
    %44 = vector.shape_cast %43 : vector<1x16x16x4xbf16> to vector<16x16x4xbf16>
    %45 = vector.shape_cast %44 : vector<16x16x4xbf16> to vector<256x4xbf16>
    %c6 = arith.constant 6 : index
    %c0_46 = arith.constant 0 : index
    %c0_47 = arith.constant 0 : index
    %46 = vector.load %arg2[%c6, %c0_46, %c0_47] : memref<9x8x4xbf16, #tpu.memory_space<vmem>>, vector<1x8x4xbf16>
    %47 = vector.shape_cast %46 : vector<1x8x4xbf16> to vector<8x4xbf16>
    %cst_48 = arith.constant dense<0.000000e+00> : vector<8x256xf32>
    %48 = tpu.matmul %47, %45, %cst_48 {dimension_numbers = #tpu.dot_dimension_numbers<[1], [1], [0], [0], [0, 0, 1, 0], [], []>} : vector<8x4xbf16>, vector<256x4xbf16>, vector<8x256xf32> -> vector<8x256xf32>
    %49 = arith.addf %42, %48 : vector<8x256xf32>
    %c0_49 = arith.constant 0 : index
    %c2_50 = arith.constant 2 : index
    %c1_51 = arith.constant 1 : index
    %c0_52 = arith.constant 0 : index
    %50 = vector.load %arg1[%c0_49, %c2_50, %c1_51, %c0_52] : memref<1x18x18x4xbf16, #tpu.memory_space<vmem>>, vector<1x16x16x4xbf16>
    %51 = vector.shape_cast %50 : vector<1x16x16x4xbf16> to vector<16x16x4xbf16>
    %52 = vector.shape_cast %51 : vector<16x16x4xbf16> to vector<256x4xbf16>
    %c7 = arith.constant 7 : index
    %c0_53 = arith.constant 0 : index
    %c0_54 = arith.constant 0 : index
    %53 = vector.load %arg2[%c7, %c0_53, %c0_54] : memref<9x8x4xbf16, #tpu.memory_space<vmem>>, vector<1x8x4xbf16>
    %54 = vector.shape_cast %53 : vector<1x8x4xbf16> to vector<8x4xbf16>
    %cst_55 = arith.constant dense<0.000000e+00> : vector<8x256xf32>
    %55 = tpu.matmul %54, %52, %cst_55 {dimension_numbers = #tpu.dot_dimension_numbers<[1], [1], [0], [0], [0, 0, 1, 0], [], []>} : vector<8x4xbf16>, vector<256x4xbf16>, vector<8x256xf32> -> vector<8x256xf32>
    %56 = arith.addf %49, %55 : vector<8x256xf32>
    %c0_56 = arith.constant 0 : index
    %c2_57 = arith.constant 2 : index
    %c2_58 = arith.constant 2 : index
    %c0_59 = arith.constant 0 : index
    %57 = vector.load %arg1[%c0_56, %c2_57, %c2_58, %c0_59] : memref<1x18x18x4xbf16, #tpu.memory_space<vmem>>, vector<1x16x16x4xbf16>
    %58 = vector.shape_cast %57 : vector<1x16x16x4xbf16> to vector<16x16x4xbf16>
    %59 = vector.shape_cast %58 : vector<16x16x4xbf16> to vector<256x4xbf16>
    %c8 = arith.constant 8 : index
    %c0_60 = arith.constant 0 : index
    %c0_61 = arith.constant 0 : index
    %60 = vector.load %arg2[%c8, %c0_60, %c0_61] : memref<9x8x4xbf16, #tpu.memory_space<vmem>>, vector<1x8x4xbf16>
    %61 = vector.shape_cast %60 : vector<1x8x4xbf16> to vector<8x4xbf16>
    %cst_62 = arith.constant dense<0.000000e+00> : vector<8x256xf32>
    %62 = tpu.matmul %61, %59, %cst_62 {dimension_numbers = #tpu.dot_dimension_numbers<[1], [1], [0], [0], [0, 0, 1, 0], [], []>} : vector<8x4xbf16>, vector<256x4xbf16>, vector<8x256xf32> -> vector<8x256xf32>
    %63 = arith.addf %56, %62 : vector<8x256xf32>
    %c0_63 = arith.constant 0 : index
    %c0_64 = arith.constant 0 : index
    %64 = vector.load %arg3[%c0_63, %c0_64] : memref<8x1xf32, #tpu.memory_space<vmem>>, vector<8x1xf32>
    %65 = vector.broadcast %64 : vector<8x1xf32> to vector<8x256xf32>
    %66 = arith.addf %63, %65 : vector<8x256xf32>
    %c0_65 = arith.constant 0 : index
    %c0_66 = arith.constant 0 : index
    %c0_67 = arith.constant 0 : index
    %67 = vector.load %arg4[%c0_65, %c0_66, %c0_67] : memref<1x8x256xf32, #tpu.memory_space<vmem>>, vector<1x8x256xf32>
    %68 = vector.shape_cast %67 : vector<1x8x256xf32> to vector<8x256xf32>
    %69 = vector.shape_cast %66 : vector<8x256xf32> to vector<1x8x256xf32>
    tpu.vector_store %arg4[%c0_65, %c0_66, %c0_67], %69 {strides = array<i32>} : memref<1x8x256xf32, #tpu.memory_space<vmem>>, vector<1x8x256xf32>,
    %cst_68 = arith.constant dense<0.000000e+00> : vector<8xf32>
    %70 = vector.multi_reduction <add>, %66, %cst_68 [1] : vector<8x256xf32> to vector<8xf32>
    %71 = vector.shape_cast %70 : vector<8xf32> to vector<8x1xf32>
    %c0_69 = arith.constant 0 : index
    %c0_70 = arith.constant 0 : index
    %c0_71 = arith.constant 0 : index
    %72 = vector.load %arg5[%c0_69, %c0_70, %c0_71] : memref<1x8x1xf32, #tpu.memory_space<vmem>>, vector<1x8x1xf32>
    %73 = vector.shape_cast %72 : vector<1x8x1xf32> to vector<8x1xf32>
    %74 = vector.shape_cast %71 : vector<8x1xf32> to vector<1x8x1xf32>
    tpu.vector_store %arg5[%c0_69, %c0_70, %c0_71], %74 {strides = array<i32>} : memref<1x8x1xf32, #tpu.memory_space<vmem>>, vector<1x8x1xf32>,
    %75 = arith.mulf %66, %66 : vector<8x256xf32>
    %cst_72 = arith.constant dense<0.000000e+00> : vector<8xf32>
    %76 = vector.multi_reduction <add>, %75, %cst_72 [1] : vector<8x256xf32> to vector<8xf32>
    %77 = vector.shape_cast %76 : vector<8xf32> to vector<8x1xf32>
    %c0_73 = arith.constant 0 : index
    %c0_74 = arith.constant 0 : index
    %c0_75 = arith.constant 0 : index
    %78 = vector.load %arg6[%c0_73, %c0_74, %c0_75] : memref<1x8x1xf32, #tpu.memory_space<vmem>>, vector<1x8x1xf32>
    %79 = vector.shape_cast %78 : vector<1x8x1xf32> to vector<8x1xf32>
    %80 = vector.shape_cast %77 : vector<8x1xf32> to vector<1x8x1xf32>
    tpu.vector_store %arg6[%c0_73, %c0_74, %c0_75], %80 {strides = array<i32>} : memref<1x8x1xf32, #tpu.memory_space<vmem>>, vector<1x8x1xf32>,
    return
  }
  func.func @transform_0(%arg0: i32) -> (i32, i32, i32, i32) {
    %c0_i32 = arith.constant 0 : i32
    %c0_i32_0 = arith.constant 0 : i32
    %c0_i32_1 = arith.constant 0 : i32
    %c0_i32_2 = arith.constant 0 : i32
    return %arg0, %c0_i32, %c0_i32_0, %c0_i32_1 : i32, i32, i32, i32
  }
  func.func @transform_1(%arg0: i32) -> (i32, i32, i32) {
    %c0_i32 = arith.constant 0 : i32
    %c0_i32_0 = arith.constant 0 : i32
    %c0_i32_1 = arith.constant 0 : i32
    %c0_i32_2 = arith.constant 0 : i32
    return %c0_i32, %c0_i32_0, %c0_i32_1 : i32, i32, i32
  }
  func.func @transform_2(%arg0: i32) -> (i32, i32) {
    %c0_i32 = arith.constant 0 : i32
    %c0_i32_0 = arith.constant 0 : i32
    %c0_i32_1 = arith.constant 0 : i32
    return %c0_i32, %c0_i32_0 : i32, i32
  }
  func.func @transform_3(%arg0: i32) -> (i32, i32, i32) {
    %c0_i32 = arith.constant 0 : i32
    %c0_i32_0 = arith.constant 0 : i32
    %c0_i32_1 = arith.constant 0 : i32
    return %arg0, %c0_i32, %c0_i32_0 : i32, i32, i32
  }
  func.func @transform_4(%arg0: i32) -> (i32, i32, i32) {
    %c0_i32 = arith.constant 0 : i32
    %c0_i32_0 = arith.constant 0 : i32
    %c0_i32_1 = arith.constant 0 : i32
    return %arg0, %c0_i32, %c0_i32_0 : i32, i32, i32
  }
  func.func @transform_5(%arg0: i32) -> (i32, i32, i32) {
    %c0_i32 = arith.constant 0 : i32
    %c0_i32_0 = arith.constant 0 : i32
    %c0_i32_1 = arith.constant 0 : i32
    return %arg0, %c0_i32, %c0_i32_0 : i32, i32, i32
  }
}

module attributes {stable_mosaic.version = 11 : i64} {
  func.func @kernel(%arg0: i32, %arg1: memref<1x128x16xf32, #tpu.memory_space<vmem>>, %arg2: memref<128x1xf32, #tpu.memory_space<vmem>>, %arg3: memref<128x1xf32, #tpu.memory_space<vmem>>, %arg4: memref<32x16xf32, #tpu.memory_space<vmem>>, %arg5: memref<16x32xf32, #tpu.memory_space<vmem>>, %arg6: memref<1x256x32xf32, #tpu.memory_space<vmem>>) attributes {dimension_semantics = [#tpu.dimension_semantics<parallel>], iteration_bounds = array<i64: 2>, scalar_prefetch = 0 : i64, scratch_operands = 0 : i64, tpu.core_type = #tpu.core_type<tc>, window_params = [{transform_indices = @transform_0, window_bounds = array<i64: 1, 128, 16>}, {pipeline_mode = #tpu.pipeline_mode<synchronous>, transform_indices = @transform_1, window_bounds = array<i64: 128, 1>}, {pipeline_mode = #tpu.pipeline_mode<synchronous>, transform_indices = @transform_2, window_bounds = array<i64: 128, 1>}, {pipeline_mode = #tpu.pipeline_mode<synchronous>, transform_indices = @transform_3, window_bounds = array<i64: 32, 16>}, {pipeline_mode = #tpu.pipeline_mode<synchronous>, transform_indices = @transform_4, window_bounds = array<i64: 16, 32>}, {transform_indices = @transform_5, window_bounds = array<i64: 1, 256, 32>}]} {
    %c0 = arith.constant 0 : index
    %c0_0 = arith.constant 0 : index
    %c0_1 = arith.constant 0 : index
    %0 = vector.load %arg1[%c0, %c0_0, %c0_1] : memref<1x128x16xf32, #tpu.memory_space<vmem>>, vector<1x128x16xf32>
    %1 = vector.shape_cast %0 : vector<1x128x16xf32> to vector<128x16xf32>
    %c0_2 = arith.constant 0 : index
    %c0_3 = arith.constant 0 : index
    %2 = vector.load %arg2[%c0_2, %c0_3] : memref<128x1xf32, #tpu.memory_space<vmem>>, vector<128x1xf32>
    %3 = vector.broadcast %2 : vector<128x1xf32> to vector<128x16xf32>
    %4 = arith.mulf %1, %3 : vector<128x16xf32>
    %c0_4 = arith.constant 0 : index
    %c0_5 = arith.constant 0 : index
    %5 = vector.load %arg3[%c0_4, %c0_5] : memref<128x1xf32, #tpu.memory_space<vmem>>, vector<128x1xf32>
    %6 = vector.broadcast %5 : vector<128x1xf32> to vector<128x16xf32>
    %7 = arith.addf %4, %6 : vector<128x16xf32>
    %cst = arith.constant 0.000000e+00 : f32
    %8 = vector.broadcast %cst : f32 to vector<128x16xf32>
    %9 = arith.maximumf %7, %8 : vector<128x16xf32>
    %c0_6 = arith.constant 0 : index
    %c0_7 = arith.constant 0 : index
    %10 = vector.load %arg5[%c0_6, %c0_7] : memref<16x32xf32, #tpu.memory_space<vmem>>, vector<16x32xf32>
    %cst_8 = arith.constant dense<0.000000e+00> : vector<128x32xf32>
    %11 = tpu.matmul %9, %10, %cst_8 {dimension_numbers = #tpu.dot_dimension_numbers<[1], [0], [0], [1], [0, 0, 1, 1], [], []>} : vector<128x16xf32>, vector<16x32xf32>, vector<128x32xf32> -> vector<128x32xf32>
    %c0_9 = arith.constant 0 : index
    %c0_10 = arith.constant 0 : index
    %12 = vector.load %arg4[%c0_9, %c0_10] : memref<32x16xf32, #tpu.memory_space<vmem>>, vector<32x16xf32>
    %13 = vector.extract_strided_slice %11 {offsets = [0, 0], sizes = [16, 32], strides = [1, 1]} : vector<128x32xf32> to vector<16x32xf32>
    %cst_11 = arith.constant dense<0.000000e+00> : vector<32x32xf32>
    %14 = tpu.matmul %12, %13, %cst_11 {dimension_numbers = #tpu.dot_dimension_numbers<[1], [0], [0], [1], [0, 0, 1, 1], [], []>} : vector<32x16xf32>, vector<16x32xf32>, vector<32x32xf32> -> vector<32x32xf32>
    %c0_12 = arith.constant 0 : index
    %c0_13 = arith.constant 0 : index
    %c0_14 = arith.constant 0 : index
    %15 = vector.load %arg6[%c0_12, %c0_13, %c0_14] : memref<1x256x32xf32, #tpu.memory_space<vmem>>, vector<1x32x32xf32>
    %16 = vector.shape_cast %15 : vector<1x32x32xf32> to vector<32x32xf32>
    %17 = vector.shape_cast %14 : vector<32x32xf32> to vector<1x32x32xf32>
    tpu.vector_store %arg6[%c0_12, %c0_13, %c0_14], %17 {strides = array<i32>} : memref<1x256x32xf32, #tpu.memory_space<vmem>>, vector<1x32x32xf32>,
    %18 = vector.extract_strided_slice %11 {offsets = [16, 0], sizes = [16, 32], strides = [1, 1]} : vector<128x32xf32> to vector<16x32xf32>
    %cst_15 = arith.constant dense<0.000000e+00> : vector<32x32xf32>
    %19 = tpu.matmul %12, %18, %cst_15 {dimension_numbers = #tpu.dot_dimension_numbers<[1], [0], [0], [1], [0, 0, 1, 1], [], []>} : vector<32x16xf32>, vector<16x32xf32>, vector<32x32xf32> -> vector<32x32xf32>
    %c0_16 = arith.constant 0 : index
    %c32 = arith.constant 32 : index
    %c0_17 = arith.constant 0 : index
    %20 = vector.load %arg6[%c0_16, %c32, %c0_17] : memref<1x256x32xf32, #tpu.memory_space<vmem>>, vector<1x32x32xf32>
    %21 = vector.shape_cast %20 : vector<1x32x32xf32> to vector<32x32xf32>
    %22 = vector.shape_cast %19 : vector<32x32xf32> to vector<1x32x32xf32>
    tpu.vector_store %arg6[%c0_16, %c32, %c0_17], %22 {strides = array<i32>} : memref<1x256x32xf32, #tpu.memory_space<vmem>>, vector<1x32x32xf32>,
    %23 = vector.extract_strided_slice %11 {offsets = [32, 0], sizes = [16, 32], strides = [1, 1]} : vector<128x32xf32> to vector<16x32xf32>
    %cst_18 = arith.constant dense<0.000000e+00> : vector<32x32xf32>
    %24 = tpu.matmul %12, %23, %cst_18 {dimension_numbers = #tpu.dot_dimension_numbers<[1], [0], [0], [1], [0, 0, 1, 1], [], []>} : vector<32x16xf32>, vector<16x32xf32>, vector<32x32xf32> -> vector<32x32xf32>
    %c0_19 = arith.constant 0 : index
    %c64 = arith.constant 64 : index
    %c0_20 = arith.constant 0 : index
    %25 = vector.load %arg6[%c0_19, %c64, %c0_20] : memref<1x256x32xf32, #tpu.memory_space<vmem>>, vector<1x32x32xf32>
    %26 = vector.shape_cast %25 : vector<1x32x32xf32> to vector<32x32xf32>
    %27 = vector.shape_cast %24 : vector<32x32xf32> to vector<1x32x32xf32>
    tpu.vector_store %arg6[%c0_19, %c64, %c0_20], %27 {strides = array<i32>} : memref<1x256x32xf32, #tpu.memory_space<vmem>>, vector<1x32x32xf32>,
    %28 = vector.extract_strided_slice %11 {offsets = [48, 0], sizes = [16, 32], strides = [1, 1]} : vector<128x32xf32> to vector<16x32xf32>
    %cst_21 = arith.constant dense<0.000000e+00> : vector<32x32xf32>
    %29 = tpu.matmul %12, %28, %cst_21 {dimension_numbers = #tpu.dot_dimension_numbers<[1], [0], [0], [1], [0, 0, 1, 1], [], []>} : vector<32x16xf32>, vector<16x32xf32>, vector<32x32xf32> -> vector<32x32xf32>
    %c0_22 = arith.constant 0 : index
    %c96 = arith.constant 96 : index
    %c0_23 = arith.constant 0 : index
    %30 = vector.load %arg6[%c0_22, %c96, %c0_23] : memref<1x256x32xf32, #tpu.memory_space<vmem>>, vector<1x32x32xf32>
    %31 = vector.shape_cast %30 : vector<1x32x32xf32> to vector<32x32xf32>
    %32 = vector.shape_cast %29 : vector<32x32xf32> to vector<1x32x32xf32>
    tpu.vector_store %arg6[%c0_22, %c96, %c0_23], %32 {strides = array<i32>} : memref<1x256x32xf32, #tpu.memory_space<vmem>>, vector<1x32x32xf32>,
    %33 = vector.extract_strided_slice %11 {offsets = [64, 0], sizes = [16, 32], strides = [1, 1]} : vector<128x32xf32> to vector<16x32xf32>
    %cst_24 = arith.constant dense<0.000000e+00> : vector<32x32xf32>
    %34 = tpu.matmul %12, %33, %cst_24 {dimension_numbers = #tpu.dot_dimension_numbers<[1], [0], [0], [1], [0, 0, 1, 1], [], []>} : vector<32x16xf32>, vector<16x32xf32>, vector<32x32xf32> -> vector<32x32xf32>
    %c0_25 = arith.constant 0 : index
    %c128 = arith.constant 128 : index
    %c0_26 = arith.constant 0 : index
    %35 = vector.load %arg6[%c0_25, %c128, %c0_26] : memref<1x256x32xf32, #tpu.memory_space<vmem>>, vector<1x32x32xf32>
    %36 = vector.shape_cast %35 : vector<1x32x32xf32> to vector<32x32xf32>
    %37 = vector.shape_cast %34 : vector<32x32xf32> to vector<1x32x32xf32>
    tpu.vector_store %arg6[%c0_25, %c128, %c0_26], %37 {strides = array<i32>} : memref<1x256x32xf32, #tpu.memory_space<vmem>>, vector<1x32x32xf32>,
    %38 = vector.extract_strided_slice %11 {offsets = [80, 0], sizes = [16, 32], strides = [1, 1]} : vector<128x32xf32> to vector<16x32xf32>
    %cst_27 = arith.constant dense<0.000000e+00> : vector<32x32xf32>
    %39 = tpu.matmul %12, %38, %cst_27 {dimension_numbers = #tpu.dot_dimension_numbers<[1], [0], [0], [1], [0, 0, 1, 1], [], []>} : vector<32x16xf32>, vector<16x32xf32>, vector<32x32xf32> -> vector<32x32xf32>
    %c0_28 = arith.constant 0 : index
    %c160 = arith.constant 160 : index
    %c0_29 = arith.constant 0 : index
    %40 = vector.load %arg6[%c0_28, %c160, %c0_29] : memref<1x256x32xf32, #tpu.memory_space<vmem>>, vector<1x32x32xf32>
    %41 = vector.shape_cast %40 : vector<1x32x32xf32> to vector<32x32xf32>
    %42 = vector.shape_cast %39 : vector<32x32xf32> to vector<1x32x32xf32>
    tpu.vector_store %arg6[%c0_28, %c160, %c0_29], %42 {strides = array<i32>} : memref<1x256x32xf32, #tpu.memory_space<vmem>>, vector<1x32x32xf32>,
    %43 = vector.extract_strided_slice %11 {offsets = [96, 0], sizes = [16, 32], strides = [1, 1]} : vector<128x32xf32> to vector<16x32xf32>
    %cst_30 = arith.constant dense<0.000000e+00> : vector<32x32xf32>
    %44 = tpu.matmul %12, %43, %cst_30 {dimension_numbers = #tpu.dot_dimension_numbers<[1], [0], [0], [1], [0, 0, 1, 1], [], []>} : vector<32x16xf32>, vector<16x32xf32>, vector<32x32xf32> -> vector<32x32xf32>
    %c0_31 = arith.constant 0 : index
    %c192 = arith.constant 192 : index
    %c0_32 = arith.constant 0 : index
    %45 = vector.load %arg6[%c0_31, %c192, %c0_32] : memref<1x256x32xf32, #tpu.memory_space<vmem>>, vector<1x32x32xf32>
    %46 = vector.shape_cast %45 : vector<1x32x32xf32> to vector<32x32xf32>
    %47 = vector.shape_cast %44 : vector<32x32xf32> to vector<1x32x32xf32>
    tpu.vector_store %arg6[%c0_31, %c192, %c0_32], %47 {strides = array<i32>} : memref<1x256x32xf32, #tpu.memory_space<vmem>>, vector<1x32x32xf32>,
    %48 = vector.extract_strided_slice %11 {offsets = [112, 0], sizes = [16, 32], strides = [1, 1]} : vector<128x32xf32> to vector<16x32xf32>
    %cst_33 = arith.constant dense<0.000000e+00> : vector<32x32xf32>
    %49 = tpu.matmul %12, %48, %cst_33 {dimension_numbers = #tpu.dot_dimension_numbers<[1], [0], [0], [1], [0, 0, 1, 1], [], []>} : vector<32x16xf32>, vector<16x32xf32>, vector<32x32xf32> -> vector<32x32xf32>
    %c0_34 = arith.constant 0 : index
    %c224 = arith.constant 224 : index
    %c0_35 = arith.constant 0 : index
    %50 = vector.load %arg6[%c0_34, %c224, %c0_35] : memref<1x256x32xf32, #tpu.memory_space<vmem>>, vector<1x32x32xf32>
    %51 = vector.shape_cast %50 : vector<1x32x32xf32> to vector<32x32xf32>
    %52 = vector.shape_cast %49 : vector<32x32xf32> to vector<1x32x32xf32>
    tpu.vector_store %arg6[%c0_34, %c224, %c0_35], %52 {strides = array<i32>} : memref<1x256x32xf32, #tpu.memory_space<vmem>>, vector<1x32x32xf32>,
    return
  }
  func.func @transform_0(%arg0: i32) -> (i32, i32, i32) {
    %c0_i32 = arith.constant 0 : i32
    %c0_i32_0 = arith.constant 0 : i32
    %c0_i32_1 = arith.constant 0 : i32
    return %arg0, %c0_i32, %c0_i32_0 : i32, i32, i32
  }
  func.func @transform_1(%arg0: i32) -> (i32, i32) {
    %c0_i32 = arith.constant 0 : i32
    %c0_i32_0 = arith.constant 0 : i32
    %c0_i32_1 = arith.constant 0 : i32
    return %c0_i32, %c0_i32_0 : i32, i32
  }
  func.func @transform_2(%arg0: i32) -> (i32, i32) {
    %c0_i32 = arith.constant 0 : i32
    %c0_i32_0 = arith.constant 0 : i32
    %c0_i32_1 = arith.constant 0 : i32
    return %c0_i32, %c0_i32_0 : i32, i32
  }
  func.func @transform_3(%arg0: i32) -> (i32, i32) {
    %c0_i32 = arith.constant 0 : i32
    %c0_i32_0 = arith.constant 0 : i32
    %c0_i32_1 = arith.constant 0 : i32
    return %c0_i32, %c0_i32_0 : i32, i32
  }
  func.func @transform_4(%arg0: i32) -> (i32, i32) {
    %c0_i32 = arith.constant 0 : i32
    %c0_i32_0 = arith.constant 0 : i32
    %c0_i32_1 = arith.constant 0 : i32
    return %c0_i32, %c0_i32_0 : i32, i32
  }
  func.func @transform_5(%arg0: i32) -> (i32, i32, i32) {
    %c0_i32 = arith.constant 0 : i32
    %c0_i32_0 = arith.constant 0 : i32
    %c0_i32_1 = arith.constant 0 : i32
    return %arg0, %c0_i32, %c0_i32_0 : i32, i32, i32
  }
}

</mosaic_0001>

<bundles_post_ra>
// kernel: up_sample_forward.3
= control target key start
LH: loop header
LB: loop body
LE: loop exit
PB: predicated region body
PF: predicated region fallthrough
CT: control target
= control target key end

     0   :  { %10 = vsyncpa [#allocation3], 0  ;;  %s2249_s0 = inlined_call_operand.vmem [shape: f32[2,128,16], index: 0, kind: input, shape index: {}]   ;;  %s2250_s1 = inlined_call_operand.vmem [shape: f32[128,1], index: 1, kind: input, shape index: {}]   ;;  %s2251_s2 = inlined_call_operand.vmem [shape: f32[128,1], index: 2, kind: input, shape index: {}]   ;;  %s2252_s3 = inlined_call_operand.vmem [shape: f32[32,16], index: 3, kind: input, shape index: {}]   ;;  %s2253_s4 = inlined_call_operand.vmem [shape: f32[16,32], index: 4, kind: input, shape index: {}]   ;;  %s2254_s5 = inlined_call_operand.hbm [shape: f32[2,256,32], index: 5, kind: output, shape index: {}]  }
   0x1   :  { %12 = vsyncpa [#allocation3 + $0x1], 0  ;;  %s1856_s18 = smov 0   ;;  %s1858_s19 = smov 0  }
   0x2   :  { %s1860_s20 = smov 0   ;;  %s1862_s21 = smov 0  }
   0x3 LB: > { %s1877_s22 = sadd.s32 4294967295, %s1820_s21   ;;  %s1480_s23 = sadd.s32 4294967294, %s1820_s21   ;;  %s1820_s21 = sphi %s1862_s21, %s2260_s21   ;;  %s1816_s20 = sphi %s1860_s20, %s2259_s20   ;;  %s1812_s19 = sphi %s1858_s19, %s2258_s19   ;;  %s1808_s18 = sphi %s1856_s18, %s2257_s18  }
   0x4   : > { %s1881_s24 = sadd.s32 1, %s1820_s21   ;;  %s135_s25 = sadd.s32 1, %s1816_s20 }
   0x5   : > { %s132_s26 = ssub.s32 %s1820_s21, %s1881_s24  ;;  %p145_p0 = scmp.ne.s32.totalorder %s1816_s20, %s1812_s19 }
   0x6   : > { %p133_p1 = scmp.eq.s32.totalorder %s132_s26, 0  ;;  %p146_p2 = scmp.eq.s32.totalorder %s1877_s22, 1 }
   0x7   : > { %p151_p3 = scmp.ne.s32.totalorder %s1812_s19, %s1808_s18  ;;  %p152_p4 = scmp.eq.s32.totalorder %s1480_s23, 1 }
   0x8   : > { %s1892_s27 = scalar_select %p133_p1, %s1816_s20, %s135_s25  }
   0x9   : > { %p1894_p5 = por %p146_p2, %p145_p0  ;;  %p1898_p6 = por %p152_p4, %p151_p3 }
   0xa   : > { %p1483_p7 = scmp.ge.s32.totalorder %s1820_s21, 1  ;;  %p190_p8 = scmp.lt.s32.totalorder %s1820_s21, 3 }
   0xc   : > { %p191_p9 = pnand %p1483_p7, %p190_p8 }
   0xd   : > { %p218_p10 = scmp.lt.s32.totalorder (!%p191_p9), %s1877_s22, 1  ;;  %s215_s6 = sand.u32 (!%p191_p9), 1, %s1812_s19  }
   0xe   : > { %194 = sbr.rel (%p191_p9) target bundleno = 620 (0x26c), region = 40  ;;  %s1484_s7 = sshll.u32 (!%p191_p9), %s215_s6, 8 }
   0xf   : > { %s2132_s8 = scalar_lea.vmem (!%p191_p9), [#allocation2], %s1484_s7  ;;  %s1823_s15 = smov (!%p191_p9), [#allocation2]  }
  0x10   : > { %s1764_s16 = sshll.u32 (!%p191_p9), %s1823_s15, 4  ;;  %s1765_s16 = int_to_ptr.vmem [resolvable:$false] %s1764_s16 }
  0x11   : > { %s1766_s17 = scalar_lea.vmem (!%p191_p9), %s1765_s16, 8192 }
  0x13   : > { %v351_v0 = vld [vmem:[%s2251_s2] sm:$0xff]  ;;  %v1822_v2 = vmov 0   ;;  %v352_v3 = vld [vmem:[%s2251_s2 + $0x8] sm:$0xff]  ;;  %v242_v5 = vld [vmem:[%s2250_s1 + $0x18] sm:$0xff]  ;;  %s219_s9 = scalar_select %p218_p10, %s1877_s22, 1  ;;  %vm481_vm0 = vcmask 130048  }
  0x14   : > { %v239_v1 = vld [vmem:[%s2250_s1] sm:$0xff]  ;;  %1759 = vset.pattern.permute.xlu1 %v1822_v2  ;;  %1758 = vset.pattern.permute.xlu0 %v1822_v2  ;;  %v240_v4 = vld [vmem:[%s2250_s1 + $0x8] sm:$0xff]  ;;  %v241_v6 = vld [vmem:[%s2250_s1 + $0x10] sm:$0xff]  ;;  %vm776_vm1 = vcmask 261120  }
  0x15   : > { %369 = vperm.xlu1 %1759, %v351_v0   ;;  %257 = vperm.xlu0 %1758, %v239_v1   ;;  %v354_v7 = vld [vmem:[%s2251_s2 + $0x18] sm:$0xff]  ;;  %v353_v8 = vld [vmem:[%s2251_s2 + $0x10] sm:$0xff]  ;;  %v480_v9 = vld [vmem:[%s2253_s4 + $0x8] sm:$0xff]  ;;  %s1540_s10 = sshll.u32 %s219_s9, 7  ;;  %s1541_s9 = sshll.u32 %s1877_s22, 12 }
  0x16   : > { %1608 = vmatprep.subr.mxu0 %v480_v9  ;;  %v479_v10 = vld [vmem:[%s2253_s4] sm:$0xff]  ;;  %v244_v11 = vld [vmem:[%s2250_s1 + $0x28] sm:$0xff]  ;;  %v246_v15 = vld [vmem:[%s2250_s1 + $0x38] sm:$0xff]  ;;  %s2011_s13 = scalar_lea.vmem %s2249_s0, %s1540_s10  ;;  %s1418_s10 = sshll.u32 %s2132_s8, 4  ;;  %s2201_s10 = int_to_ptr.vmem [resolvable:$true] %s1418_s10 }
  0x17   : > { %1609 = vmatpush3.msra.mxu0 %v480_v9  ;;  %v243_v12 = vld [vmem:[%s2250_s1 + $0x20] sm:$0xff]  ;;  %v356_v13 = vld [vmem:[%s2251_s2 + $0x28] sm:$0xff]  ;;  %v245_v16 = vld [vmem:[%s2250_s1 + $0x30] sm:$0xff]  ;;  %s2209_s22 = scalar_lea.sflag [#allocation3], %s215_s6  ;;  %s1760_s14 = scalar_lea.vmem %s2201_s10, 4096 }
  0x18   : > { %1610 = vmatprep.subr.mxu0 %v479_v10  ;;  %v355_v14 = vld [vmem:[%s2251_s2 + $0x20] sm:$0xff]  ;;  %v358_v17 = vld [vmem:[%s2251_s2 + $0x38] sm:$0xff]  ;;  %v357_v18 = vld [vmem:[%s2251_s2 + $0x30] sm:$0xff]  ;;  %p1761_p11 = scmp.ne.s32.totalorder %s2201_s10, %s1760_s14  ;;  %p1767_p0 = scmp.lt.s32.totalorder %s2201_s10, %s1765_s16 }
  0x19   : > { %374 = vperm.xlu1 %1759, %v352_v3   ;;  %262 = vperm.xlu0 %1758, %v240_v4   ;;  %v248_v19 = vld [vmem:[%s2250_s1 + $0x48] sm:$0xff]  ;;  %v247_v20 = vld [vmem:[%s2250_s1 + $0x40] sm:$0xff]  ;;  %v250_v23 = vld [vmem:[%s2250_s1 + $0x58] sm:$0xff]  ;;  %p1768_p1 = scmp.lt.s32.totalorder %s1766_s17, %s1760_s14 }
  0x1a   : > { %1611 = vmatpush3.msra.mxu0 %v479_v10  ;;  %v360_v21 = vld [vmem:[%s2251_s2 + $0x48] sm:$0xff]  ;;  %v359_v22 = vld [vmem:[%s2251_s2 + $0x40] sm:$0xff]  ;;  %v249_v24 = vld [vmem:[%s2250_s1 + $0x50] sm:$0xff]  ;;  %p1762_p12 = pnand %p1761_p11, %p1894_p5 }
  0x1b   : > { %v362_v25 = vld [vmem:[%s2251_s2 + $0x58] sm:$0xff]  ;;  %v361_v26 = vld [vmem:[%s2251_s2 + $0x50] sm:$0xff]  ;;  %v252_v27 = vld [vmem:[%s2250_s1 + $0x68] sm:$0xff]  ;;  %p1769_p2 = por %p1768_p1, %p1767_p0 }
  0x1c   : > { %v251_v28 = vld [vmem:[%s2250_s1 + $0x60] sm:$0xff]  ;;  %v364_v29 = vld [vmem:[%s2251_s2 + $0x68] sm:$0xff]  ;;  %v254_v31 = vld [vmem:[%s2250_s1 + $0x78] sm:$0xff]  ;;  %p1763_p13 = pneg %p1762_p12 }
  0x1d   : > { %272 = vperm.xlu1 %1759, %v242_v5   ;;  %267 = vperm.xlu0 %1758, %v241_v6   ;;  %v363_v30 = vld [vmem:[%s2251_s2 + $0x60] sm:$0xff]  ;;  %v253_v32 = vld [vmem:[%s2250_s1 + $0x70] sm:$0xff]  ;;  %v366_v33 = vld [vmem:[%s2251_s2 + $0x78] sm:$0xff] }
  0x1e   : > { %v365_v34 = vld [vmem:[%s2251_s2 + $0x70] sm:$0xff]  ;;  %v223_v35 = vld [vmem:[%s2011_s13] sm:$0xff]  ;;  %v224_v39 = vld [vmem:[%s2011_s13 + $0x8] sm:$0xff]  ;;  %p1770_p3 = pnand %p1769_p2, %p1763_p13 }
  0x1f   : > { %v226_v47 = vld [vmem:[%s2011_s13 + $0x18] sm:$0xff]  ;;  %v225_v49 = vld [vmem:[%s2011_s13 + $0x10] sm:$0xff]  ;;  %v228_v60 = vld [vmem:[%s2011_s13 + $0x28] sm:$0xff] }
  0x20   : > { %v227_v62 = vld [vmem:[%s2011_s13 + $0x20] sm:$0xff]  ;;  %v229_v10 = vld [vmem:[%s2011_s13 + $0x30] sm:$0xff] }
  0x21   : > { %384 = vperm.xlu1 %1759, %v354_v7   ;;  %379 = vperm.xlu0 %1758, %v353_v8   ;;  %v230_v8 = vld [vmem:[%s2011_s13 + $0x38] sm:$0xff] }
  0x25   : > { %282 = vperm.xlu1 %1759, %v244_v11   ;;  %277 = vperm.xlu0 %1758, %v243_v12  }
  0x29   : > { %394 = vperm.xlu1 %1759, %v356_v13   ;;  %389 = vperm.xlu0 %1758, %v355_v14  }
  0x2d   : > { %292 = vperm.xlu1 %1759, %v246_v15   ;;  %287 = vperm.xlu0 %1758, %v245_v16  }
  0x31   : > { %404 = vperm.xlu1 %1759, %v358_v17   ;;  %399 = vperm.xlu0 %1758, %v357_v18  }
  0x35   : > { %302 = vperm.xlu1 %1759, %v248_v19   ;;  %297 = vperm.xlu0 %1758, %v247_v20   ;;  %v232_v20 = vld [vmem:[%s2011_s13 + $0x48] sm:$0xff] }
  0x39   : > { %414 = vperm.xlu1 %1759, %v360_v21   ;;  %409 = vperm.xlu0 %1758, %v359_v22   ;;  %v231_v22 = vld [vmem:[%s2011_s13 + $0x40] sm:$0xff] }
  0x3d   : > { %312 = vperm.xlu1 %1759, %v250_v23   ;;  %307 = vperm.xlu0 %1758, %v249_v24  }
  0x41   : > { %424 = vperm.xlu1 %1759, %v362_v25   ;;  %419 = vperm.xlu0 %1758, %v361_v26  }
  0x45   : > { %322 = vperm.xlu1 %1759, %v252_v27   ;;  %317 = vperm.xlu0 %1758, %v251_v28  }
  0x49   : > { %434 = vperm.xlu1 %1759, %v364_v29   ;;  %429 = vperm.xlu0 %1758, %v363_v30  }
  0x4d   : > { %332 = vperm.xlu1 %1759, %v254_v31   ;;  %327 = vperm.xlu0 %1758, %v253_v32   ;;  %v234_v32 = vld [vmem:[%s2011_s13 + $0x58] sm:$0xff] }
  0x51   : > { %444 = vperm.xlu1 %1759, %v366_v33   ;;  %439 = vperm.xlu0 %1758, %v365_v34   ;;  %v233_v34 = vld [vmem:[%s2011_s13 + $0x50] sm:$0xff] }
  0x90   : > { %v370_v36 = vpop.permute.xlu1 %369  ;;  %v258_v37 = vpop.permute.xlu0 %257 }
  0x91   : > { %v335_v38 = vmul.f32 %v258_v37, %v223_v35 }
  0x93   : > { %v447_v40 = vadd.f32 %v370_v36, %v335_v38 }
  0x94   : > { %v375_v41 = vpop.permute.xlu1 %374  ;;  %v263_v42 = vpop.permute.xlu0 %262 }
  0x95   : > { %v336_v43 = vmul.f32 %v263_v42, %v224_v39  ;;  %v463_v44 = vmax.f32 %v447_v40, 0.0 }
  0x97   : > { %v448_v45 = vadd.f32 %v375_v41, %v336_v43  ;;  %1612 = vmatprep.mubr.msk.f32.mxu0 %vm481_vm0, %v463_v44  ;;  %v236_v44 = vld [vmem:[%s2011_s13 + $0x68] sm:$0xff] }
  0x98   : > { %v273_v46 = vpop.permute.xlu1 %272  ;;  %v268_v48 = vpop.permute.xlu0 %267 }
  0x99   : > { %v464_v50 = vmax.f32 %v448_v45, 0.0  ;;  %v338_v51 = vmul.f32 %v273_v46, %v226_v47  ;;  %v337_v52 = vmul.f32 %v268_v48, %v225_v49  ;;  %v235_v46 = vld [vmem:[%s2011_s13 + $0x60] sm:$0xff] }
  0x9b   : > { %1613 = vmatmul.mubr.msk.f32.vlgmr.msra.gmra.mxu0 %vm481_vm0, %v464_v50 }
  0x9c   : > { %v385_v53 = vpop.permute.xlu1 %384  ;;  %v380_v54 = vpop.permute.xlu0 %379 }
  0x9d   : > { %v450_v55 = vadd.f32 %v385_v53, %v338_v51  ;;  %v449_v56 = vadd.f32 %v380_v54, %v337_v52 }
  0x9f   : > { %v466_v57 = vmax.f32 %v450_v55, 0.0  ;;  %v465_v58 = vmax.f32 %v449_v56, 0.0  ;;  %v238_v56 = vld [vmem:[%s2011_s13 + $0x78] sm:$0xff] }
  0xa0   : > { %v283_v59 = vpop.permute.xlu1 %282  ;;  %v278_v61 = vpop.permute.xlu0 %277 }
  0xa1   : > { %1615 = vmatprep.mubr.msk.f32.mxu0 %vm481_vm0, %v465_v58  ;;  %v340_v63 = vmul.f32 %v283_v59, %v228_v60  ;;  %v339_v0 = vmul.f32 %v278_v61, %v227_v62  ;;  %v237_v58 = vld [vmem:[%s2011_s13 + $0x70] sm:$0xff]  ;;  %s2199_s13 = scalar_lea.hbm %s2254_s5, %s1541_s9 }
  0xa2   : > { %1616 = vmatmul.mubr.msk.f32.gmra.mxu0 %vm481_vm0, %v466_v57 }
  0xa4   : > { %v395_v1 = vpop.permute.xlu1 %394  ;;  %v390_v2 = vpop.permute.xlu0 %389 }
  0xa5   : > { %v452_v3 = vadd.f32 %v395_v1, %v340_v63  ;;  %v451_v4 = vadd.f32 %v390_v2, %v339_v0 }
  0xa7   : > { %v468_v5 = vmax.f32 %v452_v3, 0.0  ;;  %v467_v6 = vmax.f32 %v451_v4, 0.0  ;;  %v2048_v3 = vld [vmem:[%s2252_s3] sm:$0xff] }
  0xa8   : > { %v293_v7 = vpop.permute.xlu1 %292  ;;  %v288_v9 = vpop.permute.xlu0 %287  ;;  %1640 = vmatprep.mubr.msk.f32.mxu1 %vm481_vm0, %v2048_v3 }
  0xa9   : > { %1618 = vmatprep.mubr.msk.f32.mxu0 %vm481_vm0, %v467_v6  ;;  %v342_v11 = vmul.f32 %v293_v7, %v230_v8  ;;  %v341_v12 = vmul.f32 %v288_v9, %v229_v10  ;;  %v2057_v6 = vld [vmem:[%s2252_s3 + $0x8] sm:$0xff]  ;;  %v2062_v7 = vld [vmem:[%s2252_s3 + $0x10] sm:$0xff]  ;;  %v2071_v9 = vld [vmem:[%s2252_s3 + $0x18] sm:$0xff] }
  0xaa   : > { %1619 = vmatmul.mubr.msk.f32.gmra.mxu0 %vm481_vm0, %v468_v5 }
  0xac   : > { %v405_v13 = vpop.permute.xlu1 %404  ;;  %v400_v14 = vpop.permute.xlu0 %399 }
  0xad   : > { %v454_v15 = vadd.f32 %v405_v13, %v342_v11  ;;  %v453_v16 = vadd.f32 %v400_v14, %v341_v12 }
  0xaf   : > { %v470_v17 = vmax.f32 %v454_v15, 0.0  ;;  %v469_v18 = vmax.f32 %v453_v16, 0.0 }
  0xb0   : > { %v303_v19 = vpop.permute.xlu1 %302  ;;  %v298_v21 = vpop.permute.xlu0 %297 }
  0xb1   : > { %1621 = vmatprep.mubr.msk.f32.mxu0 %vm481_vm0, %v469_v18  ;;  %v344_v23 = vmul.f32 %v303_v19, %v232_v20  ;;  %v343_v24 = vmul.f32 %v298_v21, %v231_v22 }
  0xb2   : > { %1622 = vmatmul.mubr.msk.f32.gmra.mxu0 %vm481_vm0, %v470_v17 }
  0xb4   : > { %v415_v25 = vpop.permute.xlu1 %414  ;;  %v410_v26 = vpop.permute.xlu0 %409 }
  0xb5   : > { %v456_v27 = vadd.f32 %v415_v25, %v344_v23  ;;  %v455_v28 = vadd.f32 %v410_v26, %v343_v24 }
  0xb7   : > { %v472_v29 = vmax.f32 %v456_v27, 0.0  ;;  %v471_v30 = vmax.f32 %v455_v28, 0.0 }
  0xb8   : > { %v313_v31 = vpop.permute.xlu1 %312  ;;  %v308_v33 = vpop.permute.xlu0 %307 }
  0xb9   : > { %1624 = vmatprep.mubr.msk.f32.mxu0 %vm481_vm0, %v471_v30  ;;  %v346_v35 = vmul.f32 %v313_v31, %v234_v32  ;;  %v345_v36 = vmul.f32 %v308_v33, %v233_v34 }
  0xba   : > { %1625 = vmatmul.mubr.msk.f32.gmra.mxu0 %vm481_vm0, %v472_v29 }
  0xbc   : > { %v425_v37 = vpop.permute.xlu1 %424  ;;  %v420_v38 = vpop.permute.xlu0 %419 }
  0xbd   : > { %v458_v39 = vadd.f32 %v425_v37, %v346_v35  ;;  %v457_v40 = vadd.f32 %v420_v38, %v345_v36 }
  0xbf   : > { %v474_v41 = vmax.f32 %v458_v39, 0.0  ;;  %v473_v42 = vmax.f32 %v457_v40, 0.0 }
  0xc0   : > { %v323_v43 = vpop.permute.xlu1 %322  ;;  %v318_v45 = vpop.permute.xlu0 %317 }
  0xc1   : > { %1627 = vmatprep.mubr.msk.f32.mxu0 %vm481_vm0, %v473_v42  ;;  %v348_v47 = vmul.f32 %v323_v43, %v236_v44  ;;  %v347_v48 = vmul.f32 %v318_v45, %v235_v46 }
  0xc2   : > { %1628 = vmatmul.mubr.msk.f32.gmra.mxu0 %vm481_vm0, %v474_v41 }
  0xc4   : > { %v435_v49 = vpop.permute.xlu1 %434  ;;  %v430_v50 = vpop.permute.xlu0 %429 }
  0xc5   : > { %v460_v51 = vadd.f32 %v435_v49, %v348_v47  ;;  %v459_v52 = vadd.f32 %v430_v50, %v347_v48 }
  0xc7   : > { %v476_v53 = vmax.f32 %v460_v51, 0.0  ;;  %v475_v54 = vmax.f32 %v459_v52, 0.0 }
  0xc8   : > { %v333_v55 = vpop.permute.xlu1 %332  ;;  %v328_v57 = vpop.permute.xlu0 %327 }
  0xc9   : > { %1630 = vmatprep.mubr.msk.f32.mxu0 %vm481_vm0, %v475_v54  ;;  %v350_v59 = vmul.f32 %v333_v55, %v238_v56  ;;  %v349_v60 = vmul.f32 %v328_v57, %v237_v58 }
  0xca   : > { %1631 = vmatmul.mubr.msk.f32.gmra.mxu0 %vm481_vm0, %v476_v53 }
  0xcc   : > { %v445_v61 = vpop.permute.xlu1 %444  ;;  %v440_v62 = vpop.permute.xlu0 %439 }
  0xcd   : > { %v462_v63 = vadd.f32 %v445_v61, %v350_v59  ;;  %v461_v0 = vadd.f32 %v440_v62, %v349_v60 }
  0xcf   : > { %v478_v1 = vmax.f32 %v462_v63, 0.0  ;;  %v477_v2 = vmax.f32 %v461_v0, 0.0 }
  0xd1   : > { %1633 = vmatprep.mubr.msk.f32.mxu0 %vm481_vm0, %v477_v2 }
  0xd2   : > { %1634 = vmatmul.mubr.msk.f32.gmra.mxu0 %vm481_vm0, %v478_v1 }
  0xd3   : > { %1680 = vmatprep.mubr.msk.f32.mxu0 %vm481_vm0, %v2048_v3 }
 0x15b   : > { %v1614_v4 = vpop.f32.mrf.mxu0 }
 0x15c   : > { %1636 = vmatprep.subr.mxu1 %v1614_v4 }
 0x15d   : > { %v596_v5 = vpop.f32.mrf.mxu0  ;;  %1637 = vmatpush3.msra.mxu1 %v1614_v4 }
 0x15e   : > { %1638 = vmatprep.subr.mxu1 %v596_v5 }
 0x15f   : > { %1639 = vmatpush3.msra.mxu1 %v596_v5 }
 0x160   : > { %1641 = vmatmul.mubr.msk.f32.vlgmr.msra.gmra.mxu1 %vm481_vm0, %v2057_v6 }
 0x161   : > { %1643 = vmatprep.mubr.msk.f32.mxu1 %vm481_vm0, %v2062_v7 }
 0x162   : > { %v1617_v8 = vpop.f32.mrf.mxu0 }
 0x163   : > { %1646 = vmatprep.subr.mxu1 %v1617_v8 }
 0x164   : > { %v606_v10 = vpop.f32.mrf.mxu0  ;;  %1647 = vmatpush3.msra.mxu1 %v1617_v8 }
 0x165   : > { %1648 = vmatprep.subr.mxu1 %v606_v10  ;;  %1644 = vmatmul.mubr.msk.f32.gmra.mxu1 %vm481_vm0, %v2071_v9 }
 0x166   : > { %1649 = vmatpush3.msra.mxu1 %v606_v10  ;;  %1650 = vmatprep.mubr.msk.f32.mxu1 %vm481_vm0, %v2048_v3 }
 0x169   : > { %1651 = vmatmul.mubr.msk.f32.vlgmr.msra.gmra.mxu1 %vm481_vm0, %v2057_v6 }
 0x16a   : > { %v1620_v11 = vpop.f32.mrf.mxu0  ;;  %1653 = vmatprep.mubr.msk.f32.mxu1 %vm481_vm0, %v2062_v7 }
 0x16b   : > { %1656 = vmatprep.subr.mxu1 %v1620_v11 }
 0x16c   : > { %v616_v12 = vpop.f32.mrf.mxu0  ;;  %1657 = vmatpush3.msra.mxu1 %v1620_v11 }
 0x16d   : > { %1658 = vmatprep.subr.mxu1 %v616_v12  ;;  %1654 = vmatmul.mubr.msk.f32.gmra.mxu1 %vm481_vm0, %v2071_v9 }
 0x16e   : > { %1659 = vmatpush3.msra.mxu1 %v616_v12  ;;  %1660 = vmatprep.mubr.msk.f32.mxu1 %vm481_vm0, %v2048_v3 }
 0x171   : > { %1661 = vmatmul.mubr.msk.f32.vlgmr.msra.gmra.mxu1 %vm481_vm0, %v2057_v6 }
 0x172   : > { %v1623_v13 = vpop.f32.mrf.mxu0  ;;  %1663 = vmatprep.mubr.msk.f32.mxu1 %vm481_vm0, %v2062_v7 }
 0x173   : > { %1666 = vmatprep.subr.mxu1 %v1623_v13 }
 0x174   : > { %v626_v14 = vpop.f32.mrf.mxu0  ;;  %1667 = vmatpush3.msra.mxu1 %v1623_v13 }
 0x175   : > { %1668 = vmatprep.subr.mxu1 %v626_v14  ;;  %1664 = vmatmul.mubr.msk.f32.gmra.mxu1 %vm481_vm0, %v2071_v9 }
 0x176   : > { %1669 = vmatpush3.msra.mxu1 %v626_v14  ;;  %1670 = vmatprep.mubr.msk.f32.mxu1 %vm481_vm0, %v2048_v3 }
 0x179   : > { %1671 = vmatmul.mubr.msk.f32.vlgmr.msra.gmra.mxu1 %vm481_vm0, %v2057_v6 }
 0x17a   : > { %v1626_v15 = vpop.f32.mrf.mxu0  ;;  %1673 = vmatprep.mubr.msk.f32.mxu1 %vm481_vm0, %v2062_v7 }
 0x17b   : > { %1676 = vmatprep.subr.mxu0 %v1626_v15 }
 0x17c   : > { %v636_v16 = vpop.f32.mrf.mxu0  ;;  %1677 = vmatpush3.msra.mxu0 %v1626_v15 }
 0x17d   : > { %1678 = vmatprep.subr.mxu0 %v636_v16  ;;  %1674 = vmatmul.mubr.msk.f32.gmra.mxu1 %vm481_vm0, %v2071_v9 }
 0x17e   : > { %1679 = vmatpush3.msra.mxu0 %v636_v16  ;;  %1690 = vmatprep.mubr.msk.f32.mxu1 %vm481_vm0, %v2048_v3 }
 0x17f   : > { %1681 = vmatmul.mubr.msk.f32.vlgmr.msra.gmra.mxu0 %vm481_vm0, %v2057_v6 }
 0x180   : > { %1683 = vmatprep.mubr.msk.f32.mxu0 %vm481_vm0, %v2062_v7 }
 0x182   : > { %v1629_v17 = vpop.f32.mrf.mxu0 }
 0x183   : > { %1686 = vmatprep.subr.mxu1 %v1629_v17  ;;  %1684 = vmatmul.mubr.msk.f32.gmra.mxu0 %vm481_vm0, %v2071_v9 }
 0x184   : > { %v646_v18 = vpop.f32.mrf.mxu0  ;;  %1687 = vmatpush3.msra.mxu1 %v1629_v17  ;;  %1700 = vmatprep.mubr.msk.f32.mxu0 %vm481_vm0, %v2048_v3 }
 0x185   : > { %1688 = vmatprep.subr.mxu1 %v646_v18 }
 0x186   : > { %1689 = vmatpush3.msra.mxu1 %v646_v18 }
 0x187   : > { %1691 = vmatmul.mubr.msk.f32.vlgmr.msra.gmra.mxu1 %vm481_vm0, %v2057_v6 }
 0x188   : > { %1693 = vmatprep.mubr.msk.f32.mxu1 %vm481_vm0, %v2062_v7 }
 0x18a   : > { %v1632_v19 = vpop.f32.mrf.mxu0 }
 0x18b   : > { %1696 = vmatprep.subr.mxu0 %v1632_v19  ;;  %1694 = vmatmul.mubr.msk.f32.gmra.mxu1 %vm481_vm0, %v2071_v9 }
 0x18c   : > { %v656_v20 = vpop.f32.mrf.mxu0  ;;  %1697 = vmatpush3.msra.mxu0 %v1632_v19  ;;  %1710 = vmatprep.mubr.msk.f32.mxu1 %vm481_vm0, %v2048_v3 }
 0x18d   : > { %1698 = vmatprep.subr.mxu0 %v656_v20 }
 0x18e   : > { %1699 = vmatpush3.msra.mxu0 %v656_v20 }
 0x18f   : > { %1701 = vmatmul.mubr.msk.f32.vlgmr.msra.gmra.mxu0 %vm481_vm0, %v2057_v6 }
 0x190   : > { %1703 = vmatprep.mubr.msk.f32.mxu0 %vm481_vm0, %v2062_v7 }
 0x192   : > { %v1635_v21 = vpop.f32.mrf.mxu0 }
 0x193   : > { %1706 = vmatprep.subr.mxu1 %v1635_v21  ;;  %1704 = vmatmul.mubr.msk.f32.gmra.mxu0 %vm481_vm0, %v2071_v9 }
 0x194   : > { %v666_v22 = vpop.f32.mrf.mxu0  ;;  %1707 = vmatpush3.msra.mxu1 %v1635_v21 }
 0x195   : > { %1708 = vmatprep.subr.mxu1 %v666_v22 }
 0x196   : > { %1709 = vmatpush3.msra.mxu1 %v666_v22 }
 0x197   : > { %1711 = vmatmul.mubr.msk.f32.vlgmr.msra.gmra.mxu1 %vm481_vm0, %v2057_v6 }
 0x198   : > { %1713 = vmatprep.mubr.msk.f32.mxu1 %vm481_vm0, %v2062_v7 }
 0x19b   : > { %1714 = vmatmul.mubr.msk.f32.gmra.mxu1 %vm481_vm0, %v2071_v9 }
 0x220   : > { %v1642_v23 = vpop.f32.mrf.mxu1 }
 0x221   : > { %778 = vst.msk [vmem:[%s2132_s8 + $0x8] sm:$0xff] %vm776_vm1, %v1642_v23 }
 0x222   : > { %v757_v24 = vpop.f32.mrf.mxu1 }
 0x223   : > { %777 = vst.msk [vmem:[%s2132_s8] sm:$0xff] %vm776_vm1, %v757_v24 }
 0x225   : > { %v1645_v25 = vpop.f32.mrf.mxu1 }
 0x226   : > { %780 = vst.msk [vmem:[%s2132_s8 + $0x18] sm:$0xff] %vm776_vm1, %v1645_v25 }
 0x227   : > { %v767_v26 = vpop.f32.mrf.mxu1 }
 0x228   : > { %779 = vst.msk [vmem:[%s2132_s8 + $0x10] sm:$0xff] %vm776_vm1, %v767_v26 }
 0x229   : > { %v1652_v27 = vpop.f32.mrf.mxu1 }
 0x22a   : > { %867 = vst.msk [vmem:[%s2132_s8 + $0x28] sm:$0xff] %vm776_vm1, %v1652_v27 }
 0x22b   : > { %v847_v28 = vpop.f32.mrf.mxu1 }
 0x22c   : > { %866 = vst.msk [vmem:[%s2132_s8 + $0x20] sm:$0xff] %vm776_vm1, %v847_v28 }
 0x22d   : > { %v1655_v29 = vpop.f32.mrf.mxu1 }
 0x22e   : > { %869 = vst.msk [vmem:[%s2132_s8 + $0x38] sm:$0xff] %vm776_vm1, %v1655_v29 }
 0x22f   : > { %v857_v30 = vpop.f32.mrf.mxu1 }
 0x230   : > { %868 = vst.msk [vmem:[%s2132_s8 + $0x30] sm:$0xff] %vm776_vm1, %v857_v30 }
 0x231   : > { %v1662_v31 = vpop.f32.mrf.mxu1 }
 0x232   : > { %956 = vst.msk [vmem:[%s2132_s8 + $0x48] sm:$0xff] %vm776_vm1, %v1662_v31 }
 0x233   : > { %v936_v32 = vpop.f32.mrf.mxu1 }
 0x234   : > { %955 = vst.msk [vmem:[%s2132_s8 + $0x40] sm:$0xff] %vm776_vm1, %v936_v32 }
 0x235   : > { %v1665_v33 = vpop.f32.mrf.mxu1 }
 0x236   : > { %958 = vst.msk [vmem:[%s2132_s8 + $0x58] sm:$0xff] %vm776_vm1, %v1665_v33 }
 0x237   : > { %v946_v34 = vpop.f32.mrf.mxu1 }
 0x238   : > { %957 = vst.msk [vmem:[%s2132_s8 + $0x50] sm:$0xff] %vm776_vm1, %v946_v34 }
 0x239   : > { %v1672_v35 = vpop.f32.mrf.mxu1 }
 0x23a   : > { %1045 = vst.msk [vmem:[%s2132_s8 + $0x68] sm:$0xff] %vm776_vm1, %v1672_v35 }
 0x23b   : > { %v1025_v36 = vpop.f32.mrf.mxu1 }
 0x23c   : > { %1044 = vst.msk [vmem:[%s2132_s8 + $0x60] sm:$0xff] %vm776_vm1, %v1025_v36 }
 0x23d   : > { %v1675_v37 = vpop.f32.mrf.mxu1 }
 0x23e   : > { %1047 = vst.msk [vmem:[%s2132_s8 + $0x78] sm:$0xff] %vm776_vm1, %v1675_v37 }
 0x23f   : > { %v1035_v38 = vpop.f32.mrf.mxu1  ;;  %v1682_v39 = vpop.f32.mrf.mxu0 }
 0x240   : > { %1046 = vst.msk [vmem:[%s2132_s8 + $0x70] sm:$0xff] %vm776_vm1, %v1035_v38  ;;  %1134 = vst.msk [vmem:[%s2132_s8 + $0x88] sm:$0xff] %vm776_vm1, %v1682_v39 }
 0x241   : > { %v1114_v40 = vpop.f32.mrf.mxu0 }
 0x242   : > { %1133 = vst.msk [vmem:[%s2132_s8 + $0x80] sm:$0xff] %vm776_vm1, %v1114_v40 }
 0x243   : > { %v1685_v41 = vpop.f32.mrf.mxu0 }
 0x244   : > { %1136 = vst.msk [vmem:[%s2132_s8 + $0x98] sm:$0xff] %vm776_vm1, %v1685_v41 }
 0x245   : > { %v1124_v42 = vpop.f32.mrf.mxu0 }
 0x246   : > { %1135 = vst.msk [vmem:[%s2132_s8 + $0x90] sm:$0xff] %vm776_vm1, %v1124_v42 }
 0x247   : > { %v1692_v43 = vpop.f32.mrf.mxu1 }
 0x248   : > { %1223 = vst.msk [vmem:[%s2132_s8 + $0xa8] sm:$0xff] %vm776_vm1, %v1692_v43 }
 0x249   : > { %v1203_v44 = vpop.f32.mrf.mxu1 }
 0x24a   : > { %1222 = vst.msk [vmem:[%s2132_s8 + $0xa0] sm:$0xff] %vm776_vm1, %v1203_v44 }
 0x24b   : > { %v1695_v45 = vpop.f32.mrf.mxu1 }
 0x24c   : > { %1225 = vst.msk [vmem:[%s2132_s8 + $0xb8] sm:$0xff] %vm776_vm1, %v1695_v45 }
 0x24d   : > { %v1213_v46 = vpop.f32.mrf.mxu1 }
 0x24e   : > { %1224 = vst.msk [vmem:[%s2132_s8 + $0xb0] sm:$0xff] %vm776_vm1, %v1213_v46 }
 0x24f   : > { %v1702_v47 = vpop.f32.mrf.mxu0 }
 0x250   : > { %1312 = vst.msk [vmem:[%s2132_s8 + $0xc8] sm:$0xff] %vm776_vm1, %v1702_v47 }
 0x251   : > { %v1292_v48 = vpop.f32.mrf.mxu0 }
 0x252   : > { %1311 = vst.msk [vmem:[%s2132_s8 + $0xc0] sm:$0xff] %vm776_vm1, %v1292_v48 }
 0x253   : > { %v1705_v49 = vpop.f32.mrf.mxu0 }
 0x254   : > { %1314 = vst.msk [vmem:[%s2132_s8 + $0xd8] sm:$0xff] %vm776_vm1, %v1705_v49 }
 0x255   : > { %v1302_v50 = vpop.f32.mrf.mxu0 }
 0x256   : > { %1313 = vst.msk [vmem:[%s2132_s8 + $0xd0] sm:$0xff] %vm776_vm1, %v1302_v50 }
 0x257   : > { %v1712_v51 = vpop.f32.mrf.mxu1 }
 0x258   : > { %1401 = vst.msk [vmem:[%s2132_s8 + $0xe8] sm:$0xff] %vm776_vm1, %v1712_v51 }
 0x259   : > { %v1381_v52 = vpop.f32.mrf.mxu1 }
 0x25a   : > { %1400 = vst.msk [vmem:[%s2132_s8 + $0xe0] sm:$0xff] %vm776_vm1, %v1381_v52 }
 0x25b   : > { %v1715_v53 = vpop.f32.mrf.mxu1 }
 0x25c   : > { %1403 = vst.msk [vmem:[%s2132_s8 + $0xf8] sm:$0xff] %vm776_vm1, %v1715_v53 }
 0x25d   : > { %v1391_v54 = vpop.f32.mrf.mxu1 }
 0x25e   : > { %1402 = vst.msk [vmem:[%s2132_s8 + $0xf0] sm:$0xff] %vm776_vm1, %v1391_v54 }
 0x25f   : > { %1773 = shalt.err (!%p1770_p3)
}
 0x260   : > { %s1774_s23 = scalar_lea.hbm %s2199_s13, 4096  ;;  %s1778_s30 = scalar_lea.hbm %s2254_s5, 8192 }
 0x261   : > { %p1775_p4 = scmp.ne.s32.totalorder %s2199_s13, %s1774_s23  ;;  %p1779_p9 = scmp.lt.s32.totalorder %s2199_s13, %s2254_s5 }
 0x262   : > { %p1780_p10 = scmp.lt.s32.totalorder %s1778_s30, %s1774_s23 }
 0x263   : > { %p1776_p7 = pnand %p1775_p4, %p1894_p5 }
 0x264   : > { %p1781_p11 = por %p1780_p10, %p1779_p9 }
 0x265   : > { %p1777_p8 = pneg %p1776_p7 }
 0x267   : > { %p1782_p12 = pnand %p1781_p11, %p1777_p8 }
 0x269   : > { %1785 = shalt.err (!%p1782_p12)
}
 0x26a   : > { %s1824_s8 = smov 128   ;;  %s1825_s9 = smov 8  }
 0x26b   : > { %1716 = dma.vmem_to_hbm [thread:$0]  (%p1894_p5), %s2201_s10, 4096, %s2199_s13, %s2209_s22, %s1824_s8, %s1824_s8, %s1825_s9  }
 0x26c PF: > { %p1722_p13 = scmp.ge.s32.totalorder %s1820_s21, 2  ;;  %s1433_s11 = sand.u32 1, %s1808_s18  }
 0x26d   : > { %s1434_s12 = scalar_lea.sflag [#allocation3], %s1433_s11 }
 0x26e   : > { %p1719_p0 = pnand %p1722_p13, %p1898_p6 }
 0x270   : > { %p1720_p1 = pneg %p1719_p0 }
 0x272   : > { %1803 = dma.done.wait (%p1720_p1), %s1434_s12, 4096  }
 0x273   : > { %1805 = vsyncadd (%p1720_p1), %s1434_s12, 4294963200  ;;  %p15_p2 = scmp.ge.s32.totalorder %s1881_s24, 4   ;;  %s2257_s18 = smov %s1812_s19 }
 0x274   : > { %s2258_s19 = smov %s1816_s20  ;;  %s2259_s20 = smov %s1892_s27 }
 0x275   : > { %s2260_s21 = smov %s1881_s24  ;;  %17 = sbr.rel (!%p15_p2) target bundleno = 3 (0x3), region = 75 }
 0x27a   :  { %1439 = vsyncpa [#allocation3], 1 }
 0x27b   :  { %1441 = vsyncpa [#allocation3 + $0x1], 1 }

// kernel: up_sample_forward.2
= control target key start
LH: loop header
LB: loop body
LE: loop exit
PB: predicated region body
PF: predicated region fallthrough
CT: control target
= control target key end

     0   :  { %s4399_s18 = smov 0   ;;  %s5829_s0 = inlined_call_operand.vmem [shape: bf16[2,18,18,4], index: 0, kind: input, shape index: {}]   ;;  %s5830_s1 = inlined_call_operand.vmem [shape: bf16[9,8,4], index: 1, kind: input, shape index: {}]   ;;  %s5831_s2 = inlined_call_operand.vmem [shape: f32[8,1], index: 2, kind: input, shape index: {}]   ;;  %s5832_s3 = inlined_call_operand.vmem [shape: f32[2,8,256], index: 3, kind: output, shape index: {0}]   ;;  %s5833_s4 = inlined_call_operand.vmem [shape: f32[2,8,1], index: 4, kind: output, shape index: {1}]   ;;  %s5834_s5 = inlined_call_operand.vmem [shape: f32[2,8,1], index: 5, kind: output, shape index: {2}]  }
   0x1 LB: > { %s3653_s19 = sadd.s32 4294967295, %s4366_s18   ;;  %p3657_p0 = scmp.ge.s32.totalorder %s4366_s18, 1  ;;  %s4366_s18 = sphi %s4399_s18, %s16_s18  }
   0x2   : > { %p192_p1 = scmp.lt.s32.totalorder %s4366_s18, 3 }
   0x4   : > { %p193_p2 = pnand %p3657_p0, %p192_p1 }
   0x5   : > { %p228_p3 = scmp.lt.s32.totalorder (!%p193_p2), %s3653_s19, 1 }
   0x6   : > { %196 = sbr.rel (%p193_p2) target bundleno = 710 (0x2c6), region = 32 }
   0xb   : > { %vm733_vm0 = vcmask 31744   ;;  %v4410_v0 = vld [vmem:[%s5830_s1 + $0x4] sm:$0xf]  ;;  %v4415_v1 = vld [vmem:[%s5830_s1] sm:$0xf]  ;;  %s5840_s19 = smov (!%p228_p3, %s3653_s19), 1 }
   0xc   : > { %4083 = vmatprep.mubr.msk.bf16.mxu0 %vm733_vm0, %v4410_v0  ;;  %4101 = vmatprep.mubr.msk.bf16.mxu1 %vm733_vm0, %v4415_v1  ;;  %s4301_s24 = smul.u32 216, %s5840_s19  ;;  %vm296_vm1 = vsmask.f32 3328  ;;  %vm297_vm2 = vsmask.f32 7440  ;;  %vm1046_vm4 = vcmask 1042432  }
   0xd   : > { %vm4455_vm3 = vmor %vm296_vm1, %vm297_vm2  ;;  %vm1047_vm5 = vcmask 1046532   ;;  %s4066_s21 = sshll.u32 %s5840_s19, 4  ;;  %s3661_s25 = sshll.u32 %s5840_s19, 3  ;;  %vm3528_vm7 = vcmask 7168  }
   0xe   : > { %s4427_s27 = scalar_lea.vmem %s5829_s0, %s4301_s24  ;;  %vm4708_vm6 = vmor %vm1046_vm4, %vm1047_vm5  ;;  %s237_s24 = scalar_lea.vmem %s5832_s3, %s4066_s21 }
   0xf   : > { %v277_v2 = vld [vmem:[%s4427_s27 + $0xb4] sm:$0xf]  ;;  %v4431_v3 = vld [vmem:[%s4427_s27 + $0xb8] sm:$0xf]  ;;  %v4434_v4 = vld [vmem:[%s4427_s27 + $0xbc] sm:$0x1]  ;;  %s241_s28 = scalar_lea.vmem %s5833_s4, %s3661_s25  ;;  %s245_s6 = scalar_lea.vmem %s5834_s5, %s3661_s25 }
  0x10   : > { %v660_v5 = vshrl.u32 %v277_v2, 16  ;;  %v663_v6 = vshll.u32 %v277_v2, 16  ;;  %v669_v7 = vshll.u32 %v4431_v3, 16  ;;  %v673_v8 = vshrl.u32 %v4431_v3, 16  ;;  %v261_v9 = vld [vmem:[%s4427_s27 + $0x54] sm:$0xf] }
  0x11   : > { %v679_v10 = vshll.u32 %v4434_v4, 16  ;;  %v1159_v11 = vrot.slane %v4434_v4, 5  ;;  %v3696_v12 = vcombine.low %v277_v2, %v4431_v3  ;;  %v4443_v13 = vld [vmem:[%s4427_s27 + $0x58] sm:$0xf]  ;;  %v4446_v14 = vld [vmem:[%s4427_s27 + $0x5c] sm:$0x1] }
  0x12   : > { %v662_v15 = vrot.slane %v660_v5, 4  ;;  %v665_v16 = vrot.slane %v663_v6, 5  ;;  %v671_v17 = vrot.slane %v669_v7, 5  ;;  %v675_v18 = vrot.slane %v673_v8, 4  ;;  %v275_v27 = vld [vmem:[%s4427_s27 + $0xa8] sm:$0xf] }
  0x13   : > { %v681_v19 = vrot.slane %v679_v10, 5  ;;  %4237 = vmatprep.subr.msk.bf16.mxu1 %vm733_vm0, %v3696_v12  ;;  %v468_v20 = vshrl.u32 %v261_v9, 16  ;;  %v471_v21 = vshll.u32 %v261_v9, 16  ;;  %v477_v22 = vshll.u32 %v4443_v13, 16  ;;  %v4461_v33 = vld [vmem:[%s4427_s27 + $0xac] sm:$0xf] }
  0x14   : > { %v666_v23 = vor.u32 %v665_v16, %v662_v15  ;;  %v676_v24 = vor.u32 %v675_v18, %v671_v17  ;;  %v481_v25 = vshrl.u32 %v4443_v13, 16  ;;  %v487_v26 = vshll.u32 %v4446_v14, 16  ;;  %v4469_v45 = vld [vmem:[%s4427_s27 + $0xb0] sm:$0x1]  ;;  %v259_v47 = vld [vmem:[%s4427_s27 + $0x48] sm:$0xf] }
  0x15   : > { %v470_v29 = vrot.slane %v468_v20, 4  ;;  %v473_v30 = vrot.slane %v471_v21, 5  ;;  %v479_v31 = vrot.slane %v477_v22, 5  ;;  %v1103_v32 = vrot.slane %v4446_v14, 5  ;;  %v4476_v56 = vld [vmem:[%s4427_s27 + $0x4c] sm:$0xf] }
  0x16   : > { %v667_v34 = vrot.slane %v666_v23, 4  ;;  %v677_v35 = vrot.slane %v676_v24, 4  ;;  %v483_v36 = vrot.slane %v481_v25, 4  ;;  %v489_v37 = vrot.slane %v487_v26, 5  ;;  %v4486_v2 = vld [vmem:[%s4427_s27 + $0x50] sm:$0x1] }
  0x17   : > { %v474_v38 = vor.u32 %v473_v30, %v470_v29  ;;  %v3688_v39 = vcombine.low %v261_v9, %v4443_v13  ;;  %v636_v40 = vshrl.u32 %v275_v27, 16  ;;  %v639_v41 = vshll.u32 %v275_v27, 16  ;;  %v4496_v22 = vld [vmem:[%s4427_s27 + $0xa0] sm:$0xf]  ;;  %v4502_v30 = vld [vmem:[%s4427_s27 + $0xa4] sm:$0x1] }
  0x18   : > { %v672_v42 = vsel %vm4455_vm3, %v667_v34, %v671_v17  ;;  %v682_v43 = vsel %vm4455_vm3, %v677_v35, %v681_v19  ;;  %v484_v44 = vor.u32 %v483_v36, %v479_v31  ;;  %v645_v46 = vshll.u32 %v4461_v33, 16  ;;  %v273_v17 = vld [vmem:[%s4427_s27 + $0x9c] sm:$0xf]  ;;  %v4753_v14 = vld [vmem:[%s5830_s1 + $0xc] sm:$0xf] }
  0x19   : > { %v3679_v48 = vcombine.low %v672_v42, %v682_v43  ;;  %v475_v49 = vrot.slane %v474_v38, 4  ;;  %v931_v50 = vsel %vm733_vm0, %v3688_v39, 0  ;;  %v638_v51 = vrot.slane %v636_v40, 4  ;;  %v257_v39 = vld [vmem:[%s4427_s27 + $0x3c] sm:$0xf] }
  0x1a   : > { %v485_v52 = vrot.slane %v484_v44, 4  ;;  %4086 = vmatpush3.bf16.xpose.msra.mxu1 %v931_v50  ;;  %v641_v53 = vrot.slane %v639_v41, 5  ;;  %v647_v54 = vrot.slane %v645_v46, 5  ;;  %v649_v55 = vshrl.u32 %v4461_v33, 16  ;;  %v4510_v44 = vld [vmem:[%s4427_s27 + $0x40] sm:$0xf] }
  0x1b   : > { %4229 = vmatprep.subr.msk.bf16.mxu0 %vm733_vm0, %v3679_v48  ;;  %v480_v57 = vsel %vm4455_vm3, %v475_v49, %v479_v31  ;;  %v655_v58 = vshll.u32 %v4469_v45, 16  ;;  %v3695_v59 = vcombine.low %v275_v27, %v4461_v33  ;;  %v444_v60 = vshrl.u32 %v259_v47, 16  ;;  %v1003_v4 = vld [vmem:[%s4427_s27 + $0x3c] sm:$0xe] }
  0x1c   : > { %v490_v61 = vsel %vm4455_vm3, %v485_v52, %v489_v37  ;;  %v642_v62 = vor.u32 %v641_v53, %v638_v51  ;;  %v651_v63 = vrot.slane %v649_v55, 4  ;;  %v447_v5 = vshll.u32 %v259_v47, 16  ;;  %v4518_v53 = vld [vmem:[%s4427_s27 + $0x44] sm:$0x1] }
  0x1d   : > { %v3671_v6 = vcombine.low %v480_v57, %v490_v61  ;;  %v657_v7 = vrot.slane %v655_v58, 5  ;;  %4238 = vmatprep.subr.msk.bf16.mxu1 %vm733_vm0, %v3695_v59  ;;  %v446_v8 = vrot.slane %v444_v60, 4  ;;  %v453_v9 = vshll.u32 %v4476_v56, 16 }
  0x1e   : > { %v643_v10 = vrot.slane %v642_v62, 4  ;;  %v652_v12 = vor.u32 %v651_v63, %v647_v54  ;;  %v449_v15 = vrot.slane %v447_v5, 5  ;;  %v457_v16 = vshrl.u32 %v4476_v56, 16  ;;  %v271_v5 = vld [vmem:[%s4427_s27 + $0x90] sm:$0xf] }
  0x1f   : > { %v759_v18 = vsel %vm733_vm0, %v3671_v6, 0  ;;  %v455_v19 = vrot.slane %v453_v9, 5  ;;  %v463_v20 = vshll.u32 %v4486_v2, 16  ;;  %v3687_v21 = vcombine.low %v259_v47, %v4476_v56 }
  0x20   : > { %4068 = vmatpush3.bf16.xpose.msra.mxu0 %v759_v18  ;;  %v648_v23 = vsel %vm4455_vm3, %v643_v10, %v647_v54  ;;  %v653_v24 = vrot.slane %v652_v12, 4  ;;  %v450_v25 = vor.u32 %v449_v15, %v446_v8  ;;  %v459_v26 = vrot.slane %v457_v16, 4  ;;  %v4528_v10 = vld [vmem:[%s4427_s27 + $0x94] sm:$0xf] }
  0x21   : > { %v465_v27 = vrot.slane %v463_v20, 5  ;;  %v928_v29 = vsel %vm733_vm0, %v3687_v21, 0  ;;  %v612_v31 = vshrl.u32 %v273_v17, 16  ;;  %v615_v34 = vshll.u32 %v273_v17, 16  ;;  %v4535_v21 = vld [vmem:[%s4427_s27 + $0x98] sm:$0x1] }
  0x22   : > { %v658_v35 = vsel %vm4455_vm3, %v653_v24, %v657_v7  ;;  %v451_v36 = vrot.slane %v450_v25, 4  ;;  %v460_v37 = vor.u32 %v459_v26, %v455_v19  ;;  %4088 = vmatpush3.bf16.xpose.msra.mxu1 %v928_v29  ;;  %v621_v38 = vshll.u32 %v4496_v22, 16  ;;  %v255_v29 = vld [vmem:[%s4427_s27 + $0x30] sm:$0xf] }
  0x23   : > { %v3678_v40 = vcombine.low %v648_v23, %v658_v35  ;;  %v614_v41 = vrot.slane %v612_v31, 4  ;;  %v617_v42 = vrot.slane %v615_v34, 5  ;;  %v625_v43 = vshrl.u32 %v4496_v22, 16 }
  0x24   : > { %v456_v46 = vsel %vm4455_vm3, %v451_v36, %v455_v19  ;;  %v461_v47 = vrot.slane %v460_v37, 4  ;;  %v623_v48 = vrot.slane %v621_v38, 5  ;;  %v631_v49 = vshll.u32 %v4502_v30, 16 }
  0x25   : > { %4230 = vmatprep.subr.msk.bf16.mxu0 %vm733_vm0, %v3678_v40  ;;  %v618_v50 = vor.u32 %v617_v42, %v614_v41  ;;  %v627_v51 = vrot.slane %v625_v43, 4  ;;  %v3694_v52 = vcombine.low %v273_v17, %v4496_v22  ;;  %v420_v54 = vshrl.u32 %v257_v39, 16  ;;  %v4545_v41 = vld [vmem:[%s4427_s27 + $0x34] sm:$0xf] }
  0x26   : > { %v466_v55 = vsel %vm4455_vm3, %v461_v47, %v465_v27  ;;  %v633_v57 = vrot.slane %v631_v49, 5  ;;  %v423_v58 = vshll.u32 %v257_v39, 16  ;;  %v429_v59 = vshll.u32 %v4510_v44, 16 }
  0x27   : > { %v3670_v60 = vcombine.low %v456_v46, %v466_v55  ;;  %v619_v61 = vrot.slane %v618_v50, 4  ;;  %v628_v62 = vor.u32 %v627_v51, %v623_v48  ;;  %4239 = vmatprep.subr.msk.bf16.mxu1 %vm733_vm0, %v3694_v52  ;;  %v422_v63 = vrot.slane %v420_v54, 4  ;;  %v4552_v51 = vld [vmem:[%s4427_s27 + $0x38] sm:$0x1] }
  0x28   : > { %v425_v6 = vrot.slane %v423_v58, 5  ;;  %v431_v7 = vrot.slane %v429_v59, 5  ;;  %v433_v8 = vshrl.u32 %v4510_v44, 16  ;;  %v439_v9 = vshll.u32 %v4518_v53, 16  ;;  %v269_v59 = vld [vmem:[%s4427_s27 + $0x84] sm:$0xf] }
  0x29   : > { %v756_v12 = vsel %vm733_vm0, %v3670_v60, 0  ;;  %v624_v15 = vsel %vm4455_vm3, %v619_v61, %v623_v48  ;;  %v629_v16 = vrot.slane %v628_v62, 4  ;;  %v3686_v17 = vcombine.low %v257_v39, %v4510_v44 }
  0x2a   : > { %4070 = vmatpush3.bf16.xpose.msra.mxu0 %v756_v12  ;;  %v426_v18 = vor.u32 %v425_v6, %v422_v63  ;;  %v435_v19 = vrot.slane %v433_v8, 4  ;;  %v441_v20 = vrot.slane %v439_v9, 5  ;;  %v588_v23 = vshrl.u32 %v271_v5, 16  ;;  %v4566_v12 = vld [vmem:[%s4427_s27 + $0x8c] sm:$0x1] }
  0x2b   : > { %v634_v24 = vsel %vm4455_vm3, %v629_v16, %v633_v57  ;;  %v925_v25 = vsel %vm733_vm0, %v3686_v17, 0  ;;  %v591_v26 = vshll.u32 %v271_v5, 16  ;;  %v597_v27 = vshll.u32 %v4528_v10, 16 }
  0x2c   : > { %v3677_v31 = vcombine.low %v624_v15, %v634_v24  ;;  %v427_v34 = vrot.slane %v426_v18, 4  ;;  %v436_v35 = vor.u32 %v435_v19, %v431_v7  ;;  %4090 = vmatpush3.bf16.xpose.msra.mxu1 %v925_v25  ;;  %v590_v36 = vrot.slane %v588_v23, 4  ;;  %v253_v25 = vld [vmem:[%s4427_s27 + $0x24] sm:$0xf] }
  0x2d   : > { %v593_v37 = vrot.slane %v591_v26, 5  ;;  %v599_v38 = vrot.slane %v597_v27, 5  ;;  %v601_v39 = vshrl.u32 %v4528_v10, 16  ;;  %v607_v40 = vshll.u32 %v4535_v21, 16 }
  0x2e   : > { %4231 = vmatprep.subr.msk.bf16.mxu0 %vm733_vm0, %v3677_v31  ;;  %v432_v42 = vsel %vm4455_vm3, %v427_v34, %v431_v7  ;;  %v437_v43 = vrot.slane %v436_v35, 4  ;;  %v3693_v46 = vcombine.low %v271_v5, %v4528_v10  ;;  %v396_v47 = vshrl.u32 %v255_v29, 16  ;;  %v4561_v5 = vld [vmem:[%s4427_s27 + $0x88] sm:$0xf] }
  0x2f   : > { %v594_v48 = vor.u32 %v593_v37, %v590_v36  ;;  %v603_v49 = vrot.slane %v601_v39, 4  ;;  %v609_v50 = vrot.slane %v607_v40, 5  ;;  %v399_v52 = vshll.u32 %v255_v29, 16  ;;  %v4577_v34 = vld [vmem:[%s4427_s27 + $0x28] sm:$0xf] }
  0x30   : > { %v442_v54 = vsel %vm4455_vm3, %v437_v43, %v441_v20  ;;  %4240 = vmatprep.subr.msk.bf16.mxu1 %vm733_vm0, %v3693_v46  ;;  %v398_v55 = vrot.slane %v396_v47, 4  ;;  %v405_v57 = vshll.u32 %v4545_v41, 16  ;;  %v409_v58 = vshrl.u32 %v4545_v41, 16  ;;  %v4581_v39 = vld [vmem:[%s4427_s27 + $0x2c] sm:$0x1] }
  0x31   : > { %v3669_v60 = vcombine.low %v432_v42, %v442_v54  ;;  %v595_v61 = vrot.slane %v594_v48, 4  ;;  %v604_v62 = vor.u32 %v603_v49, %v599_v38  ;;  %v401_v63 = vrot.slane %v399_v52, 5 }
  0x32   : > { %v407_v6 = vrot.slane %v405_v57, 5  ;;  %v411_v7 = vrot.slane %v409_v58, 4  ;;  %v415_v8 = vshll.u32 %v4552_v51, 16  ;;  %v3685_v9 = vcombine.low %v255_v29, %v4545_v41  ;;  %v267_v58 = vld [vmem:[%s4427_s27 + $0x78] sm:$0xf] }
  0x33   : > { %v753_v15 = vsel %vm733_vm0, %v3669_v60, 0  ;;  %v600_v16 = vsel %vm4455_vm3, %v595_v61, %v599_v38  ;;  %v605_v17 = vrot.slane %v604_v62, 4  ;;  %v402_v18 = vor.u32 %v401_v63, %v398_v55 }
  0x34   : > { %4072 = vmatpush3.bf16.xpose.msra.mxu0 %v753_v15  ;;  %v412_v19 = vor.u32 %v411_v7, %v407_v6  ;;  %v417_v20 = vrot.slane %v415_v8, 5  ;;  %v922_v23 = vsel %vm733_vm0, %v3685_v9, 0  ;;  %v564_v24 = vshrl.u32 %v269_v59, 16  ;;  %v4600_v15 = vld [vmem:[%s4427_s27 + $0x80] sm:$0x1] }
  0x35   : > { %v610_v26 = vsel %vm4455_vm3, %v605_v17, %v609_v50  ;;  %v403_v27 = vrot.slane %v402_v18, 4  ;;  %4092 = vmatpush3.bf16.xpose.msra.mxu1 %v922_v23  ;;  %v567_v29 = vshll.u32 %v269_v59, 16  ;;  %v573_v31 = vshll.u32 %v4561_v5, 16 }
  0x36   : > { %v3676_v35 = vcombine.low %v600_v16, %v610_v26  ;;  %v413_v36 = vrot.slane %v412_v19, 4  ;;  %v566_v37 = vrot.slane %v564_v24, 4  ;;  %v577_v38 = vshrl.u32 %v4561_v5, 16 }
  0x37   : > { %v408_v40 = vsel %vm4455_vm3, %v403_v27, %v407_v6  ;;  %v569_v42 = vrot.slane %v567_v29, 5  ;;  %v575_v43 = vrot.slane %v573_v31, 5  ;;  %v583_v46 = vshll.u32 %v4566_v12, 16  ;;  %v4595_v6 = vld [vmem:[%s4427_s27 + $0x7c] sm:$0xf] }
  0x38   : > { %4232 = vmatprep.subr.msk.bf16.mxu0 %vm733_vm0, %v3676_v35  ;;  %v418_v47 = vsel %vm4455_vm3, %v413_v36, %v417_v20  ;;  %v579_v48 = vrot.slane %v577_v38, 4  ;;  %v3692_v49 = vcombine.low %v269_v59, %v4561_v5  ;;  %v372_v50 = vshrl.u32 %v253_v25, 16  ;;  %v251_v27 = vld [vmem:[%s4427_s27 + $0x18] sm:$0xf] }
  0x39   : > { %v3668_v52 = vcombine.low %v408_v40, %v418_v47  ;;  %v570_v54 = vor.u32 %v569_v42, %v566_v37  ;;  %v585_v55 = vrot.slane %v583_v46, 5  ;;  %v375_v57 = vshll.u32 %v253_v25, 16  ;;  %v4610_v37 = vld [vmem:[%s4427_s27 + $0x1c] sm:$0xf] }
  0x3a   : > { %v580_v60 = vor.u32 %v579_v48, %v575_v43  ;;  %4241 = vmatprep.subr.msk.bf16.mxu1 %vm733_vm0, %v3692_v49  ;;  %v374_v61 = vrot.slane %v372_v50, 4  ;;  %v381_v62 = vshll.u32 %v4577_v34, 16  ;;  %v385_v63 = vshrl.u32 %v4577_v34, 16 }
  0x3b   : > { %v750_v59 = vsel %vm733_vm0, %v3668_v52, 0  ;;  %v571_v7 = vrot.slane %v570_v54, 4  ;;  %v377_v8 = vrot.slane %v375_v57, 5  ;;  %v391_v9 = vshll.u32 %v4581_v39, 16  ;;  %v4620_v54 = vld [vmem:[%s4427_s27 + $0x20] sm:$0x1] }
  0x3c   : > { %4074 = vmatpush3.bf16.xpose.msra.mxu0 %v750_v59  ;;  %v581_v16 = vrot.slane %v580_v60, 4  ;;  %v383_v17 = vrot.slane %v381_v62, 5  ;;  %v387_v18 = vrot.slane %v385_v63, 4  ;;  %v3684_v19 = vcombine.low %v253_v25, %v4577_v34  ;;  %v265_v63 = vld [vmem:[%s4427_s27 + $0x6c] sm:$0xf] }
  0x3d   : > { %v576_v20 = vsel %vm4455_vm3, %v571_v7, %v575_v43  ;;  %v378_v23 = vor.u32 %v377_v8, %v374_v61  ;;  %v393_v24 = vrot.slane %v391_v9, 5  ;;  %v540_v26 = vshrl.u32 %v267_v58, 16 }
  0x3e   : > { %v586_v29 = vsel %vm4455_vm3, %v581_v16, %v585_v55  ;;  %v388_v31 = vor.u32 %v387_v18, %v383_v17  ;;  %v919_v35 = vsel %vm733_vm0, %v3684_v19, 0  ;;  %v543_v36 = vshll.u32 %v267_v58, 16  ;;  %v4628_v16 = vld [vmem:[%s4427_s27 + $0x70] sm:$0xf] }
  0x3f   : > { %v3675_v38 = vcombine.low %v576_v20, %v586_v29  ;;  %v379_v40 = vrot.slane %v378_v23, 4  ;;  %4094 = vmatpush3.bf16.xpose.msra.mxu1 %v919_v35  ;;  %v542_v25 = vrot.slane %v540_v26, 4  ;;  %v549_v42 = vshll.u32 %v4595_v6, 16 }
  0x40   : > { %v389_v43 = vrot.slane %v388_v31, 4  ;;  %v545_v46 = vrot.slane %v543_v36, 5  ;;  %v553_v47 = vshrl.u32 %v4595_v6, 16  ;;  %v559_v48 = vshll.u32 %v4600_v15, 16 }
  0x41   : > { %4233 = vmatprep.subr.msk.bf16.mxu0 %vm733_vm0, %v3675_v38  ;;  %v384_v49 = vsel %vm4455_vm3, %v379_v40, %v383_v17  ;;  %v551_v50 = vrot.slane %v549_v42, 5  ;;  %v3691_v52 = vcombine.low %v267_v58, %v4595_v6  ;;  %v348_v55 = vshrl.u32 %v251_v27, 16  ;;  %v4637_v38 = vld [vmem:[%s4427_s27 + $0x74] sm:$0x1] }
  0x42   : > { %v394_v57 = vsel %vm4455_vm3, %v389_v43, %v393_v24  ;;  %v546_v60 = vor.u32 %v545_v46, %v542_v25  ;;  %v555_v61 = vrot.slane %v553_v47, 4  ;;  %v561_v62 = vrot.slane %v559_v48, 5  ;;  %v249_v46 = vld [vmem:[%s4427_s27 + $0xc] sm:$0xf] }
  0x43   : > { %v3667_v59 = vcombine.low %v384_v49, %v394_v57  ;;  %4242 = vmatprep.subr.msk.bf16.mxu1 %vm733_vm0, %v3691_v52  ;;  %v350_v7 = vrot.slane %v348_v55, 4  ;;  %v351_v8 = vshll.u32 %v251_v27, 16  ;;  %v357_v9 = vshll.u32 %v4610_v37, 16 }
  0x44   : > { %v547_v58 = vrot.slane %v546_v60, 4  ;;  %v556_v17 = vor.u32 %v555_v61, %v551_v50  ;;  %v361_v18 = vshrl.u32 %v4610_v37, 16  ;;  %v367_v19 = vshll.u32 %v4620_v54, 16 }
  0x45   : > { %v747_v20 = vsel %vm733_vm0, %v3667_v59, 0  ;;  %v353_v23 = vrot.slane %v351_v8, 5  ;;  %v359_v24 = vrot.slane %v357_v9, 5  ;;  %v3683_v26 = vcombine.low %v251_v27, %v4610_v37 }
  0x46   : > { %4076 = vmatpush3.bf16.xpose.msra.mxu0 %v747_v20  ;;  %v552_v29 = vsel %vm4455_vm3, %v547_v58, %v551_v50  ;;  %v557_v31 = vrot.slane %v556_v17, 4  ;;  %v363_v35 = vrot.slane %v361_v18, 4  ;;  %v369_v36 = vrot.slane %v367_v19, 5  ;;  %v4646_v50 = vld [vmem:[%s4427_s27 + $0x10] sm:$0xf] }
  0x47   : > { %v354_v40 = vor.u32 %v353_v23, %v350_v7  ;;  %v916_v25 = vsel %vm733_vm0, %v3683_v26, 0  ;;  %v516_v42 = vshrl.u32 %v265_v63, 16  ;;  %v519_v43 = vshll.u32 %v265_v63, 16  ;;  %v4654_v17 = vld [vmem:[%s4427_s27 + $0x14] sm:$0x1] }
  0x48   : > { %v562_v47 = vsel %vm4455_vm3, %v557_v31, %v561_v62  ;;  %v364_v27 = vor.u32 %v363_v35, %v359_v24  ;;  %4096 = vmatpush3.bf16.xpose.msra.mxu1 %v916_v25  ;;  %v525_v48 = vshll.u32 %v4628_v16, 16  ;;  %v529_v49 = vshrl.u32 %v4628_v16, 16 }
  0x49   : > { %v3674_v52 = vcombine.low %v552_v29, %v562_v47  ;;  %v355_v55 = vrot.slane %v354_v40, 4  ;;  %v518_v57 = vrot.slane %v516_v42, 4  ;;  %v521_v60 = vrot.slane %v519_v43, 5  ;;  %v263_v29 = vld [vmem:[%s4427_s27 + $0x60] sm:$0xf] }
  0x4a   : > { %v365_v61 = vrot.slane %v364_v27, 4  ;;  %v527_v59 = vrot.slane %v525_v48, 5  ;;  %v531_v7 = vrot.slane %v529_v49, 4  ;;  %v535_v8 = vshll.u32 %v4637_v38, 16  ;;  %v4668_v49 = vld [vmem:[%s4427_s27 + $0x64] sm:$0xf] }
  0x4b   : > { %4234 = vmatprep.subr.msk.bf16.mxu0 %vm733_vm0, %v3674_v52  ;;  %v360_v62 = vsel %vm4455_vm3, %v355_v55, %v359_v24  ;;  %v522_v9 = vor.u32 %v521_v60, %v518_v57  ;;  %v3690_v58 = vcombine.low %v265_v63, %v4628_v16  ;;  %v324_v18 = vshrl.u32 %v249_v46, 16  ;;  %v4671_v52 = vld [vmem:[%s4427_s27 + $0x68] sm:$0x1] }
  0x4c   : > { %v370_v19 = vsel %vm4455_vm3, %v365_v61, %v369_v36  ;;  %v532_v20 = vor.u32 %v531_v7, %v527_v59  ;;  %v537_v23 = vrot.slane %v535_v8, 5  ;;  %v327_v26 = vshll.u32 %v249_v46, 16  ;;  %v247_v7 = vld [vmem:[%s4427_s27] sm:$0xf] }
  0x4d   : > { %v3666_v31 = vcombine.low %v360_v62, %v370_v19  ;;  %v523_v35 = vrot.slane %v522_v9, 4  ;;  %4243 = vmatprep.subr.msk.bf16.mxu1 %vm733_vm0, %v3690_v58  ;;  %v326_v24 = vrot.slane %v324_v18, 4  ;;  %v333_v40 = vshll.u32 %v4646_v50, 16 }
  0x4e   : > { %v533_v63 = vrot.slane %v532_v20, 4  ;;  %v329_v25 = vrot.slane %v327_v26, 5  ;;  %v337_v42 = vshrl.u32 %v4646_v50, 16  ;;  %v343_v36 = vshll.u32 %v4654_v17, 16 }
  0x4f   : > { %v744_v43 = vsel %vm733_vm0, %v3666_v31, 0  ;;  %v528_v47 = vsel %vm4455_vm3, %v523_v35, %v527_v59  ;;  %v335_v27 = vrot.slane %v333_v40, 5  ;;  %v3682_v48 = vcombine.low %v249_v46, %v4646_v50  ;;  %v4683_v35 = vld [vmem:[%s4427_s27 + $0x4] sm:$0xf] }
  0x50   : > { %4078 = vmatpush3.bf16.xpose.msra.mxu0 %v744_v43  ;;  %v538_v55 = vsel %vm4455_vm3, %v533_v63, %v537_v23  ;;  %v330_v57 = vor.u32 %v329_v25, %v326_v24  ;;  %v339_v60 = vrot.slane %v337_v42, 4  ;;  %v345_v61 = vrot.slane %v343_v36, 5  ;;  %v4689_v43 = vld [vmem:[%s4427_s27 + $0x8] sm:$0x1] }
  0x51   : > { %v3673_v8 = vcombine.low %v528_v47, %v538_v55  ;;  %v913_v59 = vsel %vm733_vm0, %v3682_v48, 0  ;;  %v492_v62 = vshrl.u32 %v263_v29, 16  ;;  %v495_v46 = vshll.u32 %v263_v29, 16 }
  0x52   : > { %v331_v9 = vrot.slane %v330_v57, 4  ;;  %v340_v58 = vor.u32 %v339_v60, %v335_v27  ;;  %4098 = vmatpush3.bf16.xpose.msra.mxu1 %v913_v59  ;;  %v501_v18 = vshll.u32 %v4668_v49, 16  ;;  %v505_v19 = vshrl.u32 %v4668_v49, 16 }
  0x53   : > { %4235 = vmatprep.subr.msk.bf16.mxu0 %vm733_vm0, %v3673_v8  ;;  %v494_v20 = vrot.slane %v492_v62, 4  ;;  %v497_v23 = vrot.slane %v495_v46, 5  ;;  %v511_v26 = vshll.u32 %v4671_v52, 16  ;;  %v3689_v31 = vcombine.low %v263_v29, %v4668_v49  ;;  %v1013_v46 = vld [vmem:[%s4427_s27 + $0xb4] sm:$0xe] }
  0x54   : > { %v336_v24 = vsel %vm4455_vm3, %v331_v9, %v335_v27  ;;  %v341_v40 = vrot.slane %v340_v58, 4  ;;  %v503_v63 = vrot.slane %v501_v18, 5  ;;  %v507_v25 = vrot.slane %v505_v19, 4 }
  0x55   : > { %v498_v42 = vor.u32 %v497_v23, %v494_v20  ;;  %v513_v36 = vrot.slane %v511_v26, 5  ;;  %4244 = vmatprep.subr.msk.bf16.mxu1 %vm733_vm0, %v3689_v31  ;;  %v300_v47 = vshrl.u32 %v247_v7, 16  ;;  %v303_v48 = vshll.u32 %v247_v7, 16  ;;  %v4329_v20 = vld [vmem:[%s4427_s27 + $0x60] sm:$0xff]  }
  0x56   : > { %v346_v29 = vsel %vm4455_vm3, %v341_v40, %v345_v61  ;;  %v508_v55 = vor.u32 %v507_v25, %v503_v63  ;;  %v309_v57 = vshll.u32 %v4683_v35, 16  ;;  %v313_v27 = vshrl.u32 %v4683_v35, 16  ;;  %v4328_v40 = vld [vmem:[%s4427_s27 + $0xc0] sm:$0xff]  }
  0x57   : > { %v3665_v60 = vcombine.low %v336_v24, %v346_v29  ;;  %v499_v8 = vrot.slane %v498_v42, 4  ;;  %v302_v59 = vrot.slane %v300_v47, 4  ;;  %v305_v62 = vrot.slane %v303_v48, 5  ;;  %v1005_v24 = vld [vmem:[%s4427_s27 + $0x54] sm:$0xe] }
  0x58   : > { %v509_v9 = vrot.slane %v508_v55, 4  ;;  %v311_v58 = vrot.slane %v309_v57, 5  ;;  %v315_v18 = vrot.slane %v313_v27, 4  ;;  %v319_v19 = vshll.u32 %v4689_v43, 16 }
  0x59   : > { %v741_v61 = vsel %vm733_vm0, %v3665_v60, 0  ;;  %v504_v23 = vsel %vm4455_vm3, %v499_v8, %v503_v63  ;;  %v306_v26 = vor.u32 %v305_v62, %v302_v59  ;;  %v3681_v31 = vcombine.low %v247_v7, %v4683_v35  ;;  %v1012_v63 = vld [vmem:[%s4427_s27 + $0xa8] sm:$0xe] }
  0x5a   : > { %4080 = vmatpush3.bf16.xpose.msra.mxu0 %v741_v61  ;;  %v514_v25 = vsel %vm4455_vm3, %v509_v9, %v513_v36  ;;  %v316_v42 = vor.u32 %v315_v18, %v311_v58  ;;  %v321_v47 = vrot.slane %v319_v19, 5  ;;  %v3713_v29 = vrot.slane %v1013_v46, 9  ;;  %v1004_v62 = vld [vmem:[%s4427_s27 + $0x48] sm:$0xe] }
  0x5b   : > { %v3672_v55 = vcombine.low %v504_v23, %v514_v25  ;;  %v307_v57 = vrot.slane %v306_v26, 4  ;;  %v910_v7 = vsel %vm733_vm0, %v3681_v31, 0  ;;  %v1156_v27 = vrot.slane %v4431_v3, 5  ;;  %v4331_v23 = vld [vmem:[%s4427_s27 + $0x54] sm:$0xff]  }
  0x5c   : > { %v317_v60 = vrot.slane %v316_v42, 4  ;;  %4100 = vmatpush3.bf16.xpose.msra.mxu1 %v910_v7  ;;  %v3705_v36 = vrot.slane %v1005_v24, 9  ;;  %v1100_v8 = vrot.slane %v4443_v13, 5  ;;  %v1445_v59 = vsel %vm733_vm0, %v4329_v20, 0 }
  0x5d   : > { %4236 = vmatprep.subr.msk.bf16.mxu0 %vm733_vm0, %v3672_v55  ;;  %v312_v46 = vsel %vm4455_vm3, %v307_v57, %v311_v58  ;;  %v1157_v9 = vsel %vm4708_vm6, %v3713_v29, %v1156_v27  ;;  %v1158_v18 = vrot.slane %v1156_v27, 4  ;;  %4253 = vmatprep.subr.msk.bf16.mxu1 %vm733_vm0, %v4328_v40  ;;  %v3712_v3 = vrot.slane %v1012_v63, 9  ;;  %v1011_v40 = vld [vmem:[%s4427_s27 + $0x9c] sm:$0xe]  ;;  %v4330_v29 = vld [vmem:[%s4427_s27 + $0xb4] sm:$0xff]   ;;  %v4333_v57 = vld [vmem:[%s4427_s27 + $0x48] sm:$0xff]  }
  0x5e   : > { %v322_v13 = vsel %vm4455_vm3, %v317_v60, %v321_v47  ;;  %v1101_v19 = vsel %vm4708_vm6, %v3705_v36, %v1100_v8  ;;  %v1102_v20 = vrot.slane %v1100_v8, 4  ;;  %v1149_v61 = vrot.slane %v4461_v33, 5 }
  0x5f   : > { %v3664_v58 = vcombine.low %v312_v46, %v322_v13  ;;  %v1160_v26 = vsel %vm4708_vm6, %v1158_v18, %v1159_v11  ;;  %v1152_v31 = vrot.slane %v4469_v45, 5  ;;  %v3704_v24 = vrot.slane %v1004_v62, 9  ;;  %v1010_v62 = vld [vmem:[%s4427_s27 + $0x90] sm:$0xe] }
  0x60   : > { %v3730_v25 = vcombine.low %v1157_v9, %v1160_v26  ;;  %v1104_v42 = vsel %vm4708_vm6, %v1102_v20, %v1103_v32  ;;  %v4742_v33 = vsel %vm4708_vm6, %v3712_v3, %v1149_v61  ;;  %v1151_v47 = vrot.slane %v1149_v61, 4 }
  0x61   : > { %v738_v63 = vsel %vm733_vm0, %v3664_v58, 0  ;;  %v3722_v11 = vcombine.low %v1101_v19, %v1104_v42  ;;  %v1093_v45 = vrot.slane %v4476_v56, 5  ;;  %v1096_v55 = vrot.slane %v4486_v2, 5  ;;  %v1002_v19 = vld [vmem:[%s4427_s27 + $0x30] sm:$0xe] }
  0x62   : > { %4082 = vmatpush3.bf16.xpose.msra.mxu0 %v738_v63  ;;  %v1153_v32 = vsel %vm4708_vm6, %v1151_v47, %v1152_v31  ;;  %v1442_v7 = vsel %vm733_vm0, %v4331_v23, 0  ;;  %v3711_v27 = vrot.slane %v1011_v40, 9  ;;  %v1142_v60 = vrot.slane %v4496_v22, 5  ;;  %v4798_v40 = vld [vmem:[%s5830_s1 + $0x8] sm:$0xf] }
  0x63   : > { %4102 = vmatmul.mubr.msk.bf16.vlgmr.msra.gmra.mxu1 %vm733_vm0, %v4415_v1  ;;  %4245 = vmatprep.subr.msk.bf16.mxu0 %vm733_vm0, %v3730_v25  ;;  %v1236_v56 = vsel %vm733_vm0, %v3722_v11, 0  ;;  %v3729_v2 = vcombine.low %v4742_v33, %v1153_v32  ;;  %v1094_v36 = vsel %vm4708_vm6, %v3704_v24, %v1093_v45  ;;  %v1095_v8 = vrot.slane %v1093_v45, 4  ;;  %v1009_v24 = vld [vmem:[%s4427_s27 + $0x84] sm:$0xe]  ;;  %v4337_v45 = vld [vmem:[%s4427_s27 + $0x30] sm:$0xff]  }
  0x64   : > { %4122 = vmatpush3.bf16.xpose.msra.mxu1 %v1445_v59  ;;  %v4769_v22 = vsel %vm4708_vm6, %v3711_v27, %v1142_v60  ;;  %v1144_v46 = vrot.slane %v1142_v60, 4  ;;  %v1145_v1 = vrot.slane %v4502_v30, 5  ;;  %v3703_v9 = vrot.slane %v1003_v4, 9  ;;  %4137 = vmatprep.mubr.msk.bf16.mxu1 %vm733_vm0, %v4753_v14  ;;  %v4335_v30 = vld [vmem:[%s4427_s27 + $0x3c] sm:$0xff]   ;;  %v1001_v11 = vld [vmem:[%s4427_s27 + $0x24] sm:$0xe] }
  0x65   : > { %v1097_v18 = vsel %vm4708_vm6, %v1095_v8, %v1096_v55  ;;  %4254 = vmatprep.subr.msk.bf16.mxu1 %vm733_vm0, %v4330_v29  ;;  %v1086_v3 = vrot.slane %v4510_v44, 5  ;;  %v1089_v59 = vrot.slane %v4518_v53, 5  ;;  %v4780_v13 = vsel %vm733_vm0, %v4333_v57, 0 }
  0x66   : > { %v3721_v20 = vcombine.low %v1094_v36, %v1097_v18  ;;  %v4786_v61 = vsel %vm4708_vm6, %v1144_v46, %v1145_v1  ;;  %v3710_v23 = vrot.slane %v1010_v62, 9  ;;  %v1135_v58 = vrot.slane %v4528_v10, 5  ;;  %v4332_v10 = vld [vmem:[%s4427_s27 + $0xa8] sm:$0xff]   ;;  %v1000_v1 = vld [vmem:[%s4427_s27 + $0x18] sm:$0xe] }
  0x67   : > { %v3728_v26 = vcombine.low %v4769_v22, %v4786_v61  ;;  %v1087_v44 = vsel %vm4708_vm6, %v3703_v9, %v1086_v3  ;;  %v1088_v53 = vrot.slane %v1086_v3, 4  ;;  %v1138_v31 = vrot.slane %v4535_v21, 5  ;;  %v4339_v9 = vld [vmem:[%s4427_s27 + $0x24] sm:$0xff]  }
  0x68   : > { %v1233_v25 = vsel %vm733_vm0, %v3721_v20, 0  ;;  %v4804_v42 = vsel %vm4708_vm6, %v3710_v23, %v1135_v58  ;;  %v1137_v33 = vrot.slane %v1135_v58, 4  ;;  %v3702_v47 = vrot.slane %v1002_v19, 9  ;;  %v1007_v23 = vld [vmem:[%s4427_s27 + $0x6c] sm:$0xe] }
  0x69   : > { %4084 = vmatmul.mubr.msk.bf16.vlgmr.msra.gmra.mxu0 %vm733_vm0, %v4410_v0  ;;  %v1090_v21 = vsel %vm4708_vm6, %v1088_v53, %v1089_v59  ;;  %v1079_v29 = vrot.slane %v4545_v41, 5  ;;  %v1082_v4 = vrot.slane %v4552_v51, 5  ;;  %v4813_v63 = vsel %vm733_vm0, %v4335_v30, 0 }
  0x6a   : > { %4104 = vmatpush3.bf16.xpose.msra.mxu0 %v1236_v56  ;;  %v3720_v55 = vcombine.low %v1087_v44, %v1090_v21  ;;  %v4819_v57 = vsel %vm4708_vm6, %v1137_v33, %v1138_v31  ;;  %v3709_v0 = vrot.slane %v1009_v24, 9  ;;  %v1128_v32 = vrot.slane %v4561_v5, 5  ;;  %4119 = vmatprep.mubr.msk.bf16.mxu0 %vm733_vm0, %v4798_v40  ;;  %v1008_v56 = vld [vmem:[%s4427_s27 + $0x78] sm:$0xe]  ;;  %v4334_v44 = vld [vmem:[%s4427_s27 + $0x9c] sm:$0xff]  }
  0x6b   : > { %4246 = vmatprep.subr.msk.bf16.mxu0 %vm733_vm0, %v3729_v2  ;;  %v3727_v41 = vcombine.low %v4804_v42, %v4819_v57  ;;  %v1080_v51 = vsel %vm4708_vm6, %v3702_v47, %v1079_v29  ;;  %v1081_v27 = vrot.slane %v1079_v29, 4  ;;  %v1131_v60 = vrot.slane %v4566_v12, 5  ;;  %v999_v47 = vld [vmem:[%s4427_s27 + $0xc] sm:$0xe]  ;;  %v4341_v21 = vld [vmem:[%s4427_s27 + $0x18] sm:$0xff]  }
  0x6c   : > { %4124 = vmatpush3.bf16.xpose.msra.mxu1 %v1442_v7  ;;  %v4832_v5 = vsel %vm733_vm0, %v3720_v55, 0  ;;  %v4836_v36 = vsel %vm4708_vm6, %v3709_v0, %v1128_v32  ;;  %v1130_v2 = vrot.slane %v1128_v32, 4  ;;  %v3701_v8 = vrot.slane %v1001_v11, 9  ;;  %v1006_v0 = vld [vmem:[%s4427_s27 + $0x60] sm:$0xe] }
  0x6d   : > { %4255 = vmatprep.subr.msk.bf16.mxu1 %vm733_vm0, %v4332_v10  ;;  %v1083_v62 = vsel %vm4708_vm6, %v1081_v27, %v1082_v4  ;;  %v1072_v12 = vrot.slane %v4577_v34, 5  ;;  %v1075_v7 = vrot.slane %v4581_v39, 5  ;;  %v4844_v46 = vsel %vm733_vm0, %v4337_v45, 0  ;;  %v998_v27 = vld [vmem:[%s4427_s27] sm:$0xe] }
  0x6e   : > { %v3719_v18 = vcombine.low %v1080_v51, %v1083_v62  ;;  %v4850_v3 = vsel %vm4708_vm6, %v1130_v2, %v1131_v60  ;;  %v3708_v59 = vrot.slane %v1008_v56, 9  ;;  %v1121_v19 = vrot.slane %v4595_v6, 5  ;;  %v4343_v60 = vld [vmem:[%s4427_s27 + $0xc] sm:$0xff]  }
  0x6f   : > { %v3726_v34 = vcombine.low %v4836_v36, %v4850_v3  ;;  %v1073_v39 = vsel %vm4708_vm6, %v3701_v8, %v1072_v12  ;;  %v1074_v30 = vrot.slane %v1072_v12, 4  ;;  %v1124_v20 = vrot.slane %v4600_v15, 5 }
  0x70   : > { %v4860_v58 = vsel %vm733_vm0, %v3719_v18, 0  ;;  %v4865_v53 = vsel %vm4708_vm6, %v3708_v59, %v1121_v19  ;;  %v1123_v6 = vrot.slane %v1121_v19, 4  ;;  %v3700_v31 = vrot.slane %v1000_v1, 9  ;;  %v3827_v1 = vld [vmem:[%s4427_s27 + $0xc0] sm:$0xf] }
  0x71   : > { %v1076_v24 = vsel %vm4708_vm6, %v1074_v30, %v1075_v7  ;;  %v1065_v10 = vrot.slane %v4610_v37, 5  ;;  %v1068_v33 = vrot.slane %v4620_v54, 5  ;;  %v4872_v15 = vsel %vm733_vm0, %v4339_v9, 0  ;;  %v4928_v19 = vld [vmem:[%s4427_s27 + $0xc4] sm:$0xf] }
  0x72   : > { %4106 = vmatpush3.bf16.xpose.msra.mxu0 %v1233_v25  ;;  %v3718_v29 = vcombine.low %v1073_v39, %v1076_v24  ;;  %v4878_v4 = vsel %vm4708_vm6, %v1123_v6, %v1124_v20  ;;  %v3707_v11 = vrot.slane %v1007_v23, 9  ;;  %v1114_v45 = vrot.slane %v4628_v16, 5  ;;  %v4336_v39 = vld [vmem:[%s4427_s27 + $0x90] sm:$0xff]  }
  0x73   : > { %4247 = vmatprep.subr.msk.bf16.mxu0 %vm733_vm0, %v3728_v26  ;;  %v3725_v37 = vcombine.low %v4865_v53, %v4878_v4  ;;  %v1066_v54 = vsel %vm4708_vm6, %v3700_v31, %v1065_v10  ;;  %v1067_v25 = vrot.slane %v1065_v10, 4  ;;  %v1117_v55 = vrot.slane %v4637_v38, 5  ;;  %v4944_v31 = vld [vmem:[%s4427_s27 + $0xc8] sm:$0x1] }
  0x74   : > { %4126 = vmatpush3.bf16.xpose.msra.mxu1 %v4780_v13  ;;  %v4893_v16 = vsel %vm733_vm0, %v3718_v29, 0  ;;  %v4897_v22 = vsel %vm4708_vm6, %v3707_v11, %v1114_v45  ;;  %v1116_v61 = vrot.slane %v1114_v45, 4  ;;  %v3699_v26 = vrot.slane %v999_v47, 9 }
  0x75   : > { %4256 = vmatprep.subr.msk.bf16.mxu1 %vm733_vm0, %v4334_v44  ;;  %v1069_v32 = vsel %vm4708_vm6, %v1067_v25, %v1068_v33  ;;  %v1058_v38 = vrot.slane %v4646_v50, 5  ;;  %v1061_v51 = vrot.slane %v4654_v17, 5  ;;  %v4905_v13 = vsel %vm733_vm0, %v4341_v21, 0  ;;  %v3803_v33 = vld [vmem:[%s4427_s27 + $0x60] sm:$0xf] }
  0x76   : > { %v3717_v56 = vcombine.low %v1066_v54, %v1069_v32  ;;  %v4911_v2 = vsel %vm4708_vm6, %v1116_v61, %v1117_v55  ;;  %v3706_v8 = vrot.slane %v1006_v0, 9  ;;  %v1107_v62 = vrot.slane %v4668_v49, 5  ;;  %v3805_v61 = vld [vmem:[%s4427_s27 + $0x68] sm:$0x1]  ;;  %v3863_v32 = vld [vmem:[%s4427_s27 + $0xc0] sm:$0xe] }
  0x77   : > { %v3724_v50 = vcombine.low %v4897_v22, %v4911_v2  ;;  %v1059_v17 = vsel %vm4708_vm6, %v3699_v26, %v1058_v38  ;;  %v1060_v12 = vrot.slane %v1058_v38, 4  ;;  %v1110_v7 = vrot.slane %v4671_v52, 5 }
  0x78   : > { %v4921_v9 = vsel %vm733_vm0, %v3717_v56, 0  ;;  %v4925_v18 = vsel %vm4708_vm6, %v3706_v8, %v1107_v62  ;;  %v1109_v49 = vrot.slane %v1107_v62, 4  ;;  %v3698_v59 = vrot.slane %v998_v27, 9  ;;  %v4338_v56 = vld [vmem:[%s4427_s27 + $0x84] sm:$0xff]  }
  0x79   : > { %v1062_v30 = vsel %vm4708_vm6, %v1060_v12, %v1061_v51  ;;  %v1051_v20 = vrot.slane %v4683_v35, 5  ;;  %v1054_v52 = vrot.slane %v4689_v43, 5  ;;  %v4936_v23 = vsel %vm733_vm0, %v4343_v60, 0 }
  0x7a   : > { %4108 = vmatpush3.bf16.xpose.msra.mxu0 %v4832_v5  ;;  %v3716_v44 = vcombine.low %v1059_v17, %v1062_v30  ;;  %v4941_v6 = vsel %vm4708_vm6, %v1109_v49, %v1110_v7  ;;  %v1923_v24 = vshrl.u32 %v3827_v1, 16  ;;  %v1926_v10 = vshll.u32 %v3827_v1, 16  ;;  %v3855_v7 = vld [vmem:[%s4427_s27 + $0x60] sm:$0xe] }
  0x7b   : > { %4248 = vmatprep.subr.msk.bf16.mxu0 %vm733_vm0, %v3727_v41  ;;  %v3723_v35 = vcombine.low %v4925_v18, %v4941_v6  ;;  %v1052_v43 = vsel %vm4708_vm6, %v3698_v59, %v1051_v20  ;;  %v1053_v5 = vrot.slane %v1051_v20, 4  ;;  %v1932_v47 = vshll.u32 %v4928_v19, 16  ;;  %v3804_v41 = vld [vmem:[%s4427_s27 + $0x64] sm:$0xf]  ;;  %v3818_v6 = vld [vmem:[%s4427_s27 + $0x9c] sm:$0xf] }
  0x7c   : > { %4128 = vmatpush3.bf16.xpose.msra.mxu1 %v4813_v63  ;;  %v4958_v21 = vsel %vm733_vm0, %v3716_v44, 0  ;;  %v1925_v29 = vrot.slane %v1923_v24, 4  ;;  %v1928_v42 = vrot.slane %v1926_v10, 5  ;;  %v1936_v57 = vshrl.u32 %v4928_v19, 16  ;;  %v3824_v24 = vld [vmem:[%s4427_s27 + $0xb4] sm:$0xf] }
  0x7d   : > { %4257 = vmatprep.subr.msk.bf16.mxu1 %vm733_vm0, %v4336_v39  ;;  %v1055_v11 = vsel %vm4708_vm6, %v1053_v5, %v1054_v52  ;;  %v1934_v45 = vrot.slane %v1932_v47, 5  ;;  %v1942_v54 = vshll.u32 %v4944_v31, 16  ;;  %v1731_v25 = vshrl.u32 %v3803_v33, 16 }
  0x7e   : > { %v3715_v63 = vcombine.low %v1052_v43, %v1055_v11  ;;  %v1929_v55 = vor.u32 %v1928_v42, %v1925_v29  ;;  %v1938_v0 = vrot.slane %v1936_v57, 4  ;;  %v1734_v26 = vshll.u32 %v3803_v33, 16  ;;  %v3825_v42 = vld [vmem:[%s4427_s27 + $0xb8] sm:$0xf]  ;;  %v5001_v11 = vld [vmem:[%s4427_s27 + $0xbc] sm:$0x1] }
  0x7f   : > { %v1944_v38 = vrot.slane %v1942_v54, 5  ;;  %v1733_v51 = vrot.slane %v1731_v25, 4  ;;  %v1740_v27 = vshll.u32 %v3804_v41, 16  ;;  %v1744_v60 = vshrl.u32 %v3804_v41, 16  ;;  %v3800_v25 = vld [vmem:[%s4427_s27 + $0x54] sm:$0xf] }
  0x80   : > { %v4970_v8 = vsel %vm733_vm0, %v3715_v63, 0  ;;  %v1930_v62 = vrot.slane %v1929_v55, 4  ;;  %v1939_v17 = vor.u32 %v1938_v0, %v1934_v45  ;;  %v1736_v12 = vrot.slane %v1734_v26, 5 }
  0x81   : > { %v1742_v1 = vrot.slane %v1740_v27, 5  ;;  %v1746_v49 = vrot.slane %v1744_v60, 4  ;;  %v1750_v59 = vshll.u32 %v3805_v61, 16  ;;  %v3879_v39 = vrot.slane %v3863_v32, 9  ;;  %v5014_v27 = vld [vmem:[%s4427_s27 + $0x5c] sm:$0x1] }
  0x82   : > { %4110 = vmatpush3.bf16.xpose.msra.mxu0 %v4860_v58  ;;  %v1935_v30 = vsel %vm4455_vm3, %v1930_v62, %v1934_v45  ;;  %v1940_v20 = vrot.slane %v1939_v17, 4  ;;  %v1737_v52 = vor.u32 %v1736_v12, %v1733_v51  ;;  %v2261_v44 = vrot.slane %v4928_v19, 5  ;;  %v3862_v60 = vld [vmem:[%s4427_s27 + $0xb4] sm:$0xe] }
  0x83   : > { %4249 = vmatprep.subr.msk.bf16.mxu0 %vm733_vm0, %v3726_v34  ;;  %v1747_v10 = vor.u32 %v1746_v49, %v1742_v1  ;;  %v1752_v33 = vrot.slane %v1750_v59, 5  ;;  %v2264_v43 = vrot.slane %v4944_v31, 5  ;;  %v3871_v58 = vrot.slane %v3855_v7, 9 }
  0x84   : > { %4130 = vmatpush3.bf16.xpose.msra.mxu1 %v4844_v46  ;;  %v1945_v5 = vsel %vm4455_vm3, %v1940_v20, %v1944_v38  ;;  %v1738_v19 = vrot.slane %v1737_v52, 4  ;;  %v4988_v47 = vsel %vm4708_vm6, %v3879_v39, %v2261_v44  ;;  %v2263_v36 = vrot.slane %v2261_v44, 4 }
  0x85   : > { %4258 = vmatprep.subr.msk.bf16.mxu1 %vm733_vm0, %v4338_v56  ;;  %v4991_v3 = vcombine.low %v1935_v30, %v1945_v5  ;;  %v1748_v34 = vrot.slane %v1747_v10, 4  ;;  %v2205_v31 = vrot.slane %v3804_v41, 5  ;;  %v2208_v29 = vrot.slane %v3805_v61, 5  ;;  %v5011_v61 = vld [vmem:[%s4427_s27 + $0x58] sm:$0xf] }
  0x86   : > { %v1743_v46 = vsel %vm4455_vm3, %v1738_v19, %v1742_v1  ;;  %v4998_v57 = vsel %vm4708_vm6, %v2263_v36, %v2264_v43  ;;  %v1899_v45 = vshrl.u32 %v3824_v24, 16  ;;  %v1902_v54 = vshll.u32 %v3824_v24, 16  ;;  %v4340_v56 = vld [vmem:[%s4427_s27 + $0x78] sm:$0xff]  }
  0x87   : > { %v1753_v41 = vsel %vm4455_vm3, %v1748_v34, %v1752_v33  ;;  %v3896_v63 = vcombine.low %v4988_v47, %v4998_v57  ;;  %v2206_v55 = vsel %vm4708_vm6, %v3871_v58, %v2205_v31  ;;  %v2207_v0 = vrot.slane %v2205_v31, 4  ;;  %v3854_v58 = vld [vmem:[%s4427_s27 + $0x54] sm:$0xe]  ;;  %v3821_v34 = vld [vmem:[%s4427_s27 + $0xa8] sm:$0xf] }
  0x88   : > { %v3838_v26 = vcombine.low %v1743_v46, %v1753_v41  ;;  %v1901_v32 = vrot.slane %v1899_v45, 4  ;;  %v1904_v38 = vrot.slane %v1902_v54, 5  ;;  %v1908_v51 = vshll.u32 %v3825_v42, 16  ;;  %v5043_v54 = vld [vmem:[%s4427_s27 + $0xac] sm:$0xf] }
  0x89   : > { %v2209_v62 = vsel %vm4708_vm6, %v2207_v0, %v2208_v29  ;;  %v1912_v17 = vshrl.u32 %v3825_v42, 16  ;;  %v1918_v12 = vshll.u32 %v5001_v11, 16  ;;  %v1707_v7 = vshrl.u32 %v3800_v25, 16 }
  0x8a   : > { %4112 = vmatpush3.bf16.xpose.msra.mxu0 %v4893_v16  ;;  %v5023_v1 = vsel %vm733_vm0, %v3838_v26, 0  ;;  %v3888_v49 = vcombine.low %v2206_v55, %v2209_v62  ;;  %v1905_v59 = vor.u32 %v1904_v38, %v1901_v32  ;;  %v1910_v39 = vrot.slane %v1908_v51, 5  ;;  %v5050_v26 = vld [vmem:[%s4427_s27 + $0xb0] sm:$0x1] }
  0x8b   : > { %4250 = vmatprep.subr.msk.bf16.mxu0 %vm733_vm0, %v3725_v37  ;;  %v1914_v30 = vrot.slane %v1912_v17, 4  ;;  %v1920_v20 = vrot.slane %v1918_v12, 5  ;;  %v1709_v52 = vrot.slane %v1707_v7, 4  ;;  %v1710_v44 = vshll.u32 %v3800_v25, 16  ;;  %v4342_v32 = vld [vmem:[%s4427_s27 + $0x6c] sm:$0xff]  }
  0x8c   : > { %4132 = vmatpush3.bf16.xpose.msra.mxu1 %v4872_v15  ;;  %v5031_v16 = vsel %vm733_vm0, %v3888_v49, 0  ;;  %v1906_v24 = vrot.slane %v1905_v59, 4  ;;  %v1716_v10 = vshll.u32 %v5011_v61, 16  ;;  %v1720_v33 = vshrl.u32 %v5011_v61, 16  ;;  %v3797_v7 = vld [vmem:[%s4427_s27 + $0x48] sm:$0xf] }
  0x8d   : > { %4259 = vmatprep.subr.msk.bf16.mxu1 %vm733_vm0, %v4340_v56  ;;  %v1915_v53 = vor.u32 %v1914_v30, %v1910_v39  ;;  %v1712_v4 = vrot.slane %v1710_v44, 5  ;;  %v1726_v37 = vshll.u32 %v5014_v27, 16  ;;  %v3878_v43 = vrot.slane %v3862_v60, 9 }
  0x8e   : > { %v1911_v15 = vsel %vm4455_vm3, %v1906_v24, %v1910_v39  ;;  %v1718_v5 = vrot.slane %v1716_v10, 5  ;;  %v1722_v19 = vrot.slane %v1720_v33, 4  ;;  %v2254_v36 = vrot.slane %v3825_v42, 5 }
  0x8f   : > { %v1916_v31 = vrot.slane %v1915_v53, 4  ;;  %v1713_v29 = vor.u32 %v1712_v4, %v1709_v52  ;;  %v1728_v46 = vrot.slane %v1726_v37, 5  ;;  %v2257_v45 = vrot.slane %v5001_v11, 5  ;;  %v5086_v52 = vld [vmem:[%s4427_s27 + $0x50] sm:$0x1] }
  0x90   : > { %v1723_v25 = vor.u32 %v1722_v19, %v1718_v5  ;;  %v5047_v41 = vsel %vm4708_vm6, %v3878_v43, %v2254_v36  ;;  %v2256_v55 = vrot.slane %v2254_v36, 4  ;;  %v3870_v0 = vrot.slane %v3854_v58, 9  ;;  %v3861_v53 = vld [vmem:[%s4427_s27 + $0xa8] sm:$0xe] }
  0x91   : > { %v1921_v42 = vsel %vm4455_vm3, %v1916_v31, %v1920_v20  ;;  %v1714_v38 = vrot.slane %v1713_v29, 4  ;;  %v2198_v51 = vrot.slane %v5011_v61, 5  ;;  %v2201_v11 = vrot.slane %v5014_v27, 5 }
  0x92   : > { %4114 = vmatpush3.bf16.xpose.msra.mxu0 %v4921_v9  ;;  %v5058_v60 = vcombine.low %v1911_v15, %v1921_v42  ;;  %v1724_v56 = vrot.slane %v1723_v25, 4  ;;  %v5062_v62 = vsel %vm4708_vm6, %v2256_v55, %v2257_v45  ;;  %v1875_v17 = vshrl.u32 %v3821_v34, 16 }
  0x93   : > { %4251 = vmatprep.subr.msk.bf16.mxu0 %vm733_vm0, %v3724_v50  ;;  %v1719_v61 = vsel %vm4455_vm3, %v1714_v38, %v1718_v5  ;;  %v3895_v9 = vcombine.low %v5047_v41, %v5062_v62  ;;  %v2199_v27 = vsel %vm4708_vm6, %v3870_v0, %v2198_v51  ;;  %v2200_v12 = vrot.slane %v2198_v51, 4  ;;  %v3815_v62 = vld [vmem:[%s4427_s27 + $0x90] sm:$0xf] }
  0x94   : > { %4134 = vmatpush3.bf16.xpose.msra.mxu1 %v4905_v13  ;;  %v1729_v22 = vsel %vm4455_vm3, %v1724_v56, %v1728_v46  ;;  %v1877_v2 = vrot.slane %v1875_v17, 4  ;;  %v1878_v50 = vshll.u32 %v3821_v34, 16  ;;  %v1884_v49 = vshll.u32 %v5043_v54, 16  ;;  %v3798_v13 = vld [vmem:[%s4427_s27 + $0x4c] sm:$0xf] }
  0x95   : > { %4260 = vmatprep.subr.msk.bf16.mxu1 %vm733_vm0, %v4342_v32  ;;  %v3837_v59 = vcombine.low %v1719_v61, %v1729_v22  ;;  %v2202_v39 = vsel %vm4708_vm6, %v2200_v12, %v2201_v11  ;;  %v1888_v30 = vshrl.u32 %v5043_v54, 16  ;;  %v1894_v20 = vshll.u32 %v5050_v26, 16  ;;  %v3853_v34 = vld [vmem:[%s4427_s27 + $0x48] sm:$0xe]  ;;  %v5122_v12 = vld [vmem:[%s4427_s27 + $0xa4] sm:$0x1] }
  0x96   : > { %v3887_v44 = vcombine.low %v2199_v27, %v2202_v39  ;;  %v1880_v24 = vrot.slane %v1878_v50, 5  ;;  %v1886_v10 = vrot.slane %v1884_v49, 5  ;;  %v1683_v33 = vshrl.u32 %v3797_v7, 16  ;;  %v5119_v27 = vld [vmem:[%s4427_s27 + $0xa0] sm:$0xf] }
  0x97   : > { %v5090_v4 = vsel %vm733_vm0, %v3837_v59, 0  ;;  %v1890_v37 = vrot.slane %v1888_v30, 4  ;;  %v1896_v43 = vrot.slane %v1894_v20, 5  ;;  %v1686_v58 = vshll.u32 %v3797_v7, 16  ;;  %v5137_v59 = vld [vmem:[%s4427_s27 + $0x40] sm:$0xf] }
  0x98   : > { %v5093_v15 = vsel %vm733_vm0, %v3887_v44, 0  ;;  %v1881_v5 = vor.u32 %v1880_v24, %v1877_v2  ;;  %v1685_v19 = vrot.slane %v1683_v33, 4  ;;  %v1692_v36 = vshll.u32 %v3798_v13, 16  ;;  %v5149_v33 = vld [vmem:[%s5830_s1 + $0x14] sm:$0xf] }
  0x99   : > { %v1891_v31 = vor.u32 %v1890_v37, %v1886_v10  ;;  %v1688_v29 = vrot.slane %v1686_v58, 5  ;;  %v1696_v46 = vshrl.u32 %v3798_v13, 16  ;;  %v1702_v45 = vshll.u32 %v5086_v52, 16 }
  0x9a   : > { %4116 = vmatpush3.bf16.xpose.msra.mxu0 %v4958_v21  ;;  %v1882_v25 = vrot.slane %v1881_v5, 4  ;;  %v1694_v55 = vrot.slane %v1692_v36, 5  ;;  %v3877_v0 = vrot.slane %v3861_v53, 9  ;;  %v2247_v32 = vrot.slane %v5043_v54, 5 }
  0x9b   : > { %4252 = vmatprep.subr.msk.bf16.mxu0 %vm733_vm0, %v3723_v35  ;;  %v1892_v42 = vrot.slane %v1891_v31, 4  ;;  %v1689_v38 = vor.u32 %v1688_v29, %v1685_v19  ;;  %v1698_v51 = vrot.slane %v1696_v46, 4  ;;  %v1704_v11 = vrot.slane %v1702_v45, 5  ;;  %v3860_v45 = vld [vmem:[%s4427_s27 + $0x9c] sm:$0xe] }
  0x9c   : > { %4136 = vmatpush3.bf16.xpose.msra.mxu1 %v4936_v23  ;;  %v1887_v21 = vsel %vm4455_vm3, %v1882_v25, %v1886_v10  ;;  %v5108_v54 = vsel %vm4708_vm6, %v3877_v0, %v2247_v32  ;;  %v2249_v56 = vrot.slane %v2247_v32, 4  ;;  %v2250_v18 = vrot.slane %v5050_v26, 5  ;;  %v3852_v0 = vld [vmem:[%s4427_s27 + $0x3c] sm:$0xe]  ;;  %v5181_v32 = vld [vmem:[%s5830_s1 + $0x10] sm:$0xf] }
  0x9d   : > { %4269 = vmatprep.subr.msk.bf16.mxu1 %vm733_vm0, %v3896_v63  ;;  %v1897_v23 = vsel %vm4455_vm3, %v1892_v42, %v1896_v43  ;;  %v1690_v35 = vrot.slane %v1689_v38, 4  ;;  %v1699_v17 = vor.u32 %v1698_v51, %v1694_v55  ;;  %v3869_v61 = vrot.slane %v3853_v34, 9  ;;  %v3794_v63 = vld [vmem:[%s4427_s27 + $0x3c] sm:$0xf]  ;;  %v5159_v34 = vld [vmem:[%s4427_s27 + $0x44] sm:$0x1] }
  0x9e   : > { %v5124_v7 = vcombine.low %v1887_v21, %v1897_v23  ;;  %v5128_v26 = vsel %vm4708_vm6, %v2249_v56, %v2250_v18  ;;  %v2191_v47 = vrot.slane %v3798_v13, 5  ;;  %v2194_v57 = vrot.slane %v5086_v52, 5 }
  0x9f   : > { %v1695_v22 = vsel %vm4455_vm3, %v1690_v35, %v1694_v55  ;;  %v1700_v2 = vrot.slane %v1699_v17, 4  ;;  %v3894_v50 = vcombine.low %v5108_v54, %v5128_v26  ;;  %v1851_v49 = vshrl.u32 %v3818_v6, 16 }
  0xa0   : > { %v2192_v39 = vsel %vm4708_vm6, %v3869_v61, %v2191_v47  ;;  %v2193_v30 = vrot.slane %v2191_v47, 4  ;;  %v1854_v20 = vshll.u32 %v3818_v6, 16  ;;  %v1860_v13 = vshll.u32 %v5119_v27, 16 }
  0xa1   : > { %v1705_v52 = vsel %vm4455_vm3, %v1700_v2, %v1704_v11  ;;  %v1853_v44 = vrot.slane %v1851_v49, 4  ;;  %v1864_v24 = vshrl.u32 %v5119_v27, 16  ;;  %v1870_v10 = vshll.u32 %v5122_v12, 16 }
  0xa2   : > { %4118 = vmatpush3.bf16.xpose.msra.mxu0 %v4970_v8  ;;  %v3836_v53 = vcombine.low %v1695_v22, %v1705_v52  ;;  %v2195_v37 = vsel %vm4708_vm6, %v2193_v30, %v2194_v57  ;;  %v1856_v43 = vrot.slane %v1854_v20, 5  ;;  %v1862_v58 = vrot.slane %v1860_v13, 5  ;;  %v3816_v22 = vld [vmem:[%s4427_s27 + $0x94] sm:$0xf]  ;;  %v3791_v52 = vld [vmem:[%s4427_s27 + $0x30] sm:$0xf] }
  0xa3   : > { %4261 = vmatprep.subr.msk.bf16.mxu0 %vm733_vm0, %v4991_v3  ;;  %4138 = vmatmul.mubr.msk.bf16.vlgmr.msra.gmra.mxu1 %vm733_vm0, %v4753_v14  ;;  %v3886_v5 = vcombine.low %v2192_v39, %v2195_v37  ;;  %v1866_v19 = vrot.slane %v1864_v24, 4  ;;  %v1872_v36 = vrot.slane %v1870_v10, 5  ;;  %v1659_v8 = vshrl.u32 %v3794_v63, 16  ;;  %v3817_v39 = vld [vmem:[%s4427_s27 + $0x98] sm:$0x1] }
  0xa4   : > { %4158 = vmatpush3.bf16.xpose.msra.mxu1 %v5031_v16  ;;  %v5163_v31 = vsel %vm733_vm0, %v3836_v53, 0  ;;  %v1857_v29 = vor.u32 %v1856_v43, %v1853_v44  ;;  %v1662_v46 = vshll.u32 %v3794_v63, 16  ;;  %v1668_v3 = vshll.u32 %v5137_v59, 16  ;;  %4173 = vmatprep.mubr.msk.bf16.mxu1 %vm733_vm0, %v5149_v33  ;;  %v3792_v44 = vld [vmem:[%s4427_s27 + $0x34] sm:$0xf] }
  0xa5   : > { %4270 = vmatprep.subr.msk.bf16.mxu1 %vm733_vm0, %v3895_v9  ;;  %v5174_v14 = vsel %vm733_vm0, %v3886_v5, 0  ;;  %v1867_v16 = vor.u32 %v1866_v19, %v1862_v58  ;;  %v1661_v25 = vrot.slane %v1659_v8, 4  ;;  %v1672_v55 = vshrl.u32 %v5137_v59, 16  ;;  %v5225_v37 = vld [vmem:[%s4427_s27 + $0x38] sm:$0x1] }
  0xa6   : > { %v1858_v42 = vrot.slane %v1857_v29, 4  ;;  %v1664_v38 = vrot.slane %v1662_v46, 5  ;;  %v1670_v51 = vrot.slane %v1668_v3, 5  ;;  %v1678_v41 = vshll.u32 %v5159_v34, 16  ;;  %v3859_v3 = vld [vmem:[%s4427_s27 + $0x90] sm:$0xe] }
  0xa7   : > { %v1868_v9 = vrot.slane %v1867_v16, 4  ;;  %v1674_v11 = vrot.slane %v1672_v55, 4  ;;  %v3876_v21 = vrot.slane %v3860_v45, 9  ;;  %v2240_v56 = vrot.slane %v5119_v27, 5 }
  0xa8   : > { %v1863_v18 = vsel %vm4455_vm3, %v1858_v42, %v1862_v58  ;;  %v1665_v6 = vor.u32 %v1664_v38, %v1661_v25  ;;  %v1680_v23 = vrot.slane %v1678_v41, 5  ;;  %v2243_v35 = vrot.slane %v5122_v12, 5 }
  0xa9   : > { %4120 = vmatmul.mubr.msk.bf16.vlgmr.msra.gmra.mxu0 %vm733_vm0, %v4798_v40  ;;  %v1873_v17 = vsel %vm4455_vm3, %v1868_v9, %v1872_v36  ;;  %v1675_v61 = vor.u32 %v1674_v11, %v1670_v51  ;;  %v5195_v47 = vsel %vm4708_vm6, %v3876_v21, %v2240_v56  ;;  %v2242_v27 = vrot.slane %v2240_v56, 4  ;;  %v3851_v21 = vld [vmem:[%s4427_s27 + $0x30] sm:$0xe] }
  0xaa   : > { %4140 = vmatpush3.bf16.xpose.msra.mxu0 %v5023_v1  ;;  %v5198_v57 = vcombine.low %v1863_v18, %v1873_v17  ;;  %v1666_v63 = vrot.slane %v1665_v6, 4  ;;  %v3868_v12 = vrot.slane %v3852_v0, 9  ;;  %v2184_v40 = vrot.slane %v5137_v59, 5  ;;  %4155 = vmatprep.mubr.msk.bf16.mxu0 %vm733_vm0, %v5181_v32 }
  0xab   : > { %4262 = vmatprep.subr.msk.bf16.mxu0 %vm733_vm0, %v5058_v60  ;;  %v1676_v2 = vrot.slane %v1675_v61, 4  ;;  %v2244_v49 = vsel %vm4708_vm6, %v2242_v27, %v2243_v35  ;;  %v2187_v1 = vrot.slane %v5159_v34, 5  ;;  %v1827_v30 = vshrl.u32 %v3815_v62, 16 }
  0xac   : > { %4160 = vmatpush3.bf16.xpose.msra.mxu1 %v5093_v15  ;;  %v1671_v59 = vsel %vm4455_vm3, %v1666_v63, %v1670_v51  ;;  %v3893_v20 = vcombine.low %v5195_v47, %v2244_v49  ;;  %v2185_v13 = vsel %vm4708_vm6, %v3868_v12, %v2184_v40  ;;  %v2186_v60 = vrot.slane %v2184_v40, 4  ;;  %v5247_v47 = vld [vmem:[%s4427_s27 + $0x88] sm:$0xf] }
  0xad   : > { %4271 = vmatprep.subr.msk.bf16.mxu1 %vm733_vm0, %v3894_v50  ;;  %v1681_v24 = vsel %vm4455_vm3, %v1676_v2, %v1680_v23  ;;  %v1829_v15 = vrot.slane %v1827_v30, 4  ;;  %v1830_v10 = vshll.u32 %v3815_v62, 16  ;;  %v1836_v53 = vshll.u32 %v3816_v22, 16  ;;  %v3812_v23 = vld [vmem:[%s4427_s27 + $0x84] sm:$0xf] }
  0xae   : > { %v3835_v43 = vcombine.low %v1671_v59, %v1681_v24  ;;  %v2188_v58 = vsel %vm4708_vm6, %v2186_v60, %v2187_v1  ;;  %v1840_v5 = vshrl.u32 %v3816_v22, 16  ;;  %v1846_v19 = vshll.u32 %v3817_v39, 16  ;;  %v5255_v1 = vld [vmem:[%s4427_s27 + $0x8c] sm:$0x1] }
  0xaf   : > { %v3885_v36 = vcombine.low %v2185_v13, %v2188_v58  ;;  %v1832_v34 = vrot.slane %v1830_v10, 5  ;;  %v1838_v54 = vrot.slane %v1836_v53, 5  ;;  %v1635_v26 = vshrl.u32 %v3791_v52, 16 }
  0xb0   : > { %v5230_v50 = vsel %vm733_vm0, %v3835_v43, 0  ;;  %v1842_v8 = vrot.slane %v1840_v5, 4  ;;  %v1848_v29 = vrot.slane %v1846_v19, 5  ;;  %v1638_v46 = vshll.u32 %v3791_v52, 16  ;;  %v3789_v43 = vld [vmem:[%s4427_s27 + $0x28] sm:$0xf] }
  0xb1   : > { %v2332_v45 = vsel %vm733_vm0, %v3885_v36, 0  ;;  %v1833_v16 = vor.u32 %v1832_v34, %v1829_v15  ;;  %v1637_v25 = vrot.slane %v1635_v26, 4  ;;  %v1644_v55 = vshll.u32 %v3792_v44, 16  ;;  %v3788_v15 = vld [vmem:[%s4427_s27 + $0x24] sm:$0xf] }
  0xb2   : > { %4142 = vmatpush3.bf16.xpose.msra.mxu0 %v5090_v4  ;;  %v1843_v0 = vor.u32 %v1842_v8, %v1838_v54  ;;  %v1640_v42 = vrot.slane %v1638_v46, 5  ;;  %v1648_v38 = vshrl.u32 %v3792_v44, 16  ;;  %v1654_v51 = vshll.u32 %v5225_v37, 16  ;;  %v3790_v26 = vld [vmem:[%s4427_s27 + $0x2c] sm:$0x1] }
  0xb3   : > { %4263 = vmatprep.subr.msk.bf16.mxu0 %vm733_vm0, %v5124_v7  ;;  %v1834_v41 = vrot.slane %v1833_v16, 4  ;;  %v1646_v62 = vrot.slane %v1644_v55, 5  ;;  %v3875_v9 = vrot.slane %v3859_v3, 9  ;;  %v2233_v11 = vrot.slane %v3816_v22, 5  ;;  %v3858_v16 = vld [vmem:[%s4427_s27 + $0x84] sm:$0xe] }
  0xb4   : > { %4162 = vmatpush3.bf16.xpose.msra.mxu1 %v5174_v14  ;;  %v1844_v56 = vrot.slane %v1843_v0, 4  ;;  %v1641_v18 = vor.u32 %v1640_v42, %v1637_v25  ;;  %v1650_v4 = vrot.slane %v1648_v38, 4  ;;  %v1656_v6 = vrot.slane %v1654_v51, 5 }
  0xb5   : > { %4272 = vmatprep.subr.msk.bf16.mxu1 %vm733_vm0, %v3893_v20  ;;  %v1839_v35 = vsel %vm4455_vm3, %v1834_v41, %v1838_v54  ;;  %v2234_v7 = vsel %vm4708_vm6, %v3875_v9, %v2233_v11  ;;  %v2235_v17 = vrot.slane %v2233_v11, 4  ;;  %v2236_v61 = vrot.slane %v3817_v39, 5 }
  0xb6   : > { %v1849_v14 = vsel %vm4455_vm3, %v1844_v56, %v1848_v29  ;;  %v1642_v27 = vrot.slane %v1641_v18, 4  ;;  %v1651_v63 = vor.u32 %v1650_v4, %v1646_v62  ;;  %v3867_v12 = vrot.slane %v3851_v21, 9  ;;  %v3850_v56 = vld [vmem:[%s4427_s27 + $0x24] sm:$0xe] }
  0xb7   : > { %v3842_v40 = vcombine.low %v1839_v35, %v1849_v14  ;;  %v2237_v22 = vsel %vm4708_vm6, %v2235_v17, %v2236_v61  ;;  %v2177_v2 = vrot.slane %v3792_v44, 5  ;;  %v2180_v49 = vrot.slane %v5225_v37, 5  ;;  %v3809_v35 = vld [vmem:[%s4427_s27 + $0x78] sm:$0xf] }
  0xb8   : > { %v1647_v39 = vsel %vm4455_vm3, %v1642_v27, %v1646_v62  ;;  %v1652_v30 = vrot.slane %v1651_v63, 4  ;;  %v3892_v59 = vcombine.low %v2234_v7, %v2237_v22  ;;  %v1803_v20 = vshrl.u32 %v3812_v23, 16  ;;  %v3810_v22 = vld [vmem:[%s4427_s27 + $0x7c] sm:$0xf] }
  0xb9   : > { %v2178_v13 = vsel %vm4708_vm6, %v3867_v12, %v2177_v2  ;;  %v2179_v60 = vrot.slane %v2177_v2, 4  ;;  %v1806_v52 = vshll.u32 %v3812_v23, 16  ;;  %v1812_v24 = vshll.u32 %v5247_v47, 16 }
  0xba   : > { %4144 = vmatpush3.bf16.xpose.msra.mxu0 %v5163_v31  ;;  %v1657_v44 = vsel %vm4455_vm3, %v1652_v30, %v1656_v6  ;;  %v1805_v10 = vrot.slane %v1803_v20, 4  ;;  %v1816_v53 = vshrl.u32 %v5247_v47, 16  ;;  %v1822_v37 = vshll.u32 %v5255_v1, 16 }
  0xbb   : > { %4264 = vmatprep.subr.msk.bf16.mxu0 %vm733_vm0, %v5198_v57  ;;  %v3834_v58 = vcombine.low %v1647_v39, %v1657_v44  ;;  %v2181_v5 = vsel %vm4708_vm6, %v2179_v60, %v2180_v49  ;;  %v1808_v19 = vrot.slane %v1806_v52, 5  ;;  %v1814_v36 = vrot.slane %v1812_v24, 5 }
  0xbc   : > { %4164 = vmatpush3.bf16.xpose.msra.mxu1 %v2332_v45  ;;  %v3884_v31 = vcombine.low %v2178_v13, %v2181_v5  ;;  %v1818_v34 = vrot.slane %v1816_v53, 4  ;;  %v1824_v54 = vrot.slane %v1822_v37, 5  ;;  %v1611_v8 = vshrl.u32 %v3788_v15, 16  ;;  %v3785_v13 = vld [vmem:[%s4427_s27 + $0x18] sm:$0xf] }
  0xbd   : > { %v5275_v29 = vsel %vm733_vm0, %v3834_v58, 0  ;;  %4273 = vmatprep.subr.msk.bf16.mxu1 %vm733_vm0, %v3892_v59  ;;  %v1809_v46 = vor.u32 %v1808_v19, %v1805_v10  ;;  %v1614_v57 = vshll.u32 %v3788_v15, 16  ;;  %v1620_v3 = vshll.u32 %v3789_v43, 16 }
  0xbe   : > { %v2329_v25 = vsel %vm733_vm0, %v3884_v31, 0  ;;  %v1819_v55 = vor.u32 %v1818_v34, %v1814_v36  ;;  %v1613_v45 = vrot.slane %v1611_v8, 4  ;;  %v1624_v0 = vshrl.u32 %v3789_v43, 16 }
  0xbf   : > { %v1810_v42 = vrot.slane %v1809_v46, 4  ;;  %v1616_v38 = vrot.slane %v1614_v57, 5  ;;  %v1622_v51 = vrot.slane %v1620_v3, 5  ;;  %v1630_v41 = vshll.u32 %v3790_v26, 16  ;;  %v3857_v46 = vld [vmem:[%s4427_s27 + $0x78] sm:$0xe] }
  0xc0   : > { %v1820_v62 = vrot.slane %v1819_v55, 4  ;;  %v1626_v9 = vrot.slane %v1624_v0, 4  ;;  %v3874_v11 = vrot.slane %v3858_v16, 9  ;;  %v2226_v21 = vrot.slane %v5247_v47, 5 }
  0xc1   : > { %v1815_v18 = vsel %vm4455_vm3, %v1810_v42, %v1814_v36  ;;  %v1617_v4 = vor.u32 %v1616_v38, %v1613_v45  ;;  %v1632_v6 = vrot.slane %v1630_v41, 5  ;;  %v2229_v23 = vrot.slane %v5255_v1, 5  ;;  %v3811_v1 = vld [vmem:[%s4427_s27 + $0x80] sm:$0x1] }
  0xc2   : > { %4146 = vmatpush3.bf16.xpose.msra.mxu0 %v5230_v50  ;;  %v1825_v7 = vsel %vm4455_vm3, %v1820_v62, %v1824_v54  ;;  %v1627_v17 = vor.u32 %v1626_v9, %v1622_v51  ;;  %v2227_v61 = vsel %vm4708_vm6, %v3874_v11, %v2226_v21  ;;  %v2228_v47 = vrot.slane %v2226_v21, 4  ;;  %v3787_v36 = vld [vmem:[%s4427_s27 + $0x20] sm:$0x1]  ;;  %v3849_v9 = vld [vmem:[%s4427_s27 + $0x18] sm:$0xe] }
  0xc3   : > { %4265 = vmatprep.subr.msk.bf16.mxu0 %vm733_vm0, %v3842_v40  ;;  %v3841_v14 = vcombine.low %v1815_v18, %v1825_v7  ;;  %v1618_v27 = vrot.slane %v1617_v4, 4  ;;  %v3866_v63 = vrot.slane %v3850_v56, 9  ;;  %v2170_v12 = vrot.slane %v3789_v43, 5  ;;  %v3786_v43 = vld [vmem:[%s4427_s27 + $0x1c] sm:$0xf] }
  0xc4   : > { %4166 = vmatpush3.bf16.xpose.msra.mxu1 %v2329_v25  ;;  %v1628_v2 = vrot.slane %v1627_v17, 4  ;;  %v2230_v50 = vsel %vm4708_vm6, %v2228_v47, %v2229_v23  ;;  %v2173_v49 = vrot.slane %v3790_v26, 5  ;;  %v1779_v39 = vshrl.u32 %v3809_v35, 16 }
  0xc5   : > { %v1623_v30 = vsel %vm4455_vm3, %v1618_v27, %v1622_v51  ;;  %v3891_v59 = vcombine.low %v2227_v61, %v2230_v50  ;;  %v2171_v40 = vsel %vm4708_vm6, %v3866_v63, %v2170_v12  ;;  %v2172_v20 = vrot.slane %v2170_v12, 4 }
  0xc6   : > { %v1633_v60 = vsel %vm4455_vm3, %v1628_v2, %v1632_v6  ;;  %v1781_v52 = vrot.slane %v1779_v39, 4  ;;  %v1782_v24 = vshll.u32 %v3809_v35, 16  ;;  %v1788_v15 = vshll.u32 %v3810_v22, 16  ;;  %v3806_v35 = vld [vmem:[%s4427_s27 + $0x6c] sm:$0xf] }
  0xc7   : > { %v3833_v44 = vcombine.low %v1623_v30, %v1633_v60  ;;  %4274 = vmatprep.subr.msk.bf16.mxu1 %vm733_vm0, %v3891_v59  ;;  %v2174_v10 = vsel %vm4708_vm6, %v2172_v20, %v2173_v49  ;;  %v1792_v53 = vshrl.u32 %v3810_v22, 16  ;;  %v1798_v37 = vshll.u32 %v3811_v1, 16  ;;  %v5325_v2 = vld [vmem:[%s4427_s27 + $0x74] sm:$0x1] }
  0xc8   : > { %v3883_v58 = vcombine.low %v2171_v40, %v2174_v10  ;;  %v1784_v5 = vrot.slane %v1782_v24, 5  ;;  %v1790_v19 = vrot.slane %v1788_v15, 5  ;;  %v1587_v31 = vshrl.u32 %v3785_v13, 16 }
  0xc9   : > { %v2006_v34 = vsel %vm733_vm0, %v3833_v44, 0  ;;  %v1794_v54 = vrot.slane %v1792_v53, 4  ;;  %v1800_v26 = vrot.slane %v1798_v37, 5  ;;  %v1590_v8 = vshll.u32 %v3785_v13, 16  ;;  %v3782_v13 = vld [vmem:[%s4427_s27 + $0xc] sm:$0xf] }
  0xca   : > { %4148 = vmatpush3.bf16.xpose.msra.mxu0 %v5275_v29  ;;  %v2326_v57 = vsel %vm733_vm0, %v3883_v58, 0  ;;  %v1785_v3 = vor.u32 %v1784_v5, %v1781_v52  ;;  %v1589_v16 = vrot.slane %v1587_v31, 4  ;;  %v1596_v25 = vshll.u32 %v3786_v43, 16  ;;  %v3783_v44 = vld [vmem:[%s4427_s27 + $0x10] sm:$0xf] }
  0xcb   : > { %4266 = vmatprep.subr.msk.bf16.mxu0 %vm733_vm0, %v3841_v14  ;;  %v1795_v55 = vor.u32 %v1794_v54, %v1790_v19  ;;  %v1592_v45 = vrot.slane %v1590_v8, 5  ;;  %v1600_v0 = vshrl.u32 %v3786_v43, 16  ;;  %v1606_v42 = vshll.u32 %v3787_v36, 16  ;;  %v3807_v14 = vld [vmem:[%s4427_s27 + $0x70] sm:$0xf] }
  0xcc   : > { %4168 = vmatpush3.bf16.xpose.msra.mxu1 %v2326_v57  ;;  %v1786_v38 = vrot.slane %v1785_v3, 4  ;;  %v1598_v51 = vrot.slane %v1596_v25, 5  ;;  %v3873_v41 = vrot.slane %v3857_v46, 9  ;;  %v2219_v62 = vrot.slane %v3810_v22, 5  ;;  %v3856_v46 = vld [vmem:[%s4427_s27 + $0x6c] sm:$0xe] }
  0xcd   : > { %v1796_v29 = vrot.slane %v1795_v55, 4  ;;  %v1593_v11 = vor.u32 %v1592_v45, %v1589_v16  ;;  %v1602_v21 = vrot.slane %v1600_v0, 4  ;;  %v1608_v56 = vrot.slane %v1606_v42, 5 }
  0xce   : > { %v1791_v18 = vsel %vm4455_vm3, %v1786_v38, %v1790_v19  ;;  %v2220_v4 = vsel %vm4708_vm6, %v3873_v41, %v2219_v62  ;;  %v2221_v6 = vrot.slane %v2219_v62, 4  ;;  %v2222_v23 = vrot.slane %v3811_v1, 5  ;;  %v4345_v38 = vld [vmem:[%s4427_s27 + $0x6c] sm:$0xff]  }
  0xcf   : > { %v1801_v7 = vsel %vm4455_vm3, %v1796_v29, %v1800_v26  ;;  %v1594_v17 = vrot.slane %v1593_v11, 4  ;;  %v1603_v61 = vor.u32 %v1602_v21, %v1598_v51  ;;  %v3865_v47 = vrot.slane %v3849_v9, 9  ;;  %v3848_v29 = vld [vmem:[%s4427_s27 + $0xc] sm:$0xe] }
  0xd0   : > { %v3840_v27 = vcombine.low %v1791_v18, %v1801_v7  ;;  %v2223_v63 = vsel %vm4708_vm6, %v2221_v6, %v2222_v23  ;;  %v2163_v12 = vrot.slane %v3786_v43, 5  ;;  %v2166_v22 = vrot.slane %v3787_v36, 5  ;;  %v3784_v36 = vld [vmem:[%s4427_s27 + $0x14] sm:$0x1]  ;;  %v3993_v7 = vld [vmem:[%s4427_s27 + $0xcc] sm:$0xf] }
  0xd1   : > { %v1599_v50 = vsel %vm4455_vm3, %v1594_v17, %v1598_v51  ;;  %v1604_v49 = vrot.slane %v1603_v61, 4  ;;  %v3890_v1 = vcombine.low %v2220_v4, %v2223_v63  ;;  %v1755_v39 = vshrl.u32 %v3806_v35, 16 }
  0xd2   : > { %4150 = vmatpush3.bf16.xpose.msra.mxu0 %v2006_v34  ;;  %v2164_v30 = vsel %vm4708_vm6, %v3865_v47, %v2163_v12  ;;  %v2165_v59 = vrot.slane %v2163_v12, 4  ;;  %v1758_v40 = vshll.u32 %v3806_v35, 16  ;;  %v1764_v20 = vshll.u32 %v3807_v14, 16 }
  0xd3   : > { %4267 = vmatprep.subr.msk.bf16.mxu0 %vm733_vm0, %v3840_v27  ;;  %v1609_v60 = vsel %vm4455_vm3, %v1604_v49, %v1608_v56  ;;  %4275 = vmatprep.subr.msk.bf16.mxu1 %vm733_vm0, %v3890_v1  ;;  %v1757_v52 = vrot.slane %v1755_v39, 4  ;;  %v1768_v24 = vshrl.u32 %v3807_v14, 16  ;;  %v1774_v15 = vshll.u32 %v5325_v2, 16  ;;  %v5355_v27 = vld [vmem:[%s4427_s27 + $0xd0] sm:$0xf] }
  0xd4   : > { %v3832_v10 = vcombine.low %v1599_v50, %v1609_v60  ;;  %v2167_v53 = vsel %vm4708_vm6, %v2165_v59, %v2166_v22  ;;  %v1760_v37 = vrot.slane %v1758_v40, 5  ;;  %v1766_v43 = vrot.slane %v1764_v20, 5  ;;  %v5363_v50 = vld [vmem:[%s4427_s27 + $0xd4] sm:$0x1]  ;;  %v3969_v60 = vld [vmem:[%s4427_s27 + $0x6c] sm:$0xf] }
  0xd5   : > { %v3882_v58 = vcombine.low %v2164_v30, %v2167_v53  ;;  %v1770_v5 = vrot.slane %v1768_v24, 4  ;;  %v1776_v19 = vrot.slane %v1774_v15, 5  ;;  %v1563_v31 = vshrl.u32 %v3782_v13, 16  ;;  %v4344_v15 = vld [vmem:[%s4427_s27 + $0xcc] sm:$0xff]  }
  0xd6   : > { %v2003_v34 = vsel %vm733_vm0, %v3832_v10, 0  ;;  %v1761_v54 = vor.u32 %v1760_v37, %v1757_v52  ;;  %v1566_v26 = vshll.u32 %v3782_v13, 16  ;;  %v1572_v8 = vshll.u32 %v3783_v44, 16  ;;  %v5381_v53 = vld [vmem:[%s4427_s27 + $0x70] sm:$0xf] }
  0xd7   : > { %v2323_v57 = vsel %vm733_vm0, %v3882_v58, 0  ;;  %v1771_v3 = vor.u32 %v1770_v5, %v1766_v43  ;;  %v1565_v16 = vrot.slane %v1563_v31, 4  ;;  %v1576_v25 = vshrl.u32 %v3783_v44, 16 }
  0xd8   : > { %4170 = vmatpush3.bf16.xpose.msra.mxu1 %v2323_v57  ;;  %v1762_v55 = vrot.slane %v1761_v54, 4  ;;  %v1568_v45 = vrot.slane %v1566_v26, 5  ;;  %v1574_v0 = vrot.slane %v1572_v8, 5  ;;  %v1582_v42 = vshll.u32 %v3784_v36, 16 }
  0xd9   : > { %v1772_v51 = vrot.slane %v1771_v3, 4  ;;  %v1578_v41 = vrot.slane %v1576_v25, 4  ;;  %v3872_v62 = vrot.slane %v3856_v46, 9  ;;  %v2212_v9 = vrot.slane %v3807_v14, 5 }
  0xda   : > { %4152 = vmatpush3.bf16.xpose.msra.mxu0 %v2003_v34  ;;  %v1767_v11 = vsel %vm4455_vm3, %v1762_v55, %v1766_v43  ;;  %v1569_v21 = vor.u32 %v1568_v45, %v1565_v16  ;;  %v1584_v56 = vrot.slane %v1582_v42, 5  ;;  %v2215_v18 = vrot.slane %v5325_v2, 5  ;;  %v3990_v16 = vld [vmem:[%s4427_s27 + $0xc0] sm:$0xf]  ;;  %v5395_v42 = vld [vmem:[%s4427_s27 + $0xc4] sm:$0xf] }
  0xdb   : > { %v1777_v4 = vsel %vm4455_vm3, %v1772_v51, %v1776_v19  ;;  %v1579_v6 = vor.u32 %v1578_v41, %v1574_v0  ;;  %v2213_v23 = vsel %vm4708_vm6, %v3872_v62, %v2212_v9  ;;  %v2214_v35 = vrot.slane %v2212_v9, 4  ;;  %v5384_v19 = vld [vmem:[%s4427_s27 + $0x74] sm:$0x1] }
  0xdc   : > { %v3839_v17 = vcombine.low %v1767_v11, %v1777_v4  ;;  %v1570_v61 = vrot.slane %v1569_v21, 4  ;;  %v3864_v47 = vrot.slane %v3848_v29, 9  ;;  %v2156_v14 = vrot.slane %v3783_v44, 5  ;;  %v5403_v4 = vld [vmem:[%s4427_s27 + $0xc8] sm:$0x1] }
  0xdd   : > { %v1580_v63 = vrot.slane %v1579_v6, 4  ;;  %v2216_v12 = vsel %vm4708_vm6, %v2214_v35, %v2215_v18  ;;  %v2159_v22 = vrot.slane %v3784_v36, 5  ;;  %v5360_v2 = vsel %vm733_vm0, %v4345_v38, 0  ;;  %v4347_v36 = vld [vmem:[%s4427_s27 + $0x60] sm:$0xff]  }
  0xde   : > { %4268 = vmatprep.subr.msk.bf16.mxu0 %vm733_vm0, %v3839_v17  ;;  %v1575_v49 = vsel %vm4455_vm3, %v1570_v61, %v1574_v0  ;;  %v3889_v1 = vcombine.low %v2213_v23, %v2216_v12  ;;  %v2157_v39 = vsel %vm4708_vm6, %v3864_v47, %v2156_v14  ;;  %v2158_v30 = vrot.slane %v2156_v14, 4  ;;  %v3966_v35 = vld [vmem:[%s4427_s27 + $0x60] sm:$0xf] }
  0xdf   : > { %v1585_v59 = vsel %vm4455_vm3, %v1580_v63, %v1584_v56  ;;  %v3028_v40 = vshrl.u32 %v3993_v7, 16  ;;  %v3031_v20 = vshll.u32 %v3993_v7, 16  ;;  %v3037_v13 = vshll.u32 %v5355_v27, 16  ;;  %v4346_v61 = vld [vmem:[%s4427_s27 + $0xc0] sm:$0xff]  }
  0xe0   : > { %v3831_v52 = vcombine.low %v1575_v49, %v1585_v59  ;;  %4276 = vmatprep.subr.msk.bf16.mxu1 %vm733_vm0, %v3889_v1  ;;  %v2160_v24 = vsel %vm4708_vm6, %v2158_v30, %v2159_v22  ;;  %v3041_v44 = vshrl.u32 %v5355_v27, 16  ;;  %v3047_v10 = vshll.u32 %v5363_v50, 16  ;;  %v5412_v63 = vld [vmem:[%s4427_s27 + $0x64] sm:$0xf]  ;;  %v5418_v30 = vld [vmem:[%s5830_s1 + $0x18] sm:$0xf] }
  0xe1   : > { %v3881_v37 = vcombine.low %v2157_v39, %v2160_v24  ;;  %v3030_v43 = vrot.slane %v3028_v40, 4  ;;  %v3033_v58 = vrot.slane %v3031_v20, 5  ;;  %v3039_v5 = vrot.slane %v3037_v13, 5  ;;  %v4349_v39 = vld [vmem:[%s4427_s27 + $0x54] sm:$0xff]   ;;  %v5434_v24 = vld [vmem:[%s4427_s27 + $0x68] sm:$0x1] }
  0xe2   : > { %v2000_v31 = vsel %vm733_vm0, %v3831_v52, 0  ;;  %v3043_v34 = vrot.slane %v3041_v44, 4  ;;  %v3049_v54 = vrot.slane %v3047_v10, 5  ;;  %v2836_v26 = vshrl.u32 %v3969_v60, 16 }
  0xe3   : > { %4154 = vmatpush3.bf16.xpose.msra.mxu0 %v2000_v31  ;;  %v2320_v8 = vsel %vm733_vm0, %v3881_v37, 0  ;;  %v3034_v46 = vor.u32 %v3033_v58, %v3030_v43  ;;  %v2839_v57 = vshll.u32 %v3969_v60, 16  ;;  %v2845_v3 = vshll.u32 %v5381_v53, 16  ;;  %v5426_v60 = vld [vmem:[%s5830_s1 + $0x1c] sm:$0xf] }
  0xe4   : > { %4172 = vmatpush3.bf16.xpose.msra.mxu1 %v2320_v8  ;;  %4277 = vmatprep.subr.msk.bf16.mxu0 %vm733_vm0, %v4344_v15  ;;  %v3044_v25 = vor.u32 %v3043_v34, %v3039_v5  ;;  %v2838_v55 = vrot.slane %v2836_v26, 4  ;;  %v2849_v45 = vshrl.u32 %v5381_v53, 16  ;;  %v2855_v0 = vshll.u32 %v5384_v19, 16  ;;  %v3987_v43 = vld [vmem:[%s4427_s27 + $0xb4] sm:$0xf] }
  0xe5   : > { %v3035_v38 = vrot.slane %v3034_v46, 4  ;;  %v2841_v51 = vrot.slane %v2839_v57, 5  ;;  %v2847_v41 = vrot.slane %v2845_v3, 5  ;;  %v5398_v62 = vsel %vm733_vm0, %v4347_v36, 0  ;;  %v5452_v46 = vld [vmem:[%s4427_s27 + $0xb8] sm:$0xf] }
  0xe6   : > { %v3045_v9 = vrot.slane %v3044_v25, 4  ;;  %v2851_v29 = vrot.slane %v2849_v45, 4  ;;  %v2857_v11 = vrot.slane %v2855_v0, 5  ;;  %v3004_v21 = vshrl.u32 %v3990_v16, 16  ;;  %v5458_v25 = vld [vmem:[%s4427_s27 + $0xbc] sm:$0x1] }
  0xe7   : > { %v3040_v56 = vsel %vm4455_vm3, %v3035_v38, %v3039_v5  ;;  %v2842_v18 = vor.u32 %v2841_v51, %v2838_v55  ;;  %v3007_v6 = vshll.u32 %v3990_v16, 16  ;;  %v3013_v23 = vshll.u32 %v5395_v42, 16  ;;  %v4348_v51 = vld [vmem:[%s4427_s27 + $0xb4] sm:$0xff]  }
  0xe8   : > { %v3050_v7 = vsel %vm4455_vm3, %v3045_v9, %v3049_v54  ;;  %v2852_v17 = vor.u32 %v2851_v29, %v2847_v41  ;;  %v3006_v47 = vrot.slane %v3004_v21, 4  ;;  %v3017_v14 = vshrl.u32 %v5395_v42, 16  ;;  %v3963_v9 = vld [vmem:[%s4427_s27 + $0x54] sm:$0xf] }
  0xe9   : > { %v4012_v12 = vcombine.low %v3040_v56, %v3050_v7  ;;  %v2843_v22 = vrot.slane %v2842_v18, 4  ;;  %v3009_v49 = vrot.slane %v3007_v6, 5  ;;  %v3015_v1 = vrot.slane %v3013_v23, 5  ;;  %v5468_v7 = vld [vmem:[%s4427_s27 + $0x58] sm:$0xf] }
  0xea   : > { %4156 = vmatmul.mubr.msk.bf16.vlgmr.msra.gmra.mxu0 %vm733_vm0, %v5181_v32  ;;  %v2853_v59 = vrot.slane %v2852_v17, 4  ;;  %v3019_v40 = vrot.slane %v3017_v14, 4  ;;  %v3023_v20 = vshll.u32 %v5403_v4, 16  ;;  %v2812_v13 = vshrl.u32 %v3966_v35, 16 }
  0xeb   : > { %4176 = vmatpush3.bf16.xpose.msra.mxu0 %v5360_v2  ;;  %4174 = vmatmul.mubr.msk.bf16.vlgmr.msra.gmra.mxu1 %vm733_vm0, %v5149_v33  ;;  %v2848_v52 = vsel %vm4455_vm3, %v2843_v22, %v2847_v41  ;;  %v3010_v32 = vor.u32 %v3009_v49, %v3006_v47  ;;  %v2815_v15 = vshll.u32 %v3966_v35, 16  ;;  %v2821_v44 = vshll.u32 %v5412_v63, 16  ;;  %v5475_v47 = vld [vmem:[%s4427_s27 + $0x5c] sm:$0x1] }
  0xec   : > { %4285 = vmatprep.subr.msk.bf16.mxu1 %vm733_vm0, %v4012_v12  ;;  %v2858_v10 = vsel %vm4455_vm3, %v2853_v59, %v2857_v11  ;;  %4278 = vmatprep.subr.msk.bf16.mxu0 %vm733_vm0, %v4346_v61  ;;  %v3020_v2 = vor.u32 %v3019_v40, %v3015_v1  ;;  %v3025_v37 = vrot.slane %v3023_v20, 5  ;;  %v2814_v33 = vrot.slane %v2812_v13, 4  ;;  %v4351_v59 = vld [vmem:[%s4427_s27 + $0x48] sm:$0xff]  }
  0xed   : > { %v4004_v58 = vcombine.low %v2848_v52, %v2858_v10  ;;  %v3011_v5 = vrot.slane %v3010_v32, 4  ;;  %v2817_v36 = vrot.slane %v2815_v15, 5  ;;  %v2823_v31 = vrot.slane %v2821_v44, 5  ;;  %4191 = vmatprep.mubr.msk.bf16.mxu0 %vm733_vm0, %v5418_v30  ;;  %4209 = vmatprep.mubr.msk.bf16.mxu1 %vm733_vm0, %v5426_v60  ;;  %v3984_v10 = vld [vmem:[%s4427_s27 + $0xa8] sm:$0xf] }
  0xee   : > { %v3021_v34 = vrot.slane %v3020_v2, 4  ;;  %v2825_v54 = vshrl.u32 %v5412_v63, 16  ;;  %v2831_v26 = vshll.u32 %v5434_v24, 16  ;;  %v5449_v8 = vsel %vm733_vm0, %v4349_v39, 0 }
  0xef   : > { %v3126_v57 = vsel %vm733_vm0, %v4004_v58, 0  ;;  %v3016_v3 = vsel %vm4455_vm3, %v3011_v5, %v3015_v1  ;;  %v2818_v16 = vor.u32 %v2817_v36, %v2814_v33  ;;  %v2980_v55 = vshrl.u32 %v3987_v43, 16  ;;  %v5486_v58 = vld [vmem:[%s4427_s27 + $0xac] sm:$0xf] }
  0xf0   : > { %4194 = vmatpush3.bf16.xpose.msra.mxu1 %v3126_v57  ;;  %v3026_v45 = vsel %vm4455_vm3, %v3021_v34, %v3025_v37  ;;  %v2827_v0 = vrot.slane %v2825_v54, 4  ;;  %v2833_v38 = vrot.slane %v2831_v26, 5  ;;  %v2983_v41 = vshll.u32 %v3987_v43, 16  ;;  %v4350_v34 = vld [vmem:[%s4427_s27 + $0xa8] sm:$0xff]   ;;  %v5493_v26 = vld [vmem:[%s4427_s27 + $0xb0] sm:$0x1] }
  0xf1   : > { %v4011_v29 = vcombine.low %v3016_v3, %v3026_v45  ;;  %v2819_v11 = vrot.slane %v2818_v16, 4  ;;  %v2982_v21 = vrot.slane %v2980_v55, 4  ;;  %v2989_v56 = vshll.u32 %v5452_v46, 16  ;;  %v3960_v45 = vld [vmem:[%s4427_s27 + $0x48] sm:$0xf] }
  0xf2   : > { %v2828_v18 = vor.u32 %v2827_v0, %v2823_v31  ;;  %v2985_v6 = vrot.slane %v2983_v41, 5  ;;  %v2993_v23 = vshrl.u32 %v5452_v46, 16  ;;  %v2999_v35 = vshll.u32 %v5458_v25, 16 }
  0xf3   : > { %4178 = vmatpush3.bf16.xpose.msra.mxu0 %v5398_v62  ;;  %4286 = vmatprep.subr.msk.bf16.mxu1 %vm733_vm0, %v4011_v29  ;;  %v2824_v17 = vsel %vm4455_vm3, %v2819_v11, %v2823_v31  ;;  %v2991_v61 = vrot.slane %v2989_v56, 5  ;;  %v2788_v14 = vshrl.u32 %v3963_v9, 16  ;;  %v2791_v12 = vshll.u32 %v3963_v9, 16  ;;  %v5502_v9 = vld [vmem:[%s4427_s27 + $0x4c] sm:$0xf] }
  0xf4   : > { %v2829_v22 = vrot.slane %v2828_v18, 4  ;;  %4279 = vmatprep.subr.msk.bf16.mxu0 %vm733_vm0, %v4348_v51  ;;  %v2986_v49 = vor.u32 %v2985_v6, %v2982_v21  ;;  %v2995_v1 = vrot.slane %v2993_v23, 4  ;;  %v3001_v39 = vrot.slane %v2999_v35, 5 }
  0xf5   : > { %v2790_v62 = vrot.slane %v2788_v14, 4  ;;  %v2793_v40 = vrot.slane %v2791_v12, 5  ;;  %v2797_v20 = vshll.u32 %v5468_v7, 16  ;;  %v2801_v13 = vshrl.u32 %v5468_v7, 16 }
  0xf6   : > { %v2834_v52 = vsel %vm4455_vm3, %v2829_v22, %v2833_v38  ;;  %v2987_v32 = vrot.slane %v2986_v49, 4  ;;  %v2996_v15 = vor.u32 %v2995_v1, %v2991_v61  ;;  %v2807_v44 = vshll.u32 %v5475_v47, 16  ;;  %v4353_v22 = vld [vmem:[%s4427_s27 + $0x3c] sm:$0xff]  }
  0xf7   : > { %v4003_v2 = vcombine.low %v2824_v17, %v2834_v52  ;;  %v2794_v37 = vor.u32 %v2793_v40, %v2790_v62  ;;  %v2799_v33 = vrot.slane %v2797_v20, 5  ;;  %v2803_v43 = vrot.slane %v2801_v13, 4  ;;  %v5513_v17 = vld [vmem:[%s4427_s27 + $0x50] sm:$0x1]  ;;  %v3981_v62 = vld [vmem:[%s4427_s27 + $0x9c] sm:$0xf] }
  0xf8   : > { %v2992_v5 = vsel %vm4455_vm3, %v2987_v32, %v2991_v61  ;;  %v2997_v36 = vrot.slane %v2996_v15, 4  ;;  %v2809_v31 = vrot.slane %v2807_v44, 5  ;;  %v2541_v54 = vsel %vm733_vm0, %v4351_v59, 0  ;;  %v4352_v32 = vld [vmem:[%s4427_s27 + $0x9c] sm:$0xff]  }
  0xf9   : > { %v3123_v57 = vsel %vm733_vm0, %v4003_v2, 0  ;;  %v2795_v3 = vrot.slane %v2794_v37, 4  ;;  %v2804_v16 = vor.u32 %v2803_v43, %v2799_v33  ;;  %v2956_v55 = vshrl.u32 %v3984_v10, 16  ;;  %v5523_v37 = vld [vmem:[%s4427_s27 + $0xa0] sm:$0xf] }
  0xfa   : > { %4196 = vmatpush3.bf16.xpose.msra.mxu1 %v3123_v57  ;;  %v3002_v0 = vsel %vm4455_vm3, %v2997_v36, %v3001_v39  ;;  %v2959_v38 = vshll.u32 %v3984_v10, 16  ;;  %v2965_v51 = vshll.u32 %v5486_v58, 16  ;;  %v2969_v41 = vshrl.u32 %v5486_v58, 16  ;;  %v5527_v36 = vld [vmem:[%s4427_s27 + $0xa4] sm:$0x1] }
  0xfb   : > { %4180 = vmatpush3.bf16.xpose.msra.mxu0 %v5449_v8  ;;  %v4010_v29 = vcombine.low %v2992_v5, %v3002_v0  ;;  %v2800_v11 = vsel %vm4455_vm3, %v2795_v3, %v2799_v33  ;;  %v2805_v21 = vrot.slane %v2804_v16, 4  ;;  %v2958_v56 = vrot.slane %v2956_v55, 4  ;;  %v3957_v55 = vld [vmem:[%s4427_s27 + $0x3c] sm:$0xf] }
  0xfc   : > { %4280 = vmatprep.subr.msk.bf16.mxu0 %vm733_vm0, %v4350_v34  ;;  %v2961_v18 = vrot.slane %v2959_v38, 5  ;;  %v2967_v6 = vrot.slane %v2965_v51, 5  ;;  %v2971_v23 = vrot.slane %v2969_v41, 4  ;;  %v2975_v35 = vshll.u32 %v5493_v26, 16 }
  0xfd   : > { %4287 = vmatprep.subr.msk.bf16.mxu1 %vm733_vm0, %v4010_v29  ;;  %v2810_v8 = vsel %vm4455_vm3, %v2805_v21, %v2809_v31  ;;  %v2764_v61 = vshrl.u32 %v3960_v45, 16  ;;  %v2767_v14 = vshll.u32 %v3960_v45, 16  ;;  %v2773_v12 = vshll.u32 %v5502_v9, 16 }
  0xfe   : > { %v4002_v49 = vcombine.low %v2800_v11, %v2810_v8  ;;  %v2962_v1 = vor.u32 %v2961_v18, %v2958_v56  ;;  %v2972_v39 = vor.u32 %v2971_v23, %v2967_v6  ;;  %v2977_v59 = vrot.slane %v2975_v35, 5  ;;  %v5539_v56 = vld [vmem:[%s4427_s27 + $0x40] sm:$0xf]  ;;  %v4355_v35 = vld [vmem:[%s4427_s27 + $0x30] sm:$0xff]  }
  0xff   : > { %v2766_v40 = vrot.slane %v2764_v61, 4  ;;  %v2769_v20 = vrot.slane %v2767_v14, 5  ;;  %v2775_v13 = vrot.slane %v2773_v12, 5  ;;  %v2777_v52 = vshrl.u32 %v5502_v9, 16 }
 0x100   : > { %v3120_v15 = vsel %vm733_vm0, %v4002_v49, 0  ;;  %v2963_v44 = vrot.slane %v2962_v1, 4  ;;  %v2973_v10 = vrot.slane %v2972_v39, 4  ;;  %v2783_v2 = vshll.u32 %v5513_v17, 16 }
 0x101   : > { %v2770_v33 = vor.u32 %v2769_v20, %v2766_v40  ;;  %v2779_v43 = vrot.slane %v2777_v52, 4  ;;  %v2538_v5 = vsel %vm733_vm0, %v4353_v22, 0  ;;  %v2932_v31 = vshrl.u32 %v3981_v62, 16  ;;  %v5546_v22 = vld [vmem:[%s4427_s27 + $0x44] sm:$0x1]  ;;  %v4354_v52 = vld [vmem:[%s4427_s27 + $0x90] sm:$0xff]  }
 0x102   : > { %4198 = vmatpush3.bf16.xpose.msra.mxu1 %v3120_v15  ;;  %v2968_v34 = vsel %vm4455_vm3, %v2963_v44, %v2967_v6  ;;  %v2978_v57 = vsel %vm4455_vm3, %v2973_v10, %v2977_v59  ;;  %v2785_v3 = vrot.slane %v2783_v2, 5  ;;  %v2935_v16 = vshll.u32 %v3981_v62, 16 }
 0x103   : > { %4182 = vmatpush3.bf16.xpose.msra.mxu0 %v2541_v54  ;;  %v4009_v45 = vcombine.low %v2968_v34, %v2978_v57  ;;  %v2771_v0 = vrot.slane %v2770_v33, 4  ;;  %v2780_v38 = vor.u32 %v2779_v43, %v2775_v13  ;;  %v2934_v51 = vrot.slane %v2932_v31, 4  ;;  %v5557_v33 = vld [vmem:[%s4427_s27 + $0x94] sm:$0xf] }
 0x104   : > { %4281 = vmatprep.subr.msk.bf16.mxu0 %vm733_vm0, %v4352_v32  ;;  %v2937_v41 = vrot.slane %v2935_v16, 5  ;;  %v2941_v29 = vshll.u32 %v5523_v37, 16  ;;  %v2945_v11 = vshrl.u32 %v5523_v37, 16  ;;  %v2951_v21 = vshll.u32 %v5527_v36, 16  ;;  %v3978_v32 = vld [vmem:[%s4427_s27 + $0x90] sm:$0xf] }
 0x105   : > { %4288 = vmatprep.subr.msk.bf16.mxu1 %vm733_vm0, %v4009_v45  ;;  %v2776_v54 = vsel %vm4455_vm3, %v2771_v0, %v2775_v13  ;;  %v2781_v18 = vrot.slane %v2780_v38, 4  ;;  %v2740_v6 = vshrl.u32 %v3957_v55, 16  ;;  %v2743_v23 = vshll.u32 %v3957_v55, 16  ;;  %v5563_v55 = vld [vmem:[%s4427_s27 + $0x98] sm:$0x1] }
 0x106   : > { %v2938_v8 = vor.u32 %v2937_v41, %v2934_v51  ;;  %v2943_v61 = vrot.slane %v2941_v29, 5  ;;  %v2947_v14 = vrot.slane %v2945_v11, 4  ;;  %v2953_v12 = vrot.slane %v2951_v21, 5  ;;  %v3954_v11 = vld [vmem:[%s4427_s27 + $0x30] sm:$0xf] }
 0x107   : > { %v2786_v49 = vsel %vm4455_vm3, %v2781_v18, %v2785_v3  ;;  %v2742_v1 = vrot.slane %v2740_v6, 4  ;;  %v2745_v39 = vrot.slane %v2743_v23, 5  ;;  %v2749_v59 = vshll.u32 %v5539_v56, 16 }
 0x108   : > { %v4001_v62 = vcombine.low %v2776_v54, %v2786_v49  ;;  %v2939_v40 = vrot.slane %v2938_v8, 4  ;;  %v2948_v20 = vor.u32 %v2947_v14, %v2943_v61  ;;  %v2753_v13 = vshrl.u32 %v5539_v56, 16 }
 0x109   : > { %v2746_v15 = vor.u32 %v2745_v39, %v2742_v1  ;;  %v2751_v44 = vrot.slane %v2749_v59, 5  ;;  %v2759_v10 = vshll.u32 %v5546_v22, 16  ;;  %v2535_v2 = vsel %vm733_vm0, %v4355_v35, 0  ;;  %v4357_v59 = vld [vmem:[%s4427_s27 + $0x24] sm:$0xff]  }
 0x10a   : > { %v3117_v43 = vsel %vm733_vm0, %v4001_v62, 0  ;;  %v2944_v31 = vsel %vm4455_vm3, %v2939_v40, %v2943_v61  ;;  %v2949_v34 = vrot.slane %v2948_v20, 4  ;;  %v2755_v57 = vrot.slane %v2753_v13, 4 }
 0x10b   : > { %4200 = vmatpush3.bf16.xpose.msra.mxu1 %v3117_v43  ;;  %4184 = vmatpush3.bf16.xpose.msra.mxu0 %v2538_v5  ;;  %v2747_v3 = vrot.slane %v2746_v15, 4  ;;  %v2761_v16 = vrot.slane %v2759_v10, 5  ;;  %v2908_v45 = vshrl.u32 %v3978_v32, 16  ;;  %v2911_v0 = vshll.u32 %v3978_v32, 16  ;;  %v5572_v5 = vld [vmem:[%s4427_s27 + $0x34] sm:$0xf] }
 0x10c   : > { %v2954_v38 = vsel %vm4455_vm3, %v2949_v34, %v2953_v12  ;;  %v2756_v51 = vor.u32 %v2755_v57, %v2751_v44  ;;  %4282 = vmatprep.subr.msk.bf16.mxu0 %vm733_vm0, %v4354_v52  ;;  %v2917_v41 = vshll.u32 %v5557_v33, 16  ;;  %v2921_v29 = vshrl.u32 %v5557_v33, 16  ;;  %v5579_v12 = vld [vmem:[%s4427_s27 + $0x38] sm:$0x1]  ;;  %v4356_v52 = vld [vmem:[%s4427_s27 + $0x84] sm:$0xff]  }
 0x10d   : > { %v4008_v21 = vcombine.low %v2944_v31, %v2954_v38  ;;  %v2752_v54 = vsel %vm4455_vm3, %v2747_v3, %v2751_v44  ;;  %v2910_v18 = vrot.slane %v2908_v45, 4  ;;  %v2913_v6 = vrot.slane %v2911_v0, 5  ;;  %v3975_v43 = vld [vmem:[%s4427_s27 + $0x84] sm:$0xf]  ;;  %v5590_v45 = vld [vmem:[%s4427_s27 + $0x88] sm:$0xf] }
 0x10e   : > { %v2757_v23 = vrot.slane %v2756_v51, 4  ;;  %v2919_v35 = vrot.slane %v2917_v41, 5  ;;  %v2923_v8 = vrot.slane %v2921_v29, 4  ;;  %v2927_v61 = vshll.u32 %v5563_v55, 16  ;;  %v5597_v41 = vld [vmem:[%s4427_s27 + $0x8c] sm:$0x1] }
 0x10f   : > { %4289 = vmatprep.subr.msk.bf16.mxu1 %vm733_vm0, %v4008_v21  ;;  %v2914_v14 = vor.u32 %v2913_v6, %v2910_v18  ;;  %v2716_v49 = vshrl.u32 %v3954_v11, 16  ;;  %v2719_v1 = vshll.u32 %v3954_v11, 16  ;;  %v2725_v39 = vshll.u32 %v5572_v5, 16 }
 0x110   : > { %v2762_v62 = vsel %vm4455_vm3, %v2757_v23, %v2761_v16  ;;  %v2924_v40 = vor.u32 %v2923_v8, %v2919_v35  ;;  %v2929_v20 = vrot.slane %v2927_v61, 5  ;;  %v2729_v13 = vshrl.u32 %v5572_v5, 16 }
 0x111   : > { %v4000_v32 = vcombine.low %v2752_v54, %v2762_v62  ;;  %v2915_v15 = vrot.slane %v2914_v14, 4  ;;  %v2718_v44 = vrot.slane %v2716_v49, 4  ;;  %v2721_v10 = vrot.slane %v2719_v1, 5  ;;  %v5607_v1 = vld [vmem:[%s4427_s27 + $0x28] sm:$0xf] }
 0x112   : > { %v2925_v31 = vrot.slane %v2924_v40, 4  ;;  %v2727_v34 = vrot.slane %v2725_v39, 5  ;;  %v2731_v57 = vrot.slane %v2729_v13, 4  ;;  %v2735_v3 = vshll.u32 %v5579_v12, 16  ;;  %v5613_v40 = vld [vmem:[%s4427_s27 + $0x2c] sm:$0x1] }
 0x113   : > { %v3114_v16 = vsel %vm733_vm0, %v4000_v32, 0  ;;  %4186 = vmatpush3.bf16.xpose.msra.mxu0 %v2535_v2  ;;  %v2920_v0 = vsel %vm4455_vm3, %v2915_v15, %v2919_v35  ;;  %v2722_v38 = vor.u32 %v2721_v10, %v2718_v44  ;;  %v2532_v51 = vsel %vm733_vm0, %v4357_v59, 0  ;;  %v3951_v2 = vld [vmem:[%s4427_s27 + $0x24] sm:$0xf]  ;;  %v4359_v13 = vld [vmem:[%s4427_s27 + $0x18] sm:$0xff]  }
 0x114   : > { %4202 = vmatpush3.bf16.xpose.msra.mxu1 %v3114_v16  ;;  %v2930_v29 = vsel %vm4455_vm3, %v2925_v31, %v2929_v20  ;;  %v2732_v11 = vor.u32 %v2731_v57, %v2727_v34  ;;  %v2737_v21 = vrot.slane %v2735_v3, 5  ;;  %4283 = vmatprep.subr.msk.bf16.mxu0 %vm733_vm0, %v4356_v52  ;;  %v2884_v54 = vshrl.u32 %v3975_v43, 16  ;;  %v4358_v10 = vld [vmem:[%s4427_s27 + $0x78] sm:$0xff]  }
 0x115   : > { %v4007_v18 = vcombine.low %v2920_v0, %v2930_v29  ;;  %v2723_v6 = vrot.slane %v2722_v38, 4  ;;  %v2887_v23 = vshll.u32 %v3975_v43, 16  ;;  %v2893_v35 = vshll.u32 %v5590_v45, 16 }
 0x116   : > { %v2733_v8 = vrot.slane %v2732_v11, 4  ;;  %v2886_v61 = vrot.slane %v2884_v54, 4  ;;  %v2897_v14 = vshrl.u32 %v5590_v45, 16  ;;  %v2903_v49 = vshll.u32 %v5597_v41, 16  ;;  %v5624_v11 = vld [vmem:[%s4427_s27 + $0x7c] sm:$0xf] }
 0x117   : > { %4290 = vmatprep.subr.msk.bf16.mxu1 %vm733_vm0, %v4007_v18  ;;  %v2728_v39 = vsel %vm4455_vm3, %v2723_v6, %v2727_v34  ;;  %v2889_v59 = vrot.slane %v2887_v23, 5  ;;  %v2895_v62 = vrot.slane %v2893_v35, 5  ;;  %v2692_v20 = vshrl.u32 %v3951_v2, 16  ;;  %v3972_v34 = vld [vmem:[%s4427_s27 + $0x78] sm:$0xf] }
 0x118   : > { %v2738_v52 = vsel %vm4455_vm3, %v2733_v8, %v2737_v21  ;;  %v2899_v32 = vrot.slane %v2897_v14, 4  ;;  %v2905_v15 = vrot.slane %v2903_v49, 5  ;;  %v2695_v44 = vshll.u32 %v3951_v2, 16  ;;  %v5632_v14 = vld [vmem:[%s4427_s27 + $0x80] sm:$0x1] }
 0x119   : > { %v3999_v43 = vcombine.low %v2728_v39, %v2738_v52  ;;  %v2890_v31 = vor.u32 %v2889_v59, %v2886_v61  ;;  %v2694_v57 = vrot.slane %v2692_v20, 4  ;;  %v2701_v3 = vshll.u32 %v5607_v1, 16 }
 0x11a   : > { %v2900_v16 = vor.u32 %v2899_v32, %v2895_v62  ;;  %v2697_v0 = vrot.slane %v2695_v44, 5  ;;  %v2705_v38 = vshrl.u32 %v5607_v1, 16  ;;  %v2711_v29 = vshll.u32 %v5613_v40, 16  ;;  %v3948_v32 = vld [vmem:[%s4427_s27 + $0x18] sm:$0xf] }
 0x11b   : > { %v3111_v21 = vsel %vm733_vm0, %v3999_v43, 0  ;;  %4188 = vmatpush3.bf16.xpose.msra.mxu0 %v2532_v51  ;;  %v2891_v54 = vrot.slane %v2890_v31, 4  ;;  %v2703_v2 = vrot.slane %v2701_v3, 5  ;;  %v2529_v18 = vsel %vm733_vm0, %v4359_v13, 0  ;;  %v5640_v44 = vld [vmem:[%s4427_s27 + $0x1c] sm:$0xf] }
 0x11c   : > { %4204 = vmatpush3.bf16.xpose.msra.mxu1 %v3111_v21  ;;  %v2901_v6 = vrot.slane %v2900_v16, 4  ;;  %v2698_v23 = vor.u32 %v2697_v0, %v2694_v57  ;;  %v2707_v35 = vrot.slane %v2705_v38, 4  ;;  %v2713_v8 = vrot.slane %v2711_v29, 5  ;;  %4284 = vmatprep.subr.msk.bf16.mxu0 %vm733_vm0, %v4358_v10  ;;  %v5647_v0 = vld [vmem:[%s4427_s27 + $0x20] sm:$0x1] }
 0x11d   : > { %v2896_v61 = vsel %vm4455_vm3, %v2891_v54, %v2895_v62  ;;  %v2860_v49 = vshrl.u32 %v3972_v34, 16  ;;  %v2863_v51 = vshll.u32 %v3972_v34, 16  ;;  %v2869_v39 = vshll.u32 %v5624_v11, 16 }
 0x11e   : > { %v2906_v59 = vsel %vm4455_vm3, %v2901_v6, %v2905_v15  ;;  %v2699_v20 = vrot.slane %v2698_v23, 4  ;;  %v2708_v13 = vor.u32 %v2707_v35, %v2703_v2  ;;  %v2873_v52 = vshrl.u32 %v5624_v11, 16  ;;  %v4029_v35 = vld [vmem:[%s4427_s27 + $0xcc] sm:$0xe] }
 0x11f   : > { %v4006_v10 = vcombine.low %v2896_v61, %v2906_v59  ;;  %v2862_v43 = vrot.slane %v2860_v49, 4  ;;  %v2865_v62 = vrot.slane %v2863_v51, 5  ;;  %v2871_v31 = vrot.slane %v2869_v39, 5 }
 0x120   : > { %v2704_v57 = vsel %vm4455_vm3, %v2699_v20, %v2703_v2  ;;  %v2709_v3 = vrot.slane %v2708_v13, 4  ;;  %v2875_v34 = vrot.slane %v2873_v52, 4  ;;  %v2879_v15 = vshll.u32 %v5632_v14, 16 }
 0x121   : > { %4291 = vmatprep.subr.msk.bf16.mxu1 %vm733_vm0, %v4006_v10  ;;  %v2866_v16 = vor.u32 %v2865_v62, %v2862_v43  ;;  %v2668_v38 = vshrl.u32 %v3948_v32, 16  ;;  %v2671_v29 = vshll.u32 %v3948_v32, 16  ;;  %v2677_v21 = vshll.u32 %v5640_v44, 16  ;;  %v4021_v10 = vld [vmem:[%s4427_s27 + $0x6c] sm:$0xe] }
 0x122   : > { %v2714_v54 = vsel %vm4455_vm3, %v2709_v3, %v2713_v8  ;;  %v2876_v6 = vor.u32 %v2875_v34, %v2871_v31  ;;  %v2881_v23 = vrot.slane %v2879_v15, 5  ;;  %v2681_v2 = vshrl.u32 %v5640_v44, 16 }
 0x123   : > { %v3998_v61 = vcombine.low %v2704_v57, %v2714_v54  ;;  %4190 = vmatpush3.bf16.xpose.msra.mxu0 %v2529_v18  ;;  %v2867_v49 = vrot.slane %v2866_v16, 4  ;;  %v2670_v51 = vrot.slane %v2668_v38, 4  ;;  %v2673_v39 = vrot.slane %v2671_v29, 5  ;;  %v991_v59 = vpop.f32.mrf.mxu1  ;;  %v4028_v38 = vld [vmem:[%s4427_s27 + $0xc0] sm:$0xe] }
 0x124   : > { %v2877_v20 = vrot.slane %v2876_v6, 4  ;;  %v2679_v13 = vrot.slane %v2677_v21, 5  ;;  %v2683_v52 = vrot.slane %v2681_v2, 4  ;;  %v2687_v32 = vshll.u32 %v5647_v0, 16 }
 0x125   : > { %v3108_v8 = vsel %vm733_vm0, %v3998_v61, 0  ;;  %v2872_v43 = vsel %vm4455_vm3, %v2867_v49, %v2871_v31  ;;  %v2674_v62 = vor.u32 %v2673_v39, %v2670_v51  ;;  %v4045_v3 = vrot.slane %v4029_v35, 9  ;;  %v993_v57 = vpop.f32.mrf.mxu1 }
 0x126   : > { %4206 = vmatpush3.bf16.xpose.msra.mxu1 %v3108_v8  ;;  %v2882_v18 = vsel %vm4455_vm3, %v2877_v20, %v2881_v23  ;;  %v2684_v34 = vor.u32 %v2683_v52, %v2679_v13  ;;  %v2689_v15 = vrot.slane %v2687_v32, 5  ;;  %v3366_v16 = vrot.slane %v5355_v27, 5  ;;  %v5670_v23 = vld [vmem:[%s5830_s1 + $0x20] sm:$0xf] }
 0x127   : > { %v4005_v29 = vcombine.low %v2872_v43, %v2882_v18  ;;  %v2675_v21 = vrot.slane %v2674_v62, 4  ;;  %v3369_v54 = vrot.slane %v5363_v50, 5  ;;  %v4037_v6 = vrot.slane %v4021_v10, 9  ;;  %v995_v2 = vpop.f32.mrf.mxu1  ;;  %v4020_v52 = vld [vmem:[%s4427_s27 + $0x60] sm:$0xe] }
 0x128   : > { %v2685_v31 = vrot.slane %v2684_v34, 4  ;;  %v3367_v35 = vsel %vm4708_vm6, %v4045_v3, %v3366_v16  ;;  %v3368_v61 = vrot.slane %v3366_v16, 4  ;;  %v3310_v49 = vrot.slane %v5381_v53, 5  ;;  %v4027_v3 = vld [vmem:[%s4427_s27 + $0xb4] sm:$0xe] }
 0x129   : > { %4292 = vmatprep.subr.msk.bf16.mxu1 %vm733_vm0, %v4005_v29  ;;  %v2680_v27 = vsel %vm4455_vm3, %v2675_v21, %v2679_v13  ;;  %v819_v50 = vpop.f32.mrf.mxu0  ;;  %v3313_v51 = vrot.slane %v5384_v19, 5  ;;  %v4044_v39 = vrot.slane %v4028_v38, 9  ;;  %v3359_v20 = vrot.slane %v5395_v42, 5  ;;  %v996_v32 = vpop.f32.mrf.mxu1 }
 0x12a   : > { %v2690_v53 = vsel %vm4455_vm3, %v2685_v31, %v2689_v15  ;;  %v5680_v10 = vadd.f32 %v991_v59, %v819_v50  ;;  %4192 = vmatmul.mubr.msk.bf16.vlgmr.msra.gmra.mxu0 %vm733_vm0, %v5418_v30  ;;  %v3370_v13 = vsel %vm4708_vm6, %v3368_v61, %v3369_v54  ;;  %v3311_v8 = vsel %vm4708_vm6, %v4037_v6, %v3310_v49  ;;  %v4019_v54 = vld [vmem:[%s4427_s27 + $0x54] sm:$0xe] }
 0x12b   : > { %v3997_v19 = vcombine.low %v2680_v27, %v2690_v53  ;;  %v4062_v43 = vcombine.low %v3367_v35, %v3370_v13  ;;  %v3312_v42 = vrot.slane %v3310_v49, 4  ;;  %v821_v62 = vpop.f32.mrf.mxu0  ;;  %v3360_v28 = vsel %vm4708_vm6, %v4044_v39, %v3359_v20  ;;  %4227 = vmatprep.mubr.msk.bf16.mxu0 %vm733_vm0, %v5670_v23 }
 0x12c   : > { %v5693_v59 = vadd.f32 %v993_v57, %v821_v62  ;;  %v3361_v30 = vrot.slane %v3359_v20, 4  ;;  %v3362_v18 = vrot.slane %v5403_v4, 5  ;;  %v4036_v34 = vrot.slane %v4020_v52, 9 }
 0x12d   : > { %v3105_v15 = vsel %vm733_vm0, %v3997_v19, 0  ;;  %4293 = vmatprep.subr.msk.bf16.mxu0 %vm733_vm0, %v4062_v43  ;;  %v3314_v16 = vsel %vm4708_vm6, %v3312_v42, %v3313_v51  ;;  %v823_v38 = vpop.f32.mrf.mxu0  ;;  %v3303_v29 = vrot.slane %v5412_v63, 5  ;;  %v3306_v21 = vrot.slane %v5434_v24, 5  ;;  %v4018_v51 = vld [vmem:[%s4427_s27 + $0x48] sm:$0xe] }
 0x12e   : > { %4208 = vmatpush3.bf16.xpose.msra.mxu1 %v3105_v15  ;;  %v4054_v57 = vcombine.low %v3311_v8, %v3314_v16  ;;  %v3363_v4 = vsel %vm4708_vm6, %v3361_v30, %v3362_v18  ;;  %v4043_v6 = vrot.slane %v4027_v3, 9  ;;  %v3352_v2 = vrot.slane %v5452_v46, 5  ;;  %v4026_v43 = vld [vmem:[%s4427_s27 + $0xa8] sm:$0xe]  ;;  %v4025_v38 = vld [vmem:[%s4427_s27 + $0x9c] sm:$0xe] }
 0x12f   : > { %v824_v31 = vpop.f32.mrf.mxu0  ;;  %v4061_v35 = vcombine.low %v3360_v28, %v3363_v4  ;;  %v3304_v61 = vsel %vm4708_vm6, %v4036_v34, %v3303_v29  ;;  %v3305_v49 = vrot.slane %v3303_v29, 4  ;;  %v3355_v63 = vrot.slane %v5458_v25, 5 }
 0x130   : > { %v3446_v27 = vsel %vm733_vm0, %v4054_v57, 0  ;;  %v3354_v24 = vrot.slane %v3352_v2, 4  ;;  %v4035_v50 = vrot.slane %v4019_v54, 9  ;;  %v3296_v46 = vrot.slane %v5468_v7, 5 }
 0x131   : > { %4212 = vmatpush3.bf16.xpose.msra.mxu0 %v3446_v27  ;;  %v3307_v39 = vsel %vm4708_vm6, %v3305_v49, %v3306_v21  ;;  %v3299_v20 = vrot.slane %v5475_v47, 5  ;;  %v3353_v25 = vsel %vm4708_vm6, %v4043_v6, %v3352_v2  ;;  %v3345_v8 = vrot.slane %v5486_v58, 5  ;;  %v4017_v6 = vld [vmem:[%s4427_s27 + $0x3c] sm:$0xe] }
 0x132   : > { %4294 = vmatprep.subr.msk.bf16.mxu0 %vm733_vm0, %v4061_v35  ;;  %v4053_v52 = vcombine.low %v3304_v61, %v3307_v39  ;;  %v3356_v32 = vsel %vm4708_vm6, %v3354_v24, %v3355_v63  ;;  %v3297_v53 = vsel %vm4708_vm6, %v4035_v50, %v3296_v46  ;;  %v3298_v13 = vrot.slane %v3296_v46, 4  ;;  %v4024_v63 = vld [vmem:[%s4427_s27 + $0x90] sm:$0xe] }
 0x133   : > { %v4034_v19 = vrot.slane %v4018_v51, 9  ;;  %v3289_v7 = vrot.slane %v5502_v9, 5  ;;  %v4060_v47 = vcombine.low %v3353_v25, %v3356_v32  ;;  %v3292_v62 = vrot.slane %v5513_v17, 5 }
 0x134   : > { %v3300_v42 = vsel %vm4708_vm6, %v3298_v13, %v3299_v20  ;;  %v3443_v28 = vsel %vm733_vm0, %v4053_v52, 0  ;;  %v4042_v18 = vrot.slane %v4026_v43, 9  ;;  %v3347_v9 = vrot.slane %v3345_v8, 4  ;;  %v4016_v20 = vld [vmem:[%s4427_s27 + $0x30] sm:$0xe] }
 0x135   : > { %4210 = vmatmul.mubr.msk.bf16.vlgmr.msra.gmra.mxu1 %vm733_vm0, %v5426_v60  ;;  %v4052_v3 = vcombine.low %v3297_v53, %v3300_v42  ;;  %v3290_v58 = vsel %vm4708_vm6, %v4034_v19, %v3289_v7  ;;  %v3291_v30 = vrot.slane %v3289_v7, 4  ;;  %v3348_v34 = vrot.slane %v5493_v26, 5  ;;  %v4023_v43 = vld [vmem:[%s4427_s27 + $0x84] sm:$0xe] }
 0x136   : > { %v3346_v17 = vsel %vm4708_vm6, %v4042_v18, %v3345_v8  ;;  %v3338_v29 = vrot.slane %v5523_v37, 5  ;;  %v4041_v54 = vrot.slane %v4025_v38, 9  ;;  %v3341_v4 = vrot.slane %v5527_v36, 5 }
 0x137   : > { %v3293_v60 = vsel %vm4708_vm6, %v3291_v30, %v3292_v62  ;;  %v3349_v16 = vsel %vm4708_vm6, %v3347_v9, %v3348_v34  ;;  %v3440_v21 = vsel %vm733_vm0, %v4052_v3, 0  ;;  %v3282_v2 = vrot.slane %v5539_v56, 5  ;;  %v3515_v56 = vld [vmem:[%s5831_s2] sm:$0xff] }
 0x138   : > { %v4051_v15 = vcombine.low %v3290_v58, %v3293_v60  ;;  %v4059_v26 = vcombine.low %v3346_v17, %v3349_v16  ;;  %v3340_v57 = vrot.slane %v3338_v29, 4  ;;  %v3339_v31 = vsel %vm4708_vm6, %v4041_v54, %v3338_v29  ;;  %v4015_v58 = vld [vmem:[%s4427_s27 + $0x24] sm:$0xe]  ;;  %v4014_v54 = vld [vmem:[%s4427_s27 + $0x18] sm:$0xe] }
 0x139   : > { %4214 = vmatpush3.bf16.xpose.msra.mxu0 %v3443_v28  ;;  %v4033_v35 = vrot.slane %v4017_v6, 9  ;;  %v3284_v61 = vrot.slane %v3282_v2, 4  ;;  %v3285_v49 = vrot.slane %v5546_v22, 5  ;;  %v3331_v36 = vrot.slane %v5557_v33, 5 }
 0x13a   : > { %4295 = vmatprep.subr.msk.bf16.mxu0 %vm733_vm0, %v4060_v47  ;;  %v3342_v37 = vsel %vm4708_vm6, %v3340_v57, %v3341_v4  ;;  %v4368_v27 = vmov 0   ;;  %v3437_v24 = vsel %vm733_vm0, %v4051_v15, 0  ;;  %v4040_v39 = vrot.slane %v4024_v63, 9  ;;  %v4022_v15 = vld [vmem:[%s4427_s27 + $0x78] sm:$0xe] }
 0x13b   : > { %4311 = vset.pattern.permute.xlu0 %v4368_v27  ;;  %v4058_v50 = vcombine.low %v3339_v31, %v3342_v37  ;;  %v3283_v51 = vsel %vm4708_vm6, %v4033_v35, %v3282_v2  ;;  %v3286_v22 = vsel %vm4708_vm6, %v3284_v61, %v3285_v49  ;;  %v3333_v46 = vrot.slane %v3331_v36, 4 }
 0x13c   : > { %3518 = vperm.xlu0 %4311, %v3515_v56   ;;  %v3334_v33 = vrot.slane %v5563_v55, 5  ;;  %v3275_v52 = vrot.slane %v5572_v5, 5  ;;  %v4050_v25 = vcombine.low %v3283_v51, %v3286_v22  ;;  %v3332_v32 = vsel %vm4708_vm6, %v4040_v39, %v3331_v36 }
 0x13d   : > { %v4032_v53 = vrot.slane %v4016_v20, 9  ;;  %v3278_v19 = vrot.slane %v5579_v12, 5  ;;  %v3324_v55 = vrot.slane %v5590_v45, 5  ;;  %v4039_v42 = vrot.slane %v4023_v43, 9 }
 0x13e   : > { %v3335_v13 = vsel %vm4708_vm6, %v3333_v46, %v3334_v33  ;;  %v3277_v8 = vrot.slane %v3275_v52, 4  ;;  %v3434_v5 = vsel %vm733_vm0, %v4050_v25, 0  ;;  %v3327_v3 = vrot.slane %v5597_v41, 5 }
 0x13f   : > { %v4057_v7 = vcombine.low %v3332_v32, %v3335_v13  ;;  %v3276_v47 = vsel %vm4708_vm6, %v4032_v53, %v3275_v52  ;;  %v3326_v28 = vrot.slane %v3324_v55, 4  ;;  %v3268_v12 = vrot.slane %v5607_v1, 5 }
 0x140   : > { %v3279_v62 = vsel %vm4708_vm6, %v3277_v8, %v3278_v19  ;;  %v3325_v30 = vsel %vm4708_vm6, %v4039_v42, %v3324_v55  ;;  %v4031_v18 = vrot.slane %v4015_v58, 9  ;;  %v3271_v60 = vrot.slane %v5613_v40, 5 }
 0x141   : > { %4216 = vmatpush3.bf16.xpose.msra.mxu0 %v3440_v21  ;;  %v4049_v45 = vcombine.low %v3276_v47, %v3279_v62  ;;  %v3328_v9 = vsel %vm4708_vm6, %v3326_v28, %v3327_v3  ;;  %v3270_v34 = vrot.slane %v3268_v12, 4  ;;  %v3317_v41 = vrot.slane %v5624_v11, 5 }
 0x142   : > { %4296 = vmatprep.subr.msk.bf16.mxu0 %vm733_vm0, %v4059_v26  ;;  %v4056_v17 = vcombine.low %v3325_v30, %v3328_v9  ;;  %v3269_v16 = vsel %vm4708_vm6, %v4031_v18, %v3268_v12  ;;  %v4038_v38 = vrot.slane %v4022_v15, 9  ;;  %v3320_v26 = vrot.slane %v5632_v14, 5 }
 0x143   : > { %v3431_v1 = vsel %vm733_vm0, %v4049_v45, 0  ;;  %v3272_v29 = vsel %vm4708_vm6, %v3270_v34, %v3271_v60  ;;  %v3319_v21 = vrot.slane %v3317_v41, 4  ;;  %v3261_v57 = vrot.slane %v5640_v44, 5 }
 0x144   : > { %v4048_v40 = vcombine.low %v3269_v16, %v3272_v29  ;;  %v4030_v11 = vrot.slane %v4014_v54, 9  ;;  %v3318_v4 = vsel %vm4708_vm6, %v4038_v38, %v3317_v41  ;;  %v3264_v31 = vrot.slane %v5647_v0, 5 }
 0x145   : > { %v3321_v6 = vsel %vm4708_vm6, %v3319_v21, %v3320_v26  ;;  %v3263_v2 = vrot.slane %v3261_v57, 4 }
 0x146   : > { %v3428_v35 = vsel %vm733_vm0, %v4048_v40, 0  ;;  %v4055_v14 = vcombine.low %v3318_v4, %v3321_v6  ;;  %v3262_v44 = vsel %vm4708_vm6, %v4030_v11, %v3261_v57 }
 0x147   : > { %v3265_v37 = vsel %vm4708_vm6, %v3263_v2, %v3264_v31 }
 0x148   : > { %v4047_v61 = vcombine.low %v3262_v44, %v3265_v37 }
 0x149   : > { %4218 = vmatpush3.bf16.xpose.msra.mxu0 %v3437_v24 }
 0x14a   : > { %4297 = vmatprep.subr.msk.bf16.mxu0 %vm733_vm0, %v4058_v50  ;;  %v3425_v36 = vsel %vm733_vm0, %v4047_v61, 0 }
 0x151   : > { %4220 = vmatpush3.bf16.xpose.msra.mxu0 %v3434_v5 }
 0x152   : > { %4298 = vmatprep.subr.msk.bf16.mxu0 %vm733_vm0, %v4057_v7 }
 0x159   : > { %4222 = vmatpush3.bf16.xpose.msra.mxu0 %v3431_v1 }
 0x15a   : > { %4299 = vmatprep.subr.msk.bf16.mxu0 %vm733_vm0, %v4056_v17 }
 0x161   : > { %4224 = vmatpush3.bf16.xpose.msra.mxu0 %v3428_v35 }
 0x162   : > { %4300 = vmatprep.subr.msk.bf16.mxu0 %vm733_vm0, %v4055_v14 }
 0x163   : > { %v1505_v49 = vpop.f32.mrf.mxu1 }
 0x165   : > { %v1507_v63 = vpop.f32.mrf.mxu1 }
 0x167   : > { %v1509_v56 = vpop.f32.mrf.mxu1 }
 0x169   : > { %4226 = vmatpush3.bf16.xpose.msra.mxu0 %v3425_v36  ;;  %v1296_v0 = vpop.f32.mrf.mxu0  ;;  %v1510_v27 = vpop.f32.mrf.mxu1 }
 0x16a   : > { %v1303_v24 = vadd.f32 %v1296_v0, %v5680_v10 }
 0x16b   : > { %v1298_v50 = vpop.f32.mrf.mxu0 }
 0x16c   : > { %v1304_v51 = vadd.f32 %v1298_v50, %v5693_v59  ;;  %v1512_v39 = vadd.f32 %v1505_v49, %v1303_v24 }
 0x16d   : > { %v1300_v48 = vpop.f32.mrf.mxu0 }
 0x16e   : > { %v1513_v22 = vadd.f32 %v1507_v63, %v1304_v51 }
 0x16f   : > { %v1301_v46 = vpop.f32.mrf.mxu0 }
 0x170   : > { %4228 = vmatmul.mubr.msk.bf16.vlgmr.msra.gmra.mxu0 %vm733_vm0, %v5670_v23 }
 0x1aa   : > { %v2081_v33 = vpop.f32.mrf.mxu0 }
 0x1ab   : > { %v2088_v20 = vadd.f32 %v2081_v33, %v1512_v39  ;;  %v2401_v52 = vpop.f32.mrf.mxu1 }
 0x1ac   : > { %v2083_v25 = vpop.f32.mrf.mxu0 }
 0x1ad   : > { %v2089_v32 = vadd.f32 %v2083_v25, %v1513_v22  ;;  %v2408_v53 = vadd.f32 %v2401_v52, %v2088_v20  ;;  %v2403_v13 = vpop.f32.mrf.mxu1 }
 0x1ae   : > { %v2085_v8 = vpop.f32.mrf.mxu0 }
 0x1af   : > { %v2409_v10 = vadd.f32 %v2403_v13, %v2089_v32  ;;  %v2405_v19 = vpop.f32.mrf.mxu1 }
 0x1b0   : > { %v2086_v43 = vpop.f32.mrf.mxu0 }
 0x1b1   : > { %v2406_v59 = vpop.f32.mrf.mxu1 }
 0x1b7   : > { %v3519_v30 = vpop.permute.xlu0 %3518 }
 0x1ea   : > { %v2610_v55 = vpop.f32.mrf.mxu0 }
 0x1eb   : > { %v2617_v5 = vadd.f32 %v2610_v55, %v2408_v53 }
 0x1ec   : > { %v2612_v7 = vpop.f32.mrf.mxu0 }
 0x1ed   : > { %v2618_v47 = vadd.f32 %v2612_v7, %v2409_v10 }
 0x1ee   : > { %v2614_v42 = vpop.f32.mrf.mxu0 }
 0x1f0   : > { %v2615_v62 = vpop.f32.mrf.mxu0 }
 0x1f5   : > { %v3186_v23 = vpop.f32.mrf.mxu1 }
 0x1f6   : > { %v3193_v12 = vadd.f32 %v3186_v23, %v2617_v5 }
 0x1f7   : > { %v3188_v28 = vpop.f32.mrf.mxu1 }
 0x1f8   : > { %v3194_v18 = vadd.f32 %v3188_v28, %v2618_v47 }
 0x1f9   : > { %v3190_v3 = vpop.f32.mrf.mxu1 }
 0x1fb   : > { %v3191_v58 = vpop.f32.mrf.mxu1 }
 0x230   : > { %v3506_v45 = vpop.f32.mrf.mxu0 }
 0x231   : > { %v3513_v9 = vadd.f32 %v3506_v45, %v3193_v12 }
 0x232   : > { %v3508_v34 = vpop.f32.mrf.mxu0 }
 0x233   : > { %v3521_v60 = vadd.f32 %v3519_v30, %v3513_v9  ;;  %v3514_v15 = vadd.f32 %v3508_v34, %v3194_v18 }
 0x234   : > { %v3510_v41 = vpop.f32.mrf.mxu0 }
 0x235   : > { %3523 = vst [vmem:[%s237_s24] sm:$0xff] %v3521_v60  ;;  %v3522_v1 = vadd.f32 %v3519_v30, %v3514_v15  ;;  %v3530_v38 = vmul.f32 %v3521_v60, %v3521_v60 }
 0x236   : > { %v3511_v17 = vpop.f32.mrf.mxu0 }
 0x237   : > { %3524 = vst [vmem:[%s237_s24 + $0x8] sm:$0xff] %v3522_v1  ;;  %v3525_v16 = vadd.f32 %v3522_v1, %v3521_v60  ;;  %v3531_v29 = vmul.f32 %v3522_v1, %v3522_v1 }
 0x239   : > { %3526 = vadd.xlane.f32.xlu0 %v3525_v16  ;;  %v3532_v21 = vadd.f32 %v3531_v29, %v3530_v38 }
 0x23b   : > { %3533 = vadd.xlane.f32.xlu1 %v3532_v21 }
 0x2c2   : > { %v3527_v26 = vpop.xlane.xlu0 %3526 }
 0x2c3   : > { %3529 = vst.msk [vmem:[%s241_s28] sm:$0xff] %vm3528_vm7, %v3527_v26 }
 0x2c4   : > { %v3534_v54 = vpop.xlane.xlu1 %3533 }
 0x2c5   : > { %3535 = vst.msk [vmem:[%s245_s6] sm:$0xff] %vm3528_vm7, %v3534_v54 }
 0x2c6 PF: > { %s16_s18 = sadd.s32 1, %s4366_s18  }
 0x2c7   : > { %p13_p4 = scmp.ge.s32.totalorder %s16_s18, 4  }
 0x2c9   :  { %15 = sbr.rel (!%p13_p4) target bundleno = 1 (0x1), region = 96 }

</bundles_post_ra>
